<compile_context>
chip_gen: v6e
topology: v6e:2x2x1
jax: 0.10.0
libtpu: 0.0.40
codegen_flags: <defaults>
</compile_context>

<pallas_src>
import functools

import jax
import jax.numpy as jnp
from jax.experimental import pallas as pl
from jax.experimental.pallas import tpu as pltpu

# ---- constants implied by the PyTorch module ----
FEATURES_PER_LANDMARK = 2
NUM_LANDMARKS = 21
FEATURES_PER_HAND = NUM_LANDMARKS * FEATURES_PER_LANDMARK   # 42
INPUT_SIZE = FEATURES_PER_HAND * 2                          # 168
HIDDEN_SIZE = 128
NUM_LAYERS = 2
NUM_CLASSES = 10
NUM_CLASSES_PADDED = 128                                    # lane-dense logits, sliced in wrapper


def lstm_kernel(xf_ref, wih0_ref, whh0_ref, b0_ref, b1_ref, bfc_ref,
                wl1_hbm, wfc_hbm,
                out_ref,
                wl1_vmem, wfc_vmem, sem, *, B, T):
    H = HIDDEN_SIZE
    bf = jnp.bfloat16

    # Weights only needed later: start their HBM->VMEM DMAs now so they overlap the
    # batched layer-0 projection (and step 0 of the recurrence), instead of being part
    # of the up-front input DMA bill.
    wl1_copy = pltpu.make_async_copy(wl1_hbm, wl1_vmem, sem.at[0])
    wfc_copy = pltpu.make_async_copy(wfc_hbm, wfc_vmem, sem.at[1])
    wl1_copy.start()
    wfc_copy.start()

    # Batched layer-0 input projection for all timesteps, time-major: one
    # (T*B, D) @ (D, 4H) MXU matmul; only h_prev @ W_hh remains on the serial path.
    g0_all = jnp.dot(xf_ref[...].astype(bf), wih0_ref[...],
                     preferred_element_type=jnp.float32)            # (T*B, 4H) f32
    g0_all = g0_all + b0_ref[...]

    # Hoist the (1,4H) -> (B,4H) bias broadcast out of the time loop (JAX doesn't CSE it).
    b1 = jnp.broadcast_to(b1_ref[...], (B, 4 * H))

    def act(gates, c_prev):
        # gate order is [i, f, o, g]: one contiguous sigmoid pass + one tanh pass.
        sg = jax.nn.sigmoid(gates[:, :3 * H])
        i = sg[:, 0 * H:1 * H]
        f = sg[:, 1 * H:2 * H]
        o = sg[:, 2 * H:3 * H]
        g = jnp.tanh(gates[:, 3 * H:4 * H])
        c = f * c_prev + i * g
        # single bf16 cast where the hidden state is produced (its only consumers are
        # MXU matmuls); cell state stays f32.
        h = (o * jnp.tanh(c)).astype(bf)
        return h, c

    # State carried as plain values (a few vregs each) -- no VMEM scratch round-trips.
    h0 = jnp.zeros((B, H), bf)
    c0 = jnp.zeros((B, H), jnp.float32)
    h1 = jnp.zeros((B, H), bf)
    c1 = jnp.zeros((B, H), jnp.float32)

    # T is small and static: full trace-time unroll keeps every index static and lets
    # the scheduler see the whole recurrence.
    for t in range(T):
        # layer 0: recurrent part only (input projection precomputed above);
        # contiguous static row slice of the time-major gate buffer.
        g0 = g0_all[t * B:(t + 1) * B, :] + jnp.dot(
            h0, whh0_ref[...], preferred_element_type=jnp.float32)
        h0, c0 = act(g0, c0)

        if t == 0:
            # fused layer-1 weight first needed here; DMA has been in flight since entry.
            wl1_copy.wait()

        # layer 1: single fused K=2H matmul (inter-layer LSTM dropout is identity in eval).
        g1 = jnp.dot(jnp.concatenate([h0, h1], axis=-1), wl1_vmem[...],
                     preferred_element_type=jnp.float32) + b1
        h1, c1 = act(g1, c1)

    # nn.Dropout(p=0.5) on the last hidden state is identity in eval mode.
    # TODO(synk): training-mode dropout (p=0.5) not implemented; forward matches eval semantics.
    wfc_copy.wait()
    out_ref[...] = (jnp.dot(h1, wfc_vmem[...], preferred_element_type=jnp.float32)
                    + bfc_ref[...]).astype(out_ref.dtype)


def hand_gesture_lstm_forward(x, kp):
    """x: (B, T, INPUT_SIZE) float32 -> logits (B, NUM_CLASSES) float32."""
    B, T, D = x.shape
    C_PAD = kp["wfc"].shape[1]

    # Time-major layout: the transpose touches ~10 KB, trivially cheap, and makes the
    # per-step gate fetch inside the kernel a contiguous static slice.
    x_tm = jnp.transpose(x, (1, 0, 2)).reshape(T * B, D)

    vmem = pl.BlockSpec(memory_space=pltpu.MemorySpace.VMEM)
    hbm = pl.BlockSpec(memory_space=pl.ANY)   # manually DMA'd inside the kernel

    out = pl.pallas_call(
        functools.partial(lstm_kernel, B=B, T=T),
        out_shape=jax.ShapeDtypeStruct((B, C_PAD), jnp.float32),
        in_specs=[vmem, vmem, vmem, vmem, vmem, vmem, hbm, hbm],
        out_specs=vmem,
        scratch_shapes=[
            pltpu.VMEM(kp["wl1"].shape, kp["wl1"].dtype),   # fused layer-1 weight buffer
            pltpu.VMEM(kp["wfc"].shape, kp["wfc"].dtype),   # fc weight buffer
            pltpu.SemaphoreType.DMA((2,)),
        ],
    )(x_tm, kp["wih0"], kp["whh0"], kp["b0"], kp["b1"], kp["bfc"],
      kp["wl1"], kp["wfc"])

    return out[:, :NUM_CLASSES]


def init_params(key):
    """PyTorch-layout parameters: W_ih (4H, in), W_hh (4H, H), biases (4H,), fc (C, H)."""
    H, D, C = HIDDEN_SIZE, INPUT_SIZE, NUM_CLASSES
    bound = 1.0 / (H ** 0.5)
    ks = jax.random.split(key, 10)
    u = lambda k, shape: jax.random.uniform(k, shape, jnp.float32, -bound, bound)
    return {
        "w_ih_l0": u(ks[0], (4 * H, D)), "w_hh_l0": u(ks[1], (4 * H, H)),
        "b_ih_l0": u(ks[2], (4 * H,)),   "b_hh_l0": u(ks[3], (4 * H,)),
        "w_ih_l1": u(ks[4], (4 * H, H)), "w_hh_l1": u(ks[5], (4 * H, H)),
        "b_ih_l1": u(ks[6], (4 * H,)),   "b_hh_l1": u(ks[7], (4 * H,)),
        "fc_w": u(ks[8], (C, H)),        "fc_b": u(ks[9], (C,)),
    }


def prepare_params(tp):
    """Kernel layout: transposed, gate order [i,f,o,g], combined biases, bf16 weights,
    layer-1 input/recurrent weights fused to (2H, 4H), fc padded to NUM_CLASSES_PADDED lanes."""
    H, C, C_PAD = HIDDEN_SIZE, NUM_CLASSES, NUM_CLASSES_PADDED

    def reorder(rows):  # torch gate order [i,f,g,o] -> [i,f,o,g] along leading 4H axis
        return jnp.concatenate([rows[:2 * H], rows[3 * H:4 * H], rows[2 * H:3 * H]], axis=0)

    def wt(w):          # (4H, K) -> (K, 4H) bf16
        return jnp.asarray(reorder(w).T, dtype=jnp.bfloat16)

    def bias(b_ih, b_hh):
        return reorder(b_ih + b_hh).reshape(1, 4 * H).astype(jnp.float32)

    # Fused layer-1 weight: [h0, h1] @ [W_ih_l1^T; W_hh_l1^T]  == h0@W_ih^T + h1@W_hh^T
    wl1 = jnp.concatenate([wt(tp["w_ih_l1"]), wt(tp["w_hh_l1"])], axis=0)   # (2H, 4H) bf16

    wfc = jnp.zeros((H, C_PAD), jnp.float32).at[:, :C].set(tp["fc_w"].T).astype(jnp.bfloat16)
    bfc = jnp.zeros((1, C_PAD), jnp.float32).at[0, :C].set(tp["fc_b"])
    return {
        "wih0": wt(tp["w_ih_l0"]), "whh0": wt(tp["w_hh_l0"]),
        "b0": bias(tp["b_ih_l0"], tp["b_hh_l0"]),
        "wl1": wl1,
        "b1": bias(tp["b_ih_l1"], tp["b_hh_l1"]),
        "wfc": wfc, "bfc": bfc,
    }


def reference_forward(x, tp):
    """Pure-JAX reference of the same forward pass (bf16 weights/activations for the
    matmuls, f32 accumulation/state) for correctness checking."""
    B = x.shape[0]
    H = HIDDEN_SIZE
    bf = jnp.bfloat16

    def cell(inp, h, c, wih, whh, b_ih, b_hh):
        gates = (jnp.dot(inp.astype(bf), wih.T.astype(bf), preferred_element_type=jnp.float32)
                 + jnp.dot(h.astype(bf), whh.T.astype(bf), preferred_element_type=jnp.float32)
                 + b_ih + b_hh)
        i, f, g, o = jnp.split(gates, 4, axis=-1)
        c = jax.nn.sigmoid(f) * c + jax.nn.sigmoid(i) * jnp.tanh(g)
        h = jax.nn.sigmoid(o) * jnp.tanh(c)
        return h, c

    def step(carry, x_t):
        h0, c0, h1, c1 = carry
        h0, c0 = cell(x_t, h0, c0, tp["w_ih_l0"], tp["w_hh_l0"], tp["b_ih_l0"], tp["b_hh_l0"])
        h1, c1 = cell(h0, h1, c1, tp["w_ih_l1"], tp["w_hh_l1"], tp["b_ih_l1"], tp["b_hh_l1"])
        return (h0, c0, h1, c1), None

    init = tuple(jnp.zeros((B, H), jnp.float32) for _ in range(4))
    (h0, c0, h1, c1), _ = jax.lax.scan(step, init, jnp.transpose(x, (1, 0, 2)))
    return (jnp.dot(h1.astype(bf), tp["fc_w"].T.astype(bf), preferred_element_type=jnp.float32)
            + tp["fc_b"])


if __name__ == "__main__":
    key = jax.random.PRNGKey(0)
    k_x, k_p = jax.random.split(key)

    B, T = 2, 8
    x = jax.random.normal(k_x, (B, T, INPUT_SIZE), jnp.float32)
    torch_params = init_params(k_p)
    kernel_params = prepare_params(torch_params)

    out = hand_gesture_lstm_forward(x, kernel_params)
    out = jax.block_until_ready(out)

    ref = reference_forward(x, torch_params)
    assert out.shape == (B, NUM_CLASSES)
    assert jnp.allclose(out, ref, atol=1e-3, rtol=1e-3), "mismatch vs JAX reference"

    print("KERNEL_OK")
</pallas_src>

<mosaic_0001>
module attributes {stable_mosaic.version = 11 : i64} {
  func.func @lstm_kernel(%arg0: memref<16x84xf32, #tpu.memory_space<vmem>>, %arg1: memref<84x512xbf16, #tpu.memory_space<vmem>>, %arg2: memref<128x512xbf16, #tpu.memory_space<vmem>>, %arg3: memref<1x512xf32, #tpu.memory_space<vmem>>, %arg4: memref<1x512xf32, #tpu.memory_space<vmem>>, %arg5: memref<1x128xf32, #tpu.memory_space<vmem>>, %arg6: memref<256x512xbf16, #tpu.memory_space<any>>, %arg7: memref<128x128xbf16, #tpu.memory_space<any>>, %arg8: memref<2x128xf32, #tpu.memory_space<vmem>>, %arg9: memref<256x512xbf16, #tpu.memory_space<vmem>>, %arg10: memref<128x128xbf16, #tpu.memory_space<vmem>>, %arg11: memref<2x!tpu.dma_semaphore, #tpu.memory_space<semaphore_mem>>) attributes {dimension_semantics = [], scalar_prefetch = 0 : i64, scratch_operands = 3 : i64, tpu.core_type = #tpu.core_type<tc>} {
    %c0_i32 = arith.constant 0 : i32
    %0 = tpu.memref_slice %arg11[%c0_i32] : memref<2x!tpu.dma_semaphore, #tpu.memory_space<semaphore_mem>> -> memref<1x!tpu.dma_semaphore, #tpu.memory_space<semaphore_mem>>
    %1 = tpu.memref_squeeze %0 : memref<1x!tpu.dma_semaphore, #tpu.memory_space<semaphore_mem>> -> memref<!tpu.dma_semaphore, #tpu.memory_space<semaphore_mem>>
    tpu.enqueue_dma source(%arg6 : memref<256x512xbf16, #tpu.memory_space<any>>) target(%arg9 : memref<256x512xbf16, #tpu.memory_space<vmem>>) target_semaphore(%1 : memref<!tpu.dma_semaphore, #tpu.memory_space<semaphore_mem>>)
    %c1_i32 = arith.constant 1 : i32
    %2 = tpu.memref_slice %arg11[%c1_i32] : memref<2x!tpu.dma_semaphore, #tpu.memory_space<semaphore_mem>> -> memref<1x!tpu.dma_semaphore, #tpu.memory_space<semaphore_mem>>
    %3 = tpu.memref_squeeze %2 : memref<1x!tpu.dma_semaphore, #tpu.memory_space<semaphore_mem>> -> memref<!tpu.dma_semaphore, #tpu.memory_space<semaphore_mem>>
    tpu.enqueue_dma source(%arg7 : memref<128x128xbf16, #tpu.memory_space<any>>) target(%arg10 : memref<128x128xbf16, #tpu.memory_space<vmem>>) target_semaphore(%3 : memref<!tpu.dma_semaphore, #tpu.memory_space<semaphore_mem>>)
    %c0 = arith.constant 0 : index
    %c0_0 = arith.constant 0 : index
    %4 = vector.load %arg0[%c0, %c0_0] : memref<16x84xf32, #tpu.memory_space<vmem>>, vector<16x84xf32>
    %5 = arith.truncf %4 : vector<16x84xf32> to vector<16x84xbf16>
    %c0_1 = arith.constant 0 : index
    %c0_2 = arith.constant 0 : index
    %6 = vector.load %arg1[%c0_1, %c0_2] : memref<84x512xbf16, #tpu.memory_space<vmem>>, vector<84x512xbf16>
    %cst = arith.constant dense<0.000000e+00> : vector<16x512xf32>
    %7 = tpu.matmul %5, %6, %cst {dimension_numbers = #tpu.dot_dimension_numbers<[1], [0], [0], [1], [0, 0, 1, 1], [], []>} : vector<16x84xbf16>, vector<84x512xbf16>, vector<16x512xf32> -> vector<16x512xf32>
    %c0_3 = arith.constant 0 : index
    %c0_4 = arith.constant 0 : index
    %8 = vector.load %arg3[%c0_3, %c0_4] : memref<1x512xf32, #tpu.memory_space<vmem>>, vector<1x512xf32>
    %9 = vector.broadcast %8 : vector<1x512xf32> to vector<16x512xf32>
    %10 = arith.addf %7, %9 : vector<16x512xf32>
    %c0_5 = arith.constant 0 : index
    %c0_6 = arith.constant 0 : index
    %11 = vector.load %arg4[%c0_5, %c0_6] : memref<1x512xf32, #tpu.memory_space<vmem>>, vector<1x512xf32>
    %12 = vector.shape_cast %11 : vector<1x512xf32> to vector<1x512xf32>
    %13 = vector.broadcast %12 : vector<1x512xf32> to vector<2x512xf32>
    %cst_7 = arith.constant 0.000000e+00 : bf16
    %14 = vector.broadcast %cst_7 : bf16 to vector<2x128xbf16>
    %cst_8 = arith.constant 0.000000e+00 : f32
    %15 = vector.broadcast %cst_8 : f32 to vector<2x128xf32>
    %cst_9 = arith.constant 0.000000e+00 : bf16
    %16 = vector.broadcast %cst_9 : bf16 to vector<2x128xbf16>
    %cst_10 = arith.constant 0.000000e+00 : f32
    %17 = vector.broadcast %cst_10 : f32 to vector<2x128xf32>
    %18 = vector.extract_strided_slice %10 {offsets = [0, 0], sizes = [2, 512], strides = [1, 1]} : vector<16x512xf32> to vector<2x512xf32>
    %c0_11 = arith.constant 0 : index
    %c0_12 = arith.constant 0 : index
    %19 = vector.load %arg2[%c0_11, %c0_12] : memref<128x512xbf16, #tpu.memory_space<vmem>>, vector<128x512xbf16>
    %cst_13 = arith.constant dense<0.000000e+00> : vector<2x512xf32>
    %20 = tpu.matmul %14, %19, %cst_13 {dimension_numbers = #tpu.dot_dimension_numbers<[1], [0], [0], [1], [0, 0, 1, 1], [], []>} : vector<2x128xbf16>, vector<128x512xbf16>, vector<2x512xf32> -> vector<2x512xf32>
    %21 = arith.addf %18, %20 : vector<2x512xf32>
    %22 = vector.extract_strided_slice %21 {offsets = [0, 0], sizes = [2, 384], strides = [1, 1]} : vector<2x512xf32> to vector<2x384xf32>
    %23 = arith.negf %22 : vector<2x384xf32>
    %24 = math.exp %23 : vector<2x384xf32>
    %cst_14 = arith.constant 1.000000e+00 : f32
    %25 = vector.broadcast %cst_14 : f32 to vector<2x384xf32>
    %26 = arith.addf %25, %24 : vector<2x384xf32>
    %27 = arith.divf %25, %26 : vector<2x384xf32>
    %28 = vector.extract_strided_slice %27 {offsets = [0, 0], sizes = [2, 128], strides = [1, 1]} : vector<2x384xf32> to vector<2x128xf32>
    %29 = vector.extract_strided_slice %27 {offsets = [0, 128], sizes = [2, 128], strides = [1, 1]} : vector<2x384xf32> to vector<2x128xf32>
    %30 = vector.extract_strided_slice %27 {offsets = [0, 256], sizes = [2, 128], strides = [1, 1]} : vector<2x384xf32> to vector<2x128xf32>
    %31 = vector.extract_strided_slice %21 {offsets = [0, 384], sizes = [2, 128], strides = [1, 1]} : vector<2x512xf32> to vector<2x128xf32>
    %32 = math.tanh %31 : vector<2x128xf32>
    %33 = arith.mulf %29, %15 : vector<2x128xf32>
    %34 = arith.mulf %28, %32 : vector<2x128xf32>
    %35 = arith.addf %33, %34 : vector<2x128xf32>
    %36 = math.tanh %35 : vector<2x128xf32>
    %37 = arith.mulf %30, %36 : vector<2x128xf32>
    %38 = arith.truncf %37 : vector<2x128xf32> to vector<2x128xbf16>
    %c0_i32_15 = arith.constant 0 : i32
    %39 = tpu.memref_slice %arg11[%c0_i32_15] : memref<2x!tpu.dma_semaphore, #tpu.memory_space<semaphore_mem>> -> memref<1x!tpu.dma_semaphore, #tpu.memory_space<semaphore_mem>>
    %40 = tpu.memref_squeeze %39 : memref<1x!tpu.dma_semaphore, #tpu.memory_space<semaphore_mem>> -> memref<!tpu.dma_semaphore, #tpu.memory_space<semaphore_mem>>
    tpu.wait_dma2 semaphore(%40 : memref<!tpu.dma_semaphore, #tpu.memory_space<semaphore_mem>>) src(%arg6 : memref<256x512xbf16, #tpu.memory_space<any>>) dst(%arg9 : memref<256x512xbf16, #tpu.memory_space<vmem>>)
    %41 = tpu.concatenate %38, %16 in 1 : vector<2x128xbf16>, vector<2x128xbf16> -> vector<2x256xbf16>
    %c0_16 = arith.constant 0 : index
    %c0_17 = arith.constant 0 : index
    %42 = vector.load %arg9[%c0_16, %c0_17] : memref<256x512xbf16, #tpu.memory_space<vmem>>, vector<256x512xbf16>
    %cst_18 = arith.constant dense<0.000000e+00> : vector<2x512xf32>
    %43 = tpu.matmul %41, %42, %cst_18 {dimension_numbers = #tpu.dot_dimension_numbers<[1], [0], [0], [1], [0, 0, 1, 1], [], []>} : vector<2x256xbf16>, vector<256x512xbf16>, vector<2x512xf32> -> vector<2x512xf32>
    %44 = arith.addf %43, %13 : vector<2x512xf32>
    %45 = vector.extract_strided_slice %44 {offsets = [0, 0], sizes = [2, 384], strides = [1, 1]} : vector<2x512xf32> to vector<2x384xf32>
    %46 = arith.negf %45 : vector<2x384xf32>
    %47 = math.exp %46 : vector<2x384xf32>
    %cst_19 = arith.constant 1.000000e+00 : f32
    %48 = vector.broadcast %cst_19 : f32 to vector<2x384xf32>
    %49 = arith.addf %48, %47 : vector<2x384xf32>
    %50 = arith.divf %48, %49 : vector<2x384xf32>
    %51 = vector.extract_strided_slice %50 {offsets = [0, 0], sizes = [2, 128], strides = [1, 1]} : vector<2x384xf32> to vector<2x128xf32>
    %52 = vector.extract_strided_slice %50 {offsets = [0, 128], sizes = [2, 128], strides = [1, 1]} : vector<2x384xf32> to vector<2x128xf32>
    %53 = vector.extract_strided_slice %50 {offsets = [0, 256], sizes = [2, 128], strides = [1, 1]} : vector<2x384xf32> to vector<2x128xf32>
    %54 = vector.extract_strided_slice %44 {offsets = [0, 384], sizes = [2, 128], strides = [1, 1]} : vector<2x512xf32> to vector<2x128xf32>
    %55 = math.tanh %54 : vector<2x128xf32>
    %56 = arith.mulf %52, %17 : vector<2x128xf32>
    %57 = arith.mulf %51, %55 : vector<2x128xf32>
    %58 = arith.addf %56, %57 : vector<2x128xf32>
    %59 = math.tanh %58 : vector<2x128xf32>
    %60 = arith.mulf %53, %59 : vector<2x128xf32>
    %61 = arith.truncf %60 : vector<2x128xf32> to vector<2x128xbf16>
    %62 = vector.extract_strided_slice %10 {offsets = [2, 0], sizes = [2, 512], strides = [1, 1]} : vector<16x512xf32> to vector<2x512xf32>
    %c0_20 = arith.constant 0 : index
    %c0_21 = arith.constant 0 : index
    %63 = vector.load %arg2[%c0_20, %c0_21] : memref<128x512xbf16, #tpu.memory_space<vmem>>, vector<128x512xbf16>
    %cst_22 = arith.constant dense<0.000000e+00> : vector<2x512xf32>
    %64 = tpu.matmul %38, %63, %cst_22 {dimension_numbers = #tpu.dot_dimension_numbers<[1], [0], [0], [1], [0, 0, 1, 1], [], []>} : vector<2x128xbf16>, vector<128x512xbf16>, vector<2x512xf32> -> vector<2x512xf32>
    %65 = arith.addf %62, %64 : vector<2x512xf32>
    %66 = vector.extract_strided_slice %65 {offsets = [0, 0], sizes = [2, 384], strides = [1, 1]} : vector<2x512xf32> to vector<2x384xf32>
    %67 = arith.negf %66 : vector<2x384xf32>
    %68 = math.exp %67 : vector<2x384xf32>
    %cst_23 = arith.constant 1.000000e+00 : f32
    %69 = vector.broadcast %cst_23 : f32 to vector<2x384xf32>
    %70 = arith.addf %69, %68 : vector<2x384xf32>
    %71 = arith.divf %69, %70 : vector<2x384xf32>
    %72 = vector.extract_strided_slice %71 {offsets = [0, 0], sizes = [2, 128], strides = [1, 1]} : vector<2x384xf32> to vector<2x128xf32>
    %73 = vector.extract_strided_slice %71 {offsets = [0, 128], sizes = [2, 128], strides = [1, 1]} : vector<2x384xf32> to vector<2x128xf32>
    %74 = vector.extract_strided_slice %71 {offsets = [0, 256], sizes = [2, 128], strides = [1, 1]} : vector<2x384xf32> to vector<2x128xf32>
    %75 = vector.extract_strided_slice %65 {offsets = [0, 384], sizes = [2, 128], strides = [1, 1]} : vector<2x512xf32> to vector<2x128xf32>
    %76 = math.tanh %75 : vector<2x128xf32>
    %77 = arith.mulf %73, %35 : vector<2x128xf32>
    %78 = arith.mulf %72, %76 : vector<2x128xf32>
    %79 = arith.addf %77, %78 : vector<2x128xf32>
    %80 = math.tanh %79 : vector<2x128xf32>
    %81 = arith.mulf %74, %80 : vector<2x128xf32>
    %82 = arith.truncf %81 : vector<2x128xf32> to vector<2x128xbf16>
    %83 = tpu.concatenate %82, %61 in 1 : vector<2x128xbf16>, vector<2x128xbf16> -> vector<2x256xbf16>
    %c0_24 = arith.constant 0 : index
    %c0_25 = arith.constant 0 : index
    %84 = vector.load %arg9[%c0_24, %c0_25] : memref<256x512xbf16, #tpu.memory_space<vmem>>, vector<256x512xbf16>
    %cst_26 = arith.constant dense<0.000000e+00> : vector<2x512xf32>
    %85 = tpu.matmul %83, %84, %cst_26 {dimension_numbers = #tpu.dot_dimension_numbers<[1], [0], [0], [1], [0, 0, 1, 1], [], []>} : vector<2x256xbf16>, vector<256x512xbf16>, vector<2x512xf32> -> vector<2x512xf32>
    %86 = arith.addf %85, %13 : vector<2x512xf32>
    %87 = vector.extract_strided_slice %86 {offsets = [0, 0], sizes = [2, 384], strides = [1, 1]} : vector<2x512xf32> to vector<2x384xf32>
    %88 = arith.negf %87 : vector<2x384xf32>
    %89 = math.exp %88 : vector<2x384xf32>
    %cst_27 = arith.constant 1.000000e+00 : f32
    %90 = vector.broadcast %cst_27 : f32 to vector<2x384xf32>
    %91 = arith.addf %90, %89 : vector<2x384xf32>
    %92 = arith.divf %90, %91 : vector<2x384xf32>
    %93 = vector.extract_strided_slice %92 {offsets = [0, 0], sizes = [2, 128], strides = [1, 1]} : vector<2x384xf32> to vector<2x128xf32>
    %94 = vector.extract_strided_slice %92 {offsets = [0, 128], sizes = [2, 128], strides = [1, 1]} : vector<2x384xf32> to vector<2x128xf32>
    %95 = vector.extract_strided_slice %92 {offsets = [0, 256], sizes = [2, 128], strides = [1, 1]} : vector<2x384xf32> to vector<2x128xf32>
    %96 = vector.extract_strided_slice %86 {offsets = [0, 384], sizes = [2, 128], strides = [1, 1]} : vector<2x512xf32> to vector<2x128xf32>
    %97 = math.tanh %96 : vector<2x128xf32>
    %98 = arith.mulf %94, %58 : vector<2x128xf32>
    %99 = arith.mulf %93, %97 : vector<2x128xf32>
    %100 = arith.addf %98, %99 : vector<2x128xf32>
    %101 = math.tanh %100 : vector<2x128xf32>
    %102 = arith.mulf %95, %101 : vector<2x128xf32>
    %103 = arith.truncf %102 : vector<2x128xf32> to vector<2x128xbf16>
    %104 = vector.extract_strided_slice %10 {offsets = [4, 0], sizes = [2, 512], strides = [1, 1]} : vector<16x512xf32> to vector<2x512xf32>
    %c0_28 = arith.constant 0 : index
    %c0_29 = arith.constant 0 : index
    %105 = vector.load %arg2[%c0_28, %c0_29] : memref<128x512xbf16, #tpu.memory_space<vmem>>, vector<128x512xbf16>
    %cst_30 = arith.constant dense<0.000000e+00> : vector<2x512xf32>
    %106 = tpu.matmul %82, %105, %cst_30 {dimension_numbers = #tpu.dot_dimension_numbers<[1], [0], [0], [1], [0, 0, 1, 1], [], []>} : vector<2x128xbf16>, vector<128x512xbf16>, vector<2x512xf32> -> vector<2x512xf32>
    %107 = arith.addf %104, %106 : vector<2x512xf32>
    %108 = vector.extract_strided_slice %107 {offsets = [0, 0], sizes = [2, 384], strides = [1, 1]} : vector<2x512xf32> to vector<2x384xf32>
    %109 = arith.negf %108 : vector<2x384xf32>
    %110 = math.exp %109 : vector<2x384xf32>
    %cst_31 = arith.constant 1.000000e+00 : f32
    %111 = vector.broadcast %cst_31 : f32 to vector<2x384xf32>
    %112 = arith.addf %111, %110 : vector<2x384xf32>
    %113 = arith.divf %111, %112 : vector<2x384xf32>
    %114 = vector.extract_strided_slice %113 {offsets = [0, 0], sizes = [2, 128], strides = [1, 1]} : vector<2x384xf32> to vector<2x128xf32>
    %115 = vector.extract_strided_slice %113 {offsets = [0, 128], sizes = [2, 128], strides = [1, 1]} : vector<2x384xf32> to vector<2x128xf32>
    %116 = vector.extract_strided_slice %113 {offsets = [0, 256], sizes = [2, 128], strides = [1, 1]} : vector<2x384xf32> to vector<2x128xf32>
    %117 = vector.extract_strided_slice %107 {offsets = [0, 384], sizes = [2, 128], strides = [1, 1]} : vector<2x512xf32> to vector<2x128xf32>
    %118 = math.tanh %117 : vector<2x128xf32>
    %119 = arith.mulf %115, %79 : vector<2x128xf32>
    %120 = arith.mulf %114, %118 : vector<2x128xf32>
    %121 = arith.addf %119, %120 : vector<2x128xf32>
    %122 = math.tanh %121 : vector<2x128xf32>
    %123 = arith.mulf %116, %122 : vector<2x128xf32>
    %124 = arith.truncf %123 : vector<2x128xf32> to vector<2x128xbf16>
    %125 = tpu.concatenate %124, %103 in 1 : vector<2x128xbf16>, vector<2x128xbf16> -> vector<2x256xbf16>
    %c0_32 = arith.constant 0 : index
    %c0_33 = arith.constant 0 : index
    %126 = vector.load %arg9[%c0_32, %c0_33] : memref<256x512xbf16, #tpu.memory_space<vmem>>, vector<256x512xbf16>
    %cst_34 = arith.constant dense<0.000000e+00> : vector<2x512xf32>
    %127 = tpu.matmul %125, %126, %cst_34 {dimension_numbers = #tpu.dot_dimension_numbers<[1], [0], [0], [1], [0, 0, 1, 1], [], []>} : vector<2x256xbf16>, vector<256x512xbf16>, vector<2x512xf32> -> vector<2x512xf32>
    %128 = arith.addf %127, %13 : vector<2x512xf32>
    %129 = vector.extract_strided_slice %128 {offsets = [0, 0], sizes = [2, 384], strides = [1, 1]} : vector<2x512xf32> to vector<2x384xf32>
    %130 = arith.negf %129 : vector<2x384xf32>
    %131 = math.exp %130 : vector<2x384xf32>
    %cst_35 = arith.constant 1.000000e+00 : f32
    %132 = vector.broadcast %cst_35 : f32 to vector<2x384xf32>
    %133 = arith.addf %132, %131 : vector<2x384xf32>
    %134 = arith.divf %132, %133 : vector<2x384xf32>
    %135 = vector.extract_strided_slice %134 {offsets = [0, 0], sizes = [2, 128], strides = [1, 1]} : vector<2x384xf32> to vector<2x128xf32>
    %136 = vector.extract_strided_slice %134 {offsets = [0, 128], sizes = [2, 128], strides = [1, 1]} : vector<2x384xf32> to vector<2x128xf32>
    %137 = vector.extract_strided_slice %134 {offsets = [0, 256], sizes = [2, 128], strides = [1, 1]} : vector<2x384xf32> to vector<2x128xf32>
    %138 = vector.extract_strided_slice %128 {offsets = [0, 384], sizes = [2, 128], strides = [1, 1]} : vector<2x512xf32> to vector<2x128xf32>
    %139 = math.tanh %138 : vector<2x128xf32>
    %140 = arith.mulf %136, %100 : vector<2x128xf32>
    %141 = arith.mulf %135, %139 : vector<2x128xf32>
    %142 = arith.addf %140, %141 : vector<2x128xf32>
    %143 = math.tanh %142 : vector<2x128xf32>
    %144 = arith.mulf %137, %143 : vector<2x128xf32>
    %145 = arith.truncf %144 : vector<2x128xf32> to vector<2x128xbf16>
    %146 = vector.extract_strided_slice %10 {offsets = [6, 0], sizes = [2, 512], strides = [1, 1]} : vector<16x512xf32> to vector<2x512xf32>
    %c0_36 = arith.constant 0 : index
    %c0_37 = arith.constant 0 : index
    %147 = vector.load %arg2[%c0_36, %c0_37] : memref<128x512xbf16, #tpu.memory_space<vmem>>, vector<128x512xbf16>
    %cst_38 = arith.constant dense<0.000000e+00> : vector<2x512xf32>
    %148 = tpu.matmul %124, %147, %cst_38 {dimension_numbers = #tpu.dot_dimension_numbers<[1], [0], [0], [1], [0, 0, 1, 1], [], []>} : vector<2x128xbf16>, vector<128x512xbf16>, vector<2x512xf32> -> vector<2x512xf32>
    %149 = arith.addf %146, %148 : vector<2x512xf32>
    %150 = vector.extract_strided_slice %149 {offsets = [0, 0], sizes = [2, 384], strides = [1, 1]} : vector<2x512xf32> to vector<2x384xf32>
    %151 = arith.negf %150 : vector<2x384xf32>
    %152 = math.exp %151 : vector<2x384xf32>
    %cst_39 = arith.constant 1.000000e+00 : f32
    %153 = vector.broadcast %cst_39 : f32 to vector<2x384xf32>
    %154 = arith.addf %153, %152 : vector<2x384xf32>
    %155 = arith.divf %153, %154 : vector<2x384xf32>
    %156 = vector.extract_strided_slice %155 {offsets = [0, 0], sizes = [2, 128], strides = [1, 1]} : vector<2x384xf32> to vector<2x128xf32>
    %157 = vector.extract_strided_slice %155 {offsets = [0, 128], sizes = [2, 128], strides = [1, 1]} : vector<2x384xf32> to vector<2x128xf32>
    %158 = vector.extract_strided_slice %155 {offsets = [0, 256], sizes = [2, 128], strides = [1, 1]} : vector<2x384xf32> to vector<2x128xf32>
    %159 = vector.extract_strided_slice %149 {offsets = [0, 384], sizes = [2, 128], strides = [1, 1]} : vector<2x512xf32> to vector<2x128xf32>
    %160 = math.tanh %159 : vector<2x128xf32>
    %161 = arith.mulf %157, %121 : vector<2x128xf32>
    %162 = arith.mulf %156, %160 : vector<2x128xf32>
    %163 = arith.addf %161, %162 : vector<2x128xf32>
    %164 = math.tanh %163 : vector<2x128xf32>
    %165 = arith.mulf %158, %164 : vector<2x128xf32>
    %166 = arith.truncf %165 : vector<2x128xf32> to vector<2x128xbf16>
    %167 = tpu.concatenate %166, %145 in 1 : vector<2x128xbf16>, vector<2x128xbf16> -> vector<2x256xbf16>
    %c0_40 = arith.constant 0 : index
    %c0_41 = arith.constant 0 : index
    %168 = vector.load %arg9[%c0_40, %c0_41] : memref<256x512xbf16, #tpu.memory_space<vmem>>, vector<256x512xbf16>
    %cst_42 = arith.constant dense<0.000000e+00> : vector<2x512xf32>
    %169 = tpu.matmul %167, %168, %cst_42 {dimension_numbers = #tpu.dot_dimension_numbers<[1], [0], [0], [1], [0, 0, 1, 1], [], []>} : vector<2x256xbf16>, vector<256x512xbf16>, vector<2x512xf32> -> vector<2x512xf32>
    %170 = arith.addf %169, %13 : vector<2x512xf32>
    %171 = vector.extract_strided_slice %170 {offsets = [0, 0], sizes = [2, 384], strides = [1, 1]} : vector<2x512xf32> to vector<2x384xf32>
    %172 = arith.negf %171 : vector<2x384xf32>
    %173 = math.exp %172 : vector<2x384xf32>
    %cst_43 = arith.constant 1.000000e+00 : f32
    %174 = vector.broadcast %cst_43 : f32 to vector<2x384xf32>
    %175 = arith.addf %174, %173 : vector<2x384xf32>
    %176 = arith.divf %174, %175 : vector<2x384xf32>
    %177 = vector.extract_strided_slice %176 {offsets = [0, 0], sizes = [2, 128], strides = [1, 1]} : vector<2x384xf32> to vector<2x128xf32>
    %178 = vector.extract_strided_slice %176 {offsets = [0, 128], sizes = [2, 128], strides = [1, 1]} : vector<2x384xf32> to vector<2x128xf32>
    %179 = vector.extract_strided_slice %176 {offsets = [0, 256], sizes = [2, 128], strides = [1, 1]} : vector<2x384xf32> to vector<2x128xf32>
    %180 = vector.extract_strided_slice %170 {offsets = [0, 384], sizes = [2, 128], strides = [1, 1]} : vector<2x512xf32> to vector<2x128xf32>
    %181 = math.tanh %180 : vector<2x128xf32>
    %182 = arith.mulf %178, %142 : vector<2x128xf32>
    %183 = arith.mulf %177, %181 : vector<2x128xf32>
    %184 = arith.addf %182, %183 : vector<2x128xf32>
    %185 = math.tanh %184 : vector<2x128xf32>
    %186 = arith.mulf %179, %185 : vector<2x128xf32>
    %187 = arith.truncf %186 : vector<2x128xf32> to vector<2x128xbf16>
    %188 = vector.extract_strided_slice %10 {offsets = [8, 0], sizes = [2, 512], strides = [1, 1]} : vector<16x512xf32> to vector<2x512xf32>
    %c0_44 = arith.constant 0 : index
    %c0_45 = arith.constant 0 : index
    %189 = vector.load %arg2[%c0_44, %c0_45] : memref<128x512xbf16, #tpu.memory_space<vmem>>, vector<128x512xbf16>
    %cst_46 = arith.constant dense<0.000000e+00> : vector<2x512xf32>
    %190 = tpu.matmul %166, %189, %cst_46 {dimension_numbers = #tpu.dot_dimension_numbers<[1], [0], [0], [1], [0, 0, 1, 1], [], []>} : vector<2x128xbf16>, vector<128x512xbf16>, vector<2x512xf32> -> vector<2x512xf32>
    %191 = arith.addf %188, %190 : vector<2x512xf32>
    %192 = vector.extract_strided_slice %191 {offsets = [0, 0], sizes = [2, 384], strides = [1, 1]} : vector<2x512xf32> to vector<2x384xf32>
    %193 = arith.negf %192 : vector<2x384xf32>
    %194 = math.exp %193 : vector<2x384xf32>
    %cst_47 = arith.constant 1.000000e+00 : f32
    %195 = vector.broadcast %cst_47 : f32 to vector<2x384xf32>
    %196 = arith.addf %195, %194 : vector<2x384xf32>
    %197 = arith.divf %195, %196 : vector<2x384xf32>
    %198 = vector.extract_strided_slice %197 {offsets = [0, 0], sizes = [2, 128], strides = [1, 1]} : vector<2x384xf32> to vector<2x128xf32>
    %199 = vector.extract_strided_slice %197 {offsets = [0, 128], sizes = [2, 128], strides = [1, 1]} : vector<2x384xf32> to vector<2x128xf32>
    %200 = vector.extract_strided_slice %197 {offsets = [0, 256], sizes = [2, 128], strides = [1, 1]} : vector<2x384xf32> to vector<2x128xf32>
    %201 = vector.extract_strided_slice %191 {offsets = [0, 384], sizes = [2, 128], strides = [1, 1]} : vector<2x512xf32> to vector<2x128xf32>
    %202 = math.tanh %201 : vector<2x128xf32>
    %203 = arith.mulf %199, %163 : vector<2x128xf32>
    %204 = arith.mulf %198, %202 : vector<2x128xf32>
    %205 = arith.addf %203, %204 : vector<2x128xf32>
    %206 = math.tanh %205 : vector<2x128xf32>
    %207 = arith.mulf %200, %206 : vector<2x128xf32>
    %208 = arith.truncf %207 : vector<2x128xf32> to vector<2x128xbf16>
    %209 = tpu.concatenate %208, %187 in 1 : vector<2x128xbf16>, vector<2x128xbf16> -> vector<2x256xbf16>
    %c0_48 = arith.constant 0 : index
    %c0_49 = arith.constant 0 : index
    %210 = vector.load %arg9[%c0_48, %c0_49] : memref<256x512xbf16, #tpu.memory_space<vmem>>, vector<256x512xbf16>
    %cst_50 = arith.constant dense<0.000000e+00> : vector<2x512xf32>
    %211 = tpu.matmul %209, %210, %cst_50 {dimension_numbers = #tpu.dot_dimension_numbers<[1], [0], [0], [1], [0, 0, 1, 1], [], []>} : vector<2x256xbf16>, vector<256x512xbf16>, vector<2x512xf32> -> vector<2x512xf32>
    %212 = arith.addf %211, %13 : vector<2x512xf32>
    %213 = vector.extract_strided_slice %212 {offsets = [0, 0], sizes = [2, 384], strides = [1, 1]} : vector<2x512xf32> to vector<2x384xf32>
    %214 = arith.negf %213 : vector<2x384xf32>
    %215 = math.exp %214 : vector<2x384xf32>
    %cst_51 = arith.constant 1.000000e+00 : f32
    %216 = vector.broadcast %cst_51 : f32 to vector<2x384xf32>
    %217 = arith.addf %216, %215 : vector<2x384xf32>
    %218 = arith.divf %216, %217 : vector<2x384xf32>
    %219 = vector.extract_strided_slice %218 {offsets = [0, 0], sizes = [2, 128], strides = [1, 1]} : vector<2x384xf32> to vector<2x128xf32>
    %220 = vector.extract_strided_slice %218 {offsets = [0, 128], sizes = [2, 128], strides = [1, 1]} : vector<2x384xf32> to vector<2x128xf32>
    %221 = vector.extract_strided_slice %218 {offsets = [0, 256], sizes = [2, 128], strides = [1, 1]} : vector<2x384xf32> to vector<2x128xf32>
    %222 = vector.extract_strided_slice %212 {offsets = [0, 384], sizes = [2, 128], strides = [1, 1]} : vector<2x512xf32> to vector<2x128xf32>
    %223 = math.tanh %222 : vector<2x128xf32>
    %224 = arith.mulf %220, %184 : vector<2x128xf32>
    %225 = arith.mulf %219, %223 : vector<2x128xf32>
    %226 = arith.addf %224, %225 : vector<2x128xf32>
    %227 = math.tanh %226 : vector<2x128xf32>
    %228 = arith.mulf %221, %227 : vector<2x128xf32>
    %229 = arith.truncf %228 : vector<2x128xf32> to vector<2x128xbf16>
    %230 = vector.extract_strided_slice %10 {offsets = [10, 0], sizes = [2, 512], strides = [1, 1]} : vector<16x512xf32> to vector<2x512xf32>
    %c0_52 = arith.constant 0 : index
    %c0_53 = arith.constant 0 : index
    %231 = vector.load %arg2[%c0_52, %c0_53] : memref<128x512xbf16, #tpu.memory_space<vmem>>, vector<128x512xbf16>
    %cst_54 = arith.constant dense<0.000000e+00> : vector<2x512xf32>
    %232 = tpu.matmul %208, %231, %cst_54 {dimension_numbers = #tpu.dot_dimension_numbers<[1], [0], [0], [1], [0, 0, 1, 1], [], []>} : vector<2x128xbf16>, vector<128x512xbf16>, vector<2x512xf32> -> vector<2x512xf32>
    %233 = arith.addf %230, %232 : vector<2x512xf32>
    %234 = vector.extract_strided_slice %233 {offsets = [0, 0], sizes = [2, 384], strides = [1, 1]} : vector<2x512xf32> to vector<2x384xf32>
    %235 = arith.negf %234 : vector<2x384xf32>
    %236 = math.exp %235 : vector<2x384xf32>
    %cst_55 = arith.constant 1.000000e+00 : f32
    %237 = vector.broadcast %cst_55 : f32 to vector<2x384xf32>
    %238 = arith.addf %237, %236 : vector<2x384xf32>
    %239 = arith.divf %237, %238 : vector<2x384xf32>
    %240 = vector.extract_strided_slice %239 {offsets = [0, 0], sizes = [2, 128], strides = [1, 1]} : vector<2x384xf32> to vector<2x128xf32>
    %241 = vector.extract_strided_slice %239 {offsets = [0, 128], sizes = [2, 128], strides = [1, 1]} : vector<2x384xf32> to vector<2x128xf32>
    %242 = vector.extract_strided_slice %239 {offsets = [0, 256], sizes = [2, 128], strides = [1, 1]} : vector<2x384xf32> to vector<2x128xf32>
    %243 = vector.extract_strided_slice %233 {offsets = [0, 384], sizes = [2, 128], strides = [1, 1]} : vector<2x512xf32> to vector<2x128xf32>
    %244 = math.tanh %243 : vector<2x128xf32>
    %245 = arith.mulf %241, %205 : vector<2x128xf32>
    %246 = arith.mulf %240, %244 : vector<2x128xf32>
    %247 = arith.addf %245, %246 : vector<2x128xf32>
    %248 = math.tanh %247 : vector<2x128xf32>
    %249 = arith.mulf %242, %248 : vector<2x128xf32>
    %250 = arith.truncf %249 : vector<2x128xf32> to vector<2x128xbf16>
    %251 = tpu.concatenate %250, %229 in 1 : vector<2x128xbf16>, vector<2x128xbf16> -> vector<2x256xbf16>
    %c0_56 = arith.constant 0 : index
    %c0_57 = arith.constant 0 : index
    %252 = vector.load %arg9[%c0_56, %c0_57] : memref<256x512xbf16, #tpu.memory_space<vmem>>, vector<256x512xbf16>
    %cst_58 = arith.constant dense<0.000000e+00> : vector<2x512xf32>
    %253 = tpu.matmul %251, %252, %cst_58 {dimension_numbers = #tpu.dot_dimension_numbers<[1], [0], [0], [1], [0, 0, 1, 1], [], []>} : vector<2x256xbf16>, vector<256x512xbf16>, vector<2x512xf32> -> vector<2x512xf32>
    %254 = arith.addf %253, %13 : vector<2x512xf32>
    %255 = vector.extract_strided_slice %254 {offsets = [0, 0], sizes = [2, 384], strides = [1, 1]} : vector<2x512xf32> to vector<2x384xf32>
    %256 = arith.negf %255 : vector<2x384xf32>
    %257 = math.exp %256 : vector<2x384xf32>
    %cst_59 = arith.constant 1.000000e+00 : f32
    %258 = vector.broadcast %cst_59 : f32 to vector<2x384xf32>
    %259 = arith.addf %258, %257 : vector<2x384xf32>
    %260 = arith.divf %258, %259 : vector<2x384xf32>
    %261 = vector.extract_strided_slice %260 {offsets = [0, 0], sizes = [2, 128], strides = [1, 1]} : vector<2x384xf32> to vector<2x128xf32>
    %262 = vector.extract_strided_slice %260 {offsets = [0, 128], sizes = [2, 128], strides = [1, 1]} : vector<2x384xf32> to vector<2x128xf32>
    %263 = vector.extract_strided_slice %260 {offsets = [0, 256], sizes = [2, 128], strides = [1, 1]} : vector<2x384xf32> to vector<2x128xf32>
    %264 = vector.extract_strided_slice %254 {offsets = [0, 384], sizes = [2, 128], strides = [1, 1]} : vector<2x512xf32> to vector<2x128xf32>
    %265 = math.tanh %264 : vector<2x128xf32>
    %266 = arith.mulf %262, %226 : vector<2x128xf32>
    %267 = arith.mulf %261, %265 : vector<2x128xf32>
    %268 = arith.addf %266, %267 : vector<2x128xf32>
    %269 = math.tanh %268 : vector<2x128xf32>
    %270 = arith.mulf %263, %269 : vector<2x128xf32>
    %271 = arith.truncf %270 : vector<2x128xf32> to vector<2x128xbf16>
    %272 = vector.extract_strided_slice %10 {offsets = [12, 0], sizes = [2, 512], strides = [1, 1]} : vector<16x512xf32> to vector<2x512xf32>
    %c0_60 = arith.constant 0 : index
    %c0_61 = arith.constant 0 : index
    %273 = vector.load %arg2[%c0_60, %c0_61] : memref<128x512xbf16, #tpu.memory_space<vmem>>, vector<128x512xbf16>
    %cst_62 = arith.constant dense<0.000000e+00> : vector<2x512xf32>
    %274 = tpu.matmul %250, %273, %cst_62 {dimension_numbers = #tpu.dot_dimension_numbers<[1], [0], [0], [1], [0, 0, 1, 1], [], []>} : vector<2x128xbf16>, vector<128x512xbf16>, vector<2x512xf32> -> vector<2x512xf32>
    %275 = arith.addf %272, %274 : vector<2x512xf32>
    %276 = vector.extract_strided_slice %275 {offsets = [0, 0], sizes = [2, 384], strides = [1, 1]} : vector<2x512xf32> to vector<2x384xf32>
    %277 = arith.negf %276 : vector<2x384xf32>
    %278 = math.exp %277 : vector<2x384xf32>
    %cst_63 = arith.constant 1.000000e+00 : f32
    %279 = vector.broadcast %cst_63 : f32 to vector<2x384xf32>
    %280 = arith.addf %279, %278 : vector<2x384xf32>
    %281 = arith.divf %279, %280 : vector<2x384xf32>
    %282 = vector.extract_strided_slice %281 {offsets = [0, 0], sizes = [2, 128], strides = [1, 1]} : vector<2x384xf32> to vector<2x128xf32>
    %283 = vector.extract_strided_slice %281 {offsets = [0, 128], sizes = [2, 128], strides = [1, 1]} : vector<2x384xf32> to vector<2x128xf32>
    %284 = vector.extract_strided_slice %281 {offsets = [0, 256], sizes = [2, 128], strides = [1, 1]} : vector<2x384xf32> to vector<2x128xf32>
    %285 = vector.extract_strided_slice %275 {offsets = [0, 384], sizes = [2, 128], strides = [1, 1]} : vector<2x512xf32> to vector<2x128xf32>
    %286 = math.tanh %285 : vector<2x128xf32>
    %287 = arith.mulf %283, %247 : vector<2x128xf32>
    %288 = arith.mulf %282, %286 : vector<2x128xf32>
    %289 = arith.addf %287, %288 : vector<2x128xf32>
    %290 = math.tanh %289 : vector<2x128xf32>
    %291 = arith.mulf %284, %290 : vector<2x128xf32>
    %292 = arith.truncf %291 : vector<2x128xf32> to vector<2x128xbf16>
    %293 = tpu.concatenate %292, %271 in 1 : vector<2x128xbf16>, vector<2x128xbf16> -> vector<2x256xbf16>
    %c0_64 = arith.constant 0 : index
    %c0_65 = arith.constant 0 : index
    %294 = vector.load %arg9[%c0_64, %c0_65] : memref<256x512xbf16, #tpu.memory_space<vmem>>, vector<256x512xbf16>
    %cst_66 = arith.constant dense<0.000000e+00> : vector<2x512xf32>
    %295 = tpu.matmul %293, %294, %cst_66 {dimension_numbers = #tpu.dot_dimension_numbers<[1], [0], [0], [1], [0, 0, 1, 1], [], []>} : vector<2x256xbf16>, vector<256x512xbf16>, vector<2x512xf32> -> vector<2x512xf32>
    %296 = arith.addf %295, %13 : vector<2x512xf32>
    %297 = vector.extract_strided_slice %296 {offsets = [0, 0], sizes = [2, 384], strides = [1, 1]} : vector<2x512xf32> to vector<2x384xf32>
    %298 = arith.negf %297 : vector<2x384xf32>
    %299 = math.exp %298 : vector<2x384xf32>
    %cst_67 = arith.constant 1.000000e+00 : f32
    %300 = vector.broadcast %cst_67 : f32 to vector<2x384xf32>
    %301 = arith.addf %300, %299 : vector<2x384xf32>
    %302 = arith.divf %300, %301 : vector<2x384xf32>
    %303 = vector.extract_strided_slice %302 {offsets = [0, 0], sizes = [2, 128], strides = [1, 1]} : vector<2x384xf32> to vector<2x128xf32>
    %304 = vector.extract_strided_slice %302 {offsets = [0, 128], sizes = [2, 128], strides = [1, 1]} : vector<2x384xf32> to vector<2x128xf32>
    %305 = vector.extract_strided_slice %302 {offsets = [0, 256], sizes = [2, 128], strides = [1, 1]} : vector<2x384xf32> to vector<2x128xf32>
    %306 = vector.extract_strided_slice %296 {offsets = [0, 384], sizes = [2, 128], strides = [1, 1]} : vector<2x512xf32> to vector<2x128xf32>
    %307 = math.tanh %306 : vector<2x128xf32>
    %308 = arith.mulf %304, %268 : vector<2x128xf32>
    %309 = arith.mulf %303, %307 : vector<2x128xf32>
    %310 = arith.addf %308, %309 : vector<2x128xf32>
    %311 = math.tanh %310 : vector<2x128xf32>
    %312 = arith.mulf %305, %311 : vector<2x128xf32>
    %313 = arith.truncf %312 : vector<2x128xf32> to vector<2x128xbf16>
    %314 = vector.extract_strided_slice %10 {offsets = [14, 0], sizes = [2, 512], strides = [1, 1]} : vector<16x512xf32> to vector<2x512xf32>
    %c0_68 = arith.constant 0 : index
    %c0_69 = arith.constant 0 : index
    %315 = vector.load %arg2[%c0_68, %c0_69] : memref<128x512xbf16, #tpu.memory_space<vmem>>, vector<128x512xbf16>
    %cst_70 = arith.constant dense<0.000000e+00> : vector<2x512xf32>
    %316 = tpu.matmul %292, %315, %cst_70 {dimension_numbers = #tpu.dot_dimension_numbers<[1], [0], [0], [1], [0, 0, 1, 1], [], []>} : vector<2x128xbf16>, vector<128x512xbf16>, vector<2x512xf32> -> vector<2x512xf32>
    %317 = arith.addf %314, %316 : vector<2x512xf32>
    %318 = vector.extract_strided_slice %317 {offsets = [0, 0], sizes = [2, 384], strides = [1, 1]} : vector<2x512xf32> to vector<2x384xf32>
    %319 = arith.negf %318 : vector<2x384xf32>
    %320 = math.exp %319 : vector<2x384xf32>
    %cst_71 = arith.constant 1.000000e+00 : f32
    %321 = vector.broadcast %cst_71 : f32 to vector<2x384xf32>
    %322 = arith.addf %321, %320 : vector<2x384xf32>
    %323 = arith.divf %321, %322 : vector<2x384xf32>
    %324 = vector.extract_strided_slice %323 {offsets = [0, 0], sizes = [2, 128], strides = [1, 1]} : vector<2x384xf32> to vector<2x128xf32>
    %325 = vector.extract_strided_slice %323 {offsets = [0, 128], sizes = [2, 128], strides = [1, 1]} : vector<2x384xf32> to vector<2x128xf32>
    %326 = vector.extract_strided_slice %323 {offsets = [0, 256], sizes = [2, 128], strides = [1, 1]} : vector<2x384xf32> to vector<2x128xf32>
    %327 = vector.extract_strided_slice %317 {offsets = [0, 384], sizes = [2, 128], strides = [1, 1]} : vector<2x512xf32> to vector<2x128xf32>
    %328 = math.tanh %327 : vector<2x128xf32>
    %329 = arith.mulf %325, %289 : vector<2x128xf32>
    %330 = arith.mulf %324, %328 : vector<2x128xf32>
    %331 = arith.addf %329, %330 : vector<2x128xf32>
    %332 = math.tanh %331 : vector<2x128xf32>
    %333 = arith.mulf %326, %332 : vector<2x128xf32>
    %334 = arith.truncf %333 : vector<2x128xf32> to vector<2x128xbf16>
    %335 = tpu.concatenate %334, %313 in 1 : vector<2x128xbf16>, vector<2x128xbf16> -> vector<2x256xbf16>
    %c0_72 = arith.constant 0 : index
    %c0_73 = arith.constant 0 : index
    %336 = vector.load %arg9[%c0_72, %c0_73] : memref<256x512xbf16, #tpu.memory_space<vmem>>, vector<256x512xbf16>
    %cst_74 = arith.constant dense<0.000000e+00> : vector<2x512xf32>
    %337 = tpu.matmul %335, %336, %cst_74 {dimension_numbers = #tpu.dot_dimension_numbers<[1], [0], [0], [1], [0, 0, 1, 1], [], []>} : vector<2x256xbf16>, vector<256x512xbf16>, vector<2x512xf32> -> vector<2x512xf32>
    %338 = arith.addf %337, %13 : vector<2x512xf32>
    %339 = vector.extract_strided_slice %338 {offsets = [0, 0], sizes = [2, 384], strides = [1, 1]} : vector<2x512xf32> to vector<2x384xf32>
    %340 = arith.negf %339 : vector<2x384xf32>
    %341 = math.exp %340 : vector<2x384xf32>
    %cst_75 = arith.constant 1.000000e+00 : f32
    %342 = vector.broadcast %cst_75 : f32 to vector<2x384xf32>
    %343 = arith.addf %342, %341 : vector<2x384xf32>
    %344 = arith.divf %342, %343 : vector<2x384xf32>
    %345 = vector.extract_strided_slice %344 {offsets = [0, 0], sizes = [2, 128], strides = [1, 1]} : vector<2x384xf32> to vector<2x128xf32>
    %346 = vector.extract_strided_slice %344 {offsets = [0, 128], sizes = [2, 128], strides = [1, 1]} : vector<2x384xf32> to vector<2x128xf32>
    %347 = vector.extract_strided_slice %344 {offsets = [0, 256], sizes = [2, 128], strides = [1, 1]} : vector<2x384xf32> to vector<2x128xf32>
    %348 = vector.extract_strided_slice %338 {offsets = [0, 384], sizes = [2, 128], strides = [1, 1]} : vector<2x512xf32> to vector<2x128xf32>
    %349 = math.tanh %348 : vector<2x128xf32>
    %350 = arith.mulf %346, %310 : vector<2x128xf32>
    %351 = arith.mulf %345, %349 : vector<2x128xf32>
    %352 = arith.addf %350, %351 : vector<2x128xf32>
    %353 = math.tanh %352 : vector<2x128xf32>
    %354 = arith.mulf %347, %353 : vector<2x128xf32>
    %355 = arith.truncf %354 : vector<2x128xf32> to vector<2x128xbf16>
    %c1_i32_76 = arith.constant 1 : i32
    %356 = tpu.memref_slice %arg11[%c1_i32_76] : memref<2x!tpu.dma_semaphore, #tpu.memory_space<semaphore_mem>> -> memref<1x!tpu.dma_semaphore, #tpu.memory_space<semaphore_mem>>
    %357 = tpu.memref_squeeze %356 : memref<1x!tpu.dma_semaphore, #tpu.memory_space<semaphore_mem>> -> memref<!tpu.dma_semaphore, #tpu.memory_space<semaphore_mem>>
    tpu.wait_dma2 semaphore(%357 : memref<!tpu.dma_semaphore, #tpu.memory_space<semaphore_mem>>) src(%arg7 : memref<128x128xbf16, #tpu.memory_space<any>>) dst(%arg10 : memref<128x128xbf16, #tpu.memory_space<vmem>>)
    %c0_77 = arith.constant 0 : index
    %c0_78 = arith.constant 0 : index
    %358 = vector.load %arg10[%c0_77, %c0_78] : memref<128x128xbf16, #tpu.memory_space<vmem>>, vector<128x128xbf16>
    %cst_79 = arith.constant dense<0.000000e+00> : vector<2x128xf32>
    %359 = tpu.matmul %355, %358, %cst_79 {dimension_numbers = #tpu.dot_dimension_numbers<[1], [0], [0], [1], [0, 0, 1, 1], [], []>} : vector<2x128xbf16>, vector<128x128xbf16>, vector<2x128xf32> -> vector<2x128xf32>
    %c0_80 = arith.constant 0 : index
    %c0_81 = arith.constant 0 : index
    %360 = vector.load %arg5[%c0_80, %c0_81] : memref<1x128xf32, #tpu.memory_space<vmem>>, vector<1x128xf32>
    %361 = vector.broadcast %360 : vector<1x128xf32> to vector<2x128xf32>
    %362 = arith.addf %359, %361 : vector<2x128xf32>
    %c0_82 = arith.constant 0 : index
    %c0_83 = arith.constant 0 : index
    %363 = vector.load %arg8[%c0_82, %c0_83] : memref<2x128xf32, #tpu.memory_space<vmem>>, vector<2x128xf32>
    tpu.vector_store %arg8[%c0_82, %c0_83], %362 {strides = array<i32>} : memref<2x128xf32, #tpu.memory_space<vmem>>, vector<2x128xf32>,
    return
  }
}

</mosaic_0001>

<bundles_post_ra>
// kernel: tpu_custom_call.1
= control target key start
LH: loop header
LB: loop body
LE: loop exit
PB: predicated region body
PF: predicated region fallthrough
CT: control target
= control target key end

     0   :  { %13 = vsyncpa [#allocation6], 0  ;;  %s5772_s0 = inlined_call_operand.hbm [shape: f32[16,84], index: 0, kind: input, shape index: {}]   ;;  %s5773_s1 = inlined_call_operand.hbm [shape: bf16[84,512], index: 1, kind: input, shape index: {}]   ;;  %s5774_s2 = inlined_call_operand.hbm [shape: bf16[128,512], index: 2, kind: input, shape index: {}]   ;;  %s5775_s3 = inlined_call_operand.vmem [shape: f32[1,512], index: 3, kind: input, shape index: {}]   ;;  %s5776_s4 = inlined_call_operand.hbm [shape: f32[1,512], index: 4, kind: input, shape index: {}]   ;;  %s5777_s5 = inlined_call_operand.vmem [shape: f32[1,128], index: 5, kind: input, shape index: {}]   ;;  %s5778_s6 = inlined_call_operand.hbm [shape: bf16[256,512], index: 6, kind: input, shape index: {}]   ;;  %s5779_s7 = inlined_call_operand.hbm [shape: bf16[128,128], index: 7, kind: input, shape index: {}]   ;;  %s5780_s8 = inlined_call_operand.hbm [shape: f32[2,128], index: 8, kind: output, shape index: {}]  }
   0x1   :  { %14 = vsyncpa [#allocation9], 0 }
   0x2   :  { %15 = vsyncpa [#allocation12], 0 }
   0x3   :  { %16 = vsyncpa [#allocation7], 0  ;;  %s4274_s27 = smov [#allocation8]  }
   0x4   :  { %s34_s28 = sshll.u32 %s4274_s27, 4  ;;  %s35_s28 = int_to_ptr.vmem [resolvable:$true] %s34_s28 }
   0x5   :  { %s4130_s29 = scalar_lea.vmem %s35_s28, 2816  ;;  %p4135_p1 = scmp.lt.s32.totalorder %s35_s28, %s35_s28 }
   0x6   :  { %p4131_p0 = scmp.ne.s32.totalorder %s35_s28, %s4130_s29  ;;  %p4136_p2 = scmp.lt.s32.totalorder %s4130_s29, %s4130_s29 }
   0x8   :  { %p4137_p3 = por %p4136_p2, %p4135_p1 }
   0xa   :  { %p4138_p4 = pnand %p4137_p3, %p4131_p0 }
   0xc   :  { %4141 = shalt.err (!%p4138_p4)
}
   0xd   :  { %s4275_s30 = smov 256   ;;  %s4276_s9 = smov 16  }
   0xe   :  { %40 = dma.hbm_to_vmem [thread:$0]  %s5773_s1, 2816, %s35_s28, [#allocation9], %s4275_s30, %s4275_s30, %s4276_s9  }
   0xf   :  { %s4277_s12 = smov [#allocation5]  }
  0x10   :  { %s22_s13 = sshll.u32 %s4277_s12, 4  ;;  %s23_s13 = int_to_ptr.vmem [resolvable:$true] %s22_s13 }
  0x11   :  { %s4150_s14 = scalar_lea.vmem %s23_s13, 256  ;;  %p4155_p6 = scmp.lt.s32.totalorder %s23_s13, %s23_s13 }
  0x12   :  { %p4151_p5 = scmp.ne.s32.totalorder %s23_s13, %s4150_s14  ;;  %p4156_p7 = scmp.lt.s32.totalorder %s4150_s14, %s4150_s14 }
  0x14   :  { %p4157_p8 = por %p4156_p7, %p4155_p6 }
  0x16   :  { %p4158_p9 = pnand %p4157_p8, %p4151_p5 }
  0x18   :  { %4161 = shalt.err (!%p4158_p9)
}
  0x19   :  { %s4278_s15 = smov 128   ;;  %s4279_s16 = smov 8  }
  0x1a   :  { %28 = dma.hbm_to_vmem [thread:$0]  %s5772_s0, 256, %s23_s13, [#allocation6], %s4278_s15, %s4278_s15, %s4279_s16  }
  0x1b   :  { %s4280_s19 = smov [#allocation10]   ;;  %s4281_s21 = smov [#allocation11]  }
  0x1c   :  { %s46_s20 = sshll.u32 %s4280_s19, 4  ;;  %s61_s1 = sshll.u32 %s4281_s21, 4  ;;  %s47_s20 = int_to_ptr.vmem [resolvable:$true] %s46_s20  ;;  %s62_s1 = int_to_ptr.vmem [resolvable:$true] %s61_s1 }
  0x1d   :  { %s4170_s22 = scalar_lea.vmem %s47_s20, 4096  ;;  %p4175_p11 = scmp.lt.s32.totalorder %s47_s20, %s47_s20 }
  0x1e   :  { %p4171_p10 = scmp.ne.s32.totalorder %s47_s20, %s4170_s22  ;;  %p4176_p12 = scmp.lt.s32.totalorder %s4170_s22, %s4170_s22 }
  0x20   :  { %p4177_p13 = por %p4176_p12, %p4175_p11 }
  0x22   :  { %p4178_p0 = pnand %p4177_p13, %p4171_p10 }
  0x24   :  { %4181 = shalt.err (!%p4178_p0)
}
  0x25   :  { %52 = dma.hbm_to_vmem [thread:$0]  %s5774_s2, 4096, %s47_s20, [#allocation9], %s4275_s30, %s4275_s30, %s4276_s9  }
  0x26   :  { %s4190_s0 = scalar_lea.vmem %s62_s1, 64  ;;  %p4195_p2 = scmp.lt.s32.totalorder %s62_s1, %s62_s1 }
  0x27   :  { %p4191_p1 = scmp.ne.s32.totalorder %s62_s1, %s4190_s0  ;;  %p4196_p3 = scmp.lt.s32.totalorder %s4190_s0, %s4190_s0 }
  0x29   :  { %p4197_p4 = por %p4196_p3, %p4195_p2 }
  0x2b   :  { %p4198_p5 = pnand %p4197_p4, %p4191_p1 }
  0x2d   :  { %4201 = shalt.err (!%p4198_p5)
}
  0x2e   :  { %64 = dma.hbm_to_vmem [thread:$0]  %s5776_s4, 64, %s62_s1, [#allocation12]  }
  0x2f   :  { %4262 = dma.done.wait [#allocation6], 256  }
  0x30   :  { %4263 = vsyncadd [#allocation6], 4294967040 }
  0x31   :  { %4264 = dma.done.wait [#allocation9], 6912  }
  0x32   :  { %4265 = vsyncadd [#allocation9], 4294960384 }
  0x33   :  { %4266 = dma.done.wait [#allocation12], 64  }
  0x34   :  { %4267 = vsyncadd [#allocation12], 4294967232  ;;  %v5781_v0 = vmov 0   ;;  %v126_v1 = vld [vmem:[#allocation8 + $0xa0] sm:$0x33]  ;;  %vm264_vm0 = vcmask 1041408  }
  0x35   :  { %309 = vmatprep.mubr.bf16.mxu1 %v5781_v0  ;;  %609 = vmatprep.mubr.bf16.mxu0 %v5781_v0  ;;  %v3203_v2 = vcombine.high %v126_v1, %v126_v1  ;;  %v3441_v3 = vld [vmem:[#allocation10 + $0xe4] ss:$16 sps:$4 sm:$0xff]   ;;  %v3202_v4 = vcombine.low %v126_v1, %v126_v1  ;;  %v3444_v5 = vld [vmem:[#allocation10 + $0xe0] ss:$16 sps:$4 sm:$0xff]   ;;  %v127_v26 = vld [vmem:[#allocation8 + $0xa8] sm:$0x33]  ;;  %v130_v1 = vlaneseq }
  0x36   :  { %v3445_v6 = vld [vmem:[#allocation8 + $0x84] ss:$16 sps:$4 sm:$0xff]   ;;  %577 = vmatprep.subr.bf16.mxu0 %v3441_v3  ;;  %v3449_v9 = vld [vmem:[#allocation8 + $0x80] ss:$16 sps:$4 sm:$0xff]   ;;  %v104_v29 = vld [vmem:[#allocation5 + $0x8] sm:$0xff]  ;;  %v3205_v30 = vcombine.high %v127_v26, %v127_v26  ;;  %v3204_v32 = vcombine.low %v127_v26, %v127_v26  ;;  %vm260_vm1 = vcmask 687104  }
  0x37   :  { %3206 = vmatprep.subr.msk.bf16.mxu1 %vm264_vm0, %v3203_v2  ;;  %v266_v7 = vsel %vm264_vm0, %v3202_v4, 0  ;;  %v3447_v8 = vld [vmem:[#allocation10 + $0xc4] ss:$16 sps:$4 sm:$0xff]   ;;  %578 = vmatpush1.bf16.msra.mxu0 %v3444_v5  ;;  %v3450_v10 = vld [vmem:[#allocation10 + $0xc0] ss:$16 sps:$4 sm:$0xff]   ;;  %v131_v2 = vshrl.u32 %v130_v1, 7 }
  0x38   :  { %282 = vmatpush1.bf16.msra.mxu1 %v266_v7  ;;  %579 = vmatprep.subr.bf16.mxu0 %v3447_v8  ;;  %v3451_v11 = vld [vmem:[#allocation8 + $0x64] ss:$16 sps:$4 sm:$0xff]   ;;  %v3455_v13 = vld [vmem:[#allocation8 + $0x60] ss:$16 sps:$4 sm:$0xff]   ;;  %v3482_v35 = vld [vmem:[#allocation8 + $0x8c] ss:$16 sps:$4 sm:$0xff]  }
  0x39   :  { %283 = vmatprep.subr.bf16.mxu1 %v3445_v6  ;;  %v3453_v12 = vld [vmem:[#allocation10 + $0xa4] ss:$16 sps:$4 sm:$0xff]   ;;  %v3456_v14 = vld [vmem:[#allocation10 + $0xa0] ss:$16 sps:$4 sm:$0xff]   ;;  %v272_v36 = vsel %vm264_vm0, %v3204_v32, 0  ;;  %v132_v3 = vsub.s32 0, %v131_v2 }
  0x3a   :  { %v3457_v15 = vld [vmem:[#allocation8 + $0x44] ss:$16 sps:$4 sm:$0xff]   ;;  %v3461_v17 = vld [vmem:[#allocation8 + $0x40] ss:$16 sps:$4 sm:$0xff]   ;;  %v3480_v38 = vld [vmem:[#allocation8 + $0x88] ss:$16 sps:$4 sm:$0xff]  }
  0x3b   :  { %580 = vmatpush1.bf16.msra.mxu0 %v3450_v10  ;;  %v3459_v16 = vld [vmem:[#allocation10 + $0x84] ss:$16 sps:$4 sm:$0xff]   ;;  %v3462_v18 = vld [vmem:[#allocation10 + $0x80] ss:$16 sps:$4 sm:$0xff]   ;;  %v3488_v40 = vld [vmem:[#allocation8 + $0x6c] ss:$16 sps:$4 sm:$0xff]  }
  0x3c   :  { %284 = vmatpush1.bf16.msra.mxu1 %v3449_v9  ;;  %581 = vmatprep.subr.bf16.mxu0 %v3453_v12  ;;  %v3463_v19 = vld [vmem:[#allocation8 + $0x24] ss:$16 sps:$4 sm:$0xff]   ;;  %v3467_v21 = vld [vmem:[#allocation8 + $0x20] ss:$16 sps:$4 sm:$0xff]   ;;  %v3486_v41 = vld [vmem:[#allocation8 + $0x68] ss:$16 sps:$4 sm:$0xff]  }
  0x3d   :  { %285 = vmatprep.subr.bf16.mxu1 %v3451_v11  ;;  %v3465_v20 = vld [vmem:[#allocation10 + $0x64] ss:$16 sps:$4 sm:$0xff]   ;;  %v3468_v22 = vld [vmem:[#allocation10 + $0x60] ss:$16 sps:$4 sm:$0xff]   ;;  %v3491_v42 = vld [vmem:[#allocation8 + $0x4c] ss:$16 sps:$4 sm:$0xff]  }
  0x3e   :  { %v3469_v23 = vld [vmem:[#allocation8 + $0x4] ss:$16 sps:$4 sm:$0xff]   ;;  %v3473_v25 = vld [vmem:[#allocation8] ss:$16 sps:$4 sm:$0xff]   ;;  %v3489_v43 = vld [vmem:[#allocation8 + $0x48] ss:$16 sps:$4 sm:$0xff]  }
  0x3f   :  { %582 = vmatpush1.bf16.msra.mxu0 %v3456_v14  ;;  %v3471_v24 = vld [vmem:[#allocation10 + $0x44] ss:$16 sps:$4 sm:$0xff]   ;;  %v3474_v27 = vld [vmem:[#allocation10 + $0x40] ss:$16 sps:$4 sm:$0xff]   ;;  %v3494_v44 = vld [vmem:[#allocation8 + $0x2c] ss:$16 sps:$4 sm:$0xff]  }
  0x40   :  { %286 = vmatpush1.bf16.msra.mxu1 %v3455_v13  ;;  %583 = vmatprep.subr.bf16.mxu0 %v3459_v16  ;;  %v103_v28 = vld [vmem:[#allocation5] sm:$0xff]  ;;  %v3492_v45 = vld [vmem:[#allocation8 + $0x28] ss:$16 sps:$4 sm:$0xff]   ;;  %v3497_v46 = vld [vmem:[#allocation8 + $0xc] ss:$16 sps:$4 sm:$0xff]   ;;  %v136_v5 = vsub.s32 1, %v131_v2 }
  0x41   :  { %287 = vmatprep.subr.bf16.mxu1 %v3457_v15  ;;  %v3476_v31 = vld [vmem:[#allocation10 + $0x24] ss:$16 sps:$4 sm:$0xff]   ;;  %v105_v33 = vpack.c.bf16 %v104_v29, %v103_v28  ;;  %v3479_v34 = vld [vmem:[#allocation10 + $0x20] ss:$16 sps:$4 sm:$0xff]   ;;  %v3495_v47 = vld [vmem:[#allocation8 + $0x8] ss:$16 sps:$4 sm:$0xff]  }
  0x42   :  { %v3483_v37 = vld [vmem:[#allocation10 + $0x4] ss:$16 sps:$4 sm:$0xff]   ;;  %v3485_v39 = vld [vmem:[#allocation10] ss:$16 sps:$4 sm:$0xff]   ;;  %v3500_v48 = vld [vmem:[#allocation10 + $0xec] ss:$16 sps:$4 sm:$0xff]  }
  0x43   :  { %584 = vmatpush1.bf16.msra.mxu0 %v3462_v18  ;;  %v3498_v49 = vld [vmem:[#allocation10 + $0xe8] ss:$16 sps:$4 sm:$0xff]   ;;  %v3503_v50 = vld [vmem:[#allocation10 + $0xcc] ss:$16 sps:$4 sm:$0xff]   ;;  %v363_v4 = vld [vmem:[#allocation11] sm:$0xf] }
  0x44   :  { %288 = vmatpush1.bf16.msra.mxu1 %v3461_v17  ;;  %585 = vmatprep.subr.bf16.mxu0 %v3465_v20  ;;  %v3501_v51 = vld [vmem:[#allocation10 + $0xc8] ss:$16 sps:$4 sm:$0xff]   ;;  %v3506_v52 = vld [vmem:[#allocation10 + $0xac] ss:$16 sps:$4 sm:$0xff]   ;;  %v4363_v6 = vrot.slane %v363_v4, %v132_v3  ;;  %v4365_v7 = vrot.slane %v363_v4, %v136_v5  ;;  %v140_v8 = vsub.s32 2, %v131_v2  ;;  %v144_v9 = vsub.s32 3, %v131_v2 }
  0x45   :  { %289 = vmatprep.subr.bf16.mxu1 %v3463_v19  ;;  %v3504_v53 = vld [vmem:[#allocation10 + $0xa8] ss:$16 sps:$4 sm:$0xff]   ;;  %v3509_v54 = vld [vmem:[#allocation10 + $0x8c] ss:$16 sps:$4 sm:$0xff]   ;;  %s4283_s2 = smov [#allocation2]   ;;  %s4284_s27 = smov [#allocation3]  }
  0x46   :  { %v3507_v55 = vld [vmem:[#allocation10 + $0x88] ss:$16 sps:$4 sm:$0xff]   ;;  %v3512_v56 = vld [vmem:[#allocation10 + $0x6c] ss:$16 sps:$4 sm:$0xff]   ;;  %6018 = vst [vmem:[#allocation26_spill] sm:$0xff] %v4363_v6  ;;  %6019 = vst [vmem:[#allocation27_spill] sm:$0xff] %v4365_v7  ;;  %v4367_v10 = vrot.slane %v363_v4, %v140_v8  ;;  %v4369_v11 = vrot.slane %v363_v4, %v144_v9 }
  0x47   :  { %586 = vmatpush1.bf16.msra.mxu0 %v3468_v22  ;;  %v3510_v57 = vld [vmem:[#allocation10 + $0x68] ss:$16 sps:$4 sm:$0xff]   ;;  %v3515_v58 = vld [vmem:[#allocation10 + $0x4c] ss:$16 sps:$4 sm:$0xff]   ;;  %s87_s4 = sshll.u32 %s4283_s2, 4  ;;  %s99_s28 = sshll.u32 %s4284_s27, 4  ;;  %s88_s4 = int_to_ptr.vmem [resolvable:$true] %s87_s4  ;;  %s100_s28 = int_to_ptr.vmem [resolvable:$true] %s99_s28 }
  0x48   :  { %290 = vmatpush1.bf16.msra.mxu1 %v3467_v21  ;;  %587 = vmatprep.subr.bf16.mxu0 %v3471_v24  ;;  %v3513_v59 = vld [vmem:[#allocation10 + $0x48] ss:$16 sps:$4 sm:$0xff]   ;;  %v3518_v60 = vld [vmem:[#allocation10 + $0x2c] ss:$16 sps:$4 sm:$0xff]   ;;  %6020 = vst [vmem:[#allocation28_spill] sm:$0xff] %v4367_v10  ;;  %6021 = vst [vmem:[#allocation29_spill] sm:$0xff] %v4369_v11  ;;  %p4215_p7 = scmp.lt.s32.totalorder %s88_s4, %s88_s4 }
  0x49   :  { %291 = vmatprep.subr.bf16.mxu1 %v3469_v23  ;;  %v3516_v61 = vld [vmem:[#allocation10 + $0x28] ss:$16 sps:$4 sm:$0xff]   ;;  %v3521_v62 = vld [vmem:[#allocation10 + $0xc] ss:$16 sps:$4 sm:$0xff]   ;;  %s4210_s29 = scalar_lea.vmem %s88_s4, 8192 }
  0x4a   :  { %v3519_v63 = vld [vmem:[#allocation10 + $0x8] ss:$16 sps:$4 sm:$0xff]   ;;  %p4211_p6 = scmp.ne.s32.totalorder %s88_s4, %s4210_s29  ;;  %p4216_p8 = scmp.lt.s32.totalorder %s4210_s29, %s4210_s29 }
  0x4b   :  { %588 = vmatpush1.bf16.msra.mxu0 %v3474_v27 }
  0x4c   :  { %292 = vmatpush1.bf16.msra.mxu1 %v3473_v25  ;;  %589 = vmatprep.subr.bf16.mxu0 %v3476_v31  ;;  %p4217_p9 = por %p4216_p8, %p4215_p7 }
  0x4d   :  { %3208 = vmatprep.subr.msk.bf16.mxu1 %vm264_vm0, %v3205_v30 }
  0x4e   :  { %p4218_p10 = pnand %p4217_p9, %p4211_p6 }
  0x4f   :  { %3207 = vmatmul.mubr.msk.bf16.vlgmr.msra.gmra.mxu1 %vm260_vm1, %v105_v33  ;;  %590 = vmatpush1.bf16.msra.mxu0 %v3479_v34 }
  0x50   :  { %325 = vmatpush1.bf16.msra.mxu1 %v272_v36  ;;  %591 = vmatprep.subr.bf16.mxu0 %v3483_v37 }
  0x51   :  { %326 = vmatprep.subr.bf16.mxu1 %v3482_v35  ;;  %352 = vmatprep.mubr.bf16.mxu1 %v5781_v0 }
  0x53   :  { %592 = vmatpush1.bf16.msra.mxu0 %v3485_v39 }
  0x54   :  { %327 = vmatpush1.bf16.msra.mxu1 %v3480_v38 }
  0x55   :  { %328 = vmatprep.subr.bf16.mxu1 %v3488_v40 }
  0x56   :  { %610 = vmatmul.mubr.bf16.vlgmr.msra.gmra.mxu0 %v5781_v0 }
  0x58   :  { %329 = vmatpush1.bf16.msra.mxu1 %v3486_v41 }
  0x59   :  { %330 = vmatprep.subr.bf16.mxu1 %v3491_v42 }
  0x5c   :  { %331 = vmatpush1.bf16.msra.mxu1 %v3489_v43 }
  0x5d   :  { %332 = vmatprep.subr.bf16.mxu1 %v3494_v44 }
  0x60   :  { %333 = vmatpush1.bf16.msra.mxu1 %v3492_v45 }
  0x61   :  { %334 = vmatprep.subr.bf16.mxu1 %v3497_v46 }
  0x64   :  { %335 = vmatpush1.bf16.msra.mxu1 %v3495_v47 }
  0x65   :  { %618 = vmatprep.subr.bf16.mxu1 %v3500_v48 }
  0x67   :  { %3209 = vmatmul.mubr.msk.bf16.vlgmr.msra.gmra.mxu1 %vm260_vm1, %v105_v33 }
  0x68   :  { %619 = vmatpush1.bf16.msra.mxu1 %v3498_v49  ;;  %650 = vmatprep.mubr.bf16.mxu1 %v5781_v0 }
  0x69   :  { %620 = vmatprep.subr.bf16.mxu1 %v3503_v50 }
  0x6c   :  { %621 = vmatpush1.bf16.msra.mxu1 %v3501_v51 }
  0x6d   :  { %622 = vmatprep.subr.bf16.mxu1 %v3506_v52 }
  0x70   :  { %623 = vmatpush1.bf16.msra.mxu1 %v3504_v53 }
  0x71   :  { %624 = vmatprep.subr.bf16.mxu1 %v3509_v54 }
  0x74   :  { %625 = vmatpush1.bf16.msra.mxu1 %v3507_v55 }
  0x75   :  { %626 = vmatprep.subr.bf16.mxu1 %v3512_v56 }
  0x78   :  { %627 = vmatpush1.bf16.msra.mxu1 %v3510_v57 }
  0x79   :  { %628 = vmatprep.subr.bf16.mxu1 %v3515_v58 }
  0x7c   :  { %629 = vmatpush1.bf16.msra.mxu1 %v3513_v59 }
  0x7d   :  { %630 = vmatprep.subr.bf16.mxu1 %v3518_v60 }
  0x80   :  { %631 = vmatpush1.bf16.msra.mxu1 %v3516_v61 }
  0x81   :  { %632 = vmatprep.subr.bf16.mxu1 %v3521_v62 }
  0x84   :  { %633 = vmatpush1.bf16.msra.mxu1 %v3519_v63 }
  0x87   :  { %651 = vmatmul.mubr.bf16.vlgmr.msra.gmra.mxu1 %v5781_v0 }
  0x88   :  { %4221 = shalt.err (!%p4218_p10)  }
  0x89   :  { %90 = dma.hbm_to_vmem [thread:$0]  %s5778_s6, 8192, %s88_s4, [#allocation4] }
  0x8a   :  { %s4230_s10 = scalar_lea.vmem %s100_s28, 1024  ;;  %p4235_p12 = scmp.lt.s32.totalorder %s100_s28, %s100_s28 }
  0x8b   :  { %p4231_p11 = scmp.ne.s32.totalorder %s100_s28, %s4230_s10  ;;  %p4236_p13 = scmp.lt.s32.totalorder %s4230_s10, %s4230_s10 }
  0x8d   :  { %p4237_p0 = por %p4236_p13, %p4235_p12 }
  0x8f   :  { %p4238_p1 = pnand %p4237_p0, %p4231_p11 }
  0x91   :  { %4241 = shalt.err (!%p4238_p1)  }
  0x92   :  { %102 = dma.hbm_to_vmem [thread:$0]  %s5779_s7, 1024, %s100_s28, [#allocation4 + $0x1]  ;;  %v128_v12 = vld [vmem:[%s5775_s3] sm:$0xf] }
  0x93   :  { %v133_v15 = vrot.slane %v128_v12, %v132_v3  ;;  %v137_v17 = vrot.slane %v128_v12, %v136_v5  ;;  %v141_v27 = vrot.slane %v128_v12, %v140_v8  ;;  %v145_v30 = vrot.slane %v128_v12, %v144_v9 }
 0x10f   :  { %v311_v13 = vpop.f32.mrf.mxu1 }
 0x110   :  { %v4384_v29 = vadd.f32 %v311_v13, %v133_v15 }
 0x111   :  { %v313_v14 = vpop.f32.mrf.mxu1 }
 0x112   :  { %6024 = vst [vmem:[#allocation32_spill] sm:$0xff] %v4384_v29  ;;  %v4388_v32 = vadd.f32 %v313_v14, %v137_v17 }
 0x113   :  { %v315_v16 = vpop.f32.mrf.mxu1 }
 0x114   :  { %v4380_v18 = vadd.f32 %v315_v16, %v133_v15  ;;  %6026 = vst [vmem:[#allocation34_spill] sm:$0xff] %v4388_v32 }
 0x115   :  { %v317_v19 = vpop.f32.mrf.mxu1 }
 0x116   :  { %6022 = vst [vmem:[#allocation30_spill] sm:$0xff] %v4380_v18  ;;  %v4382_v20 = vadd.f32 %v317_v19, %v137_v17  ;;  %v611_v21 = vpop.f32.mrf.mxu0 }
 0x117   :  { %v659_v34 = vadd.f32 %v611_v21, %v4384_v29 }
 0x118   :  { %6023 = vst [vmem:[#allocation31_spill] sm:$0xff] %v4382_v20  ;;  %v613_v22 = vpop.f32.mrf.mxu0 }
 0x119   :  { %v660_v36 = vadd.f32 %v613_v22, %v4388_v32  ;;  %v3242_v37 = vmul.f32 -1.442695, %v659_v34 }
 0x11a   :  { %v615_v23 = vpop.f32.mrf.mxu0 }
 0x11b   :  { %v3243_v38 = vmul.f32 -1.442695, %v660_v36  ;;  %3522 = vpow2.f32 %v3242_v37 }
 0x11c   :  { %v616_v24 = vpop.f32.mrf.mxu0 }
 0x11d   :  { %3524 = vpow2.f32 %v3243_v38 }
 0x127   :  { %v354_v25 = vpop.f32.mrf.mxu1 }
 0x128   :  { %v3523_v39 = vpop.eup %3522  ;;  %v4394_v42 = vadd.f32 %v354_v25, %v141_v27 }
 0x129   :  { %v356_v26 = vpop.f32.mrf.mxu1  ;;  %v672_v41 = vadd.f32 1.0, %v3523_v39 }
 0x12a   :  { %v3525_v40 = vpop.eup %3524  ;;  %6028 = vst [vmem:[#allocation36_spill] sm:$0xff] %v4394_v42  ;;  %v4396_v45 = vadd.f32 %v356_v26, %v145_v30 }
 0x12b   :  { %v358_v28 = vpop.f32.mrf.mxu1  ;;  %v673_v43 = vadd.f32 1.0, %v3525_v40  ;;  %3526 = vrcp.f32 %v672_v41 }
 0x12c   :  { %v4386_v31 = vadd.f32 %v358_v28, %v141_v27  ;;  %6029 = vst [vmem:[#allocation37_spill] sm:$0xff] %v4396_v45 }
 0x12d   :  { %v360_v33 = vpop.f32.mrf.mxu1  ;;  %3528 = vrcp.f32 %v673_v43 }
 0x12e   :  { %6025 = vst [vmem:[#allocation33_spill] sm:$0xff] %v4386_v31  ;;  %v4391_v35 = vadd.f32 %v360_v33, %v145_v30 }
 0x130   :  { %6027 = vst [vmem:[#allocation35_spill] sm:$0xff] %v4391_v35 }
 0x138   :  { %v3527_v52 = vpop.eup %3526 }
 0x13a   :  { %v3529_v53 = vpop.eup %3528 }
 0x13b   :  { %v682_v57 = vmul.f32 0.0, %v3529_v53 }
 0x147   :  { %v652_v44 = vpop.f32.mrf.mxu1 }
 0x148   :  { %v661_v46 = vadd.f32 %v652_v44, %v4394_v42 }
 0x149   :  { %v654_v47 = vpop.f32.mrf.mxu1 }
 0x14a   :  { %v3244_v48 = vmul.f32 -1.442695, %v661_v46  ;;  %v662_v49 = vadd.f32 %v654_v47, %v4396_v45 }
 0x14b   :  { %v656_v50 = vpop.f32.mrf.mxu1 }
 0x14c   :  { %3530 = vpow2.f32 %v3244_v48 }
 0x14d   :  { %3532 = vtanh.f32 %v662_v49  ;;  %v657_v51 = vpop.f32.mrf.mxu1 }
 0x159   :  { %v3531_v54 = vpop.eup %3530 }
 0x15a   :  { %v3533_v55 = vpop.eup %3532  ;;  %v674_v56 = vadd.f32 1.0, %v3531_v54 }
 0x15b   :  { %v683_v58 = vmul.f32 %v3533_v55, %v3527_v52 }
 0x15c   :  { %3534 = vrcp.f32 %v674_v56 }
 0x15d   :  { %v4400_v59 = vadd.f32 %v683_v58, %v682_v57 }
 0x15f   :  { %6030 = vst [vmem:[#allocation38_spill] sm:$0xff] %v4400_v59  ;;  %3536 = vtanh.f32 %v4400_v59 }
 0x169   :  { %v3535_v60 = vpop.eup %3534 }
 0x16c   :  { %v3537_v61 = vpop.eup %3536 }
 0x16d   :  { %v686_v62 = vmul.f32 %v3537_v61, %v3535_v60 }
 0x16f   :  { %v4403_v63 = vpack.c.bf16 %v686_v62, %v686_v62 }
 0x170   :  { %4268 = dma.done.wait [#allocation4], 8192 }
 0x171   :  { %4269 = vsyncadd [#allocation4], 4294959104  ;;  %1108 = vmatprep.mubr.bf16.mxu0 %v5781_v0  ;;  %1149 = vmatprep.mubr.bf16.mxu1 %v5781_v0  ;;  %v4407_v1 = vld [vmem:[#allocation2 + $0xe4] ss:$16 sps:$4 sm:$0xff]   ;;  %v4409_v2 = vld [vmem:[#allocation2 + $0xe0] ss:$16 sps:$4 sm:$0xff]  }
 0x172   :  { %1076 = vmatprep.subr.bf16.mxu0 %v4407_v1  ;;  %v4412_v3 = vld [vmem:[#allocation2 + $0xc4] ss:$16 sps:$4 sm:$0xff]   ;;  %v4415_v4 = vld [vmem:[#allocation2 + $0xc0] ss:$16 sps:$4 sm:$0xff]   ;;  %v4420_v8 = vld [vmem:[#allocation2 + $0xec] ss:$16 sps:$4 sm:$0xff]  }
 0x173   :  { %1077 = vmatpush1.bf16.msra.mxu0 %v4409_v2  ;;  %v4418_v5 = vld [vmem:[#allocation2 + $0xa4] ss:$16 sps:$4 sm:$0xff]   ;;  %v4422_v9 = vld [vmem:[#allocation2 + $0xe8] ss:$16 sps:$4 sm:$0xff]   ;;  %v4425_v12 = vld [vmem:[#allocation2 + $0xa0] ss:$16 sps:$4 sm:$0xff]   ;;  %1117 = vmatprep.subr.bf16.mxu1 %v4420_v8 }
 0x174   :  { %1078 = vmatprep.subr.bf16.mxu0 %v4412_v3  ;;  %v4429_v13 = vld [vmem:[#allocation2 + $0x84] ss:$16 sps:$4 sm:$0xff]   ;;  %1118 = vmatpush1.bf16.msra.mxu1 %v4422_v9  ;;  %v4432_v14 = vld [vmem:[#allocation2 + $0xcc] ss:$16 sps:$4 sm:$0xff]   ;;  %v4434_v15 = vld [vmem:[#allocation2 + $0xc8] ss:$16 sps:$4 sm:$0xff]  }
 0x175   :  { %1119 = vmatprep.subr.bf16.mxu1 %v4432_v14  ;;  %v4438_v16 = vld [vmem:[#allocation2 + $0x80] ss:$16 sps:$4 sm:$0xff]   ;;  %v4440_v17 = vld [vmem:[#allocation2 + $0x64] ss:$16 sps:$4 sm:$0xff]   ;;  %v4442_v19 = vld [vmem:[#allocation2 + $0xac] ss:$16 sps:$4 sm:$0xff]  }
 0x176   :  { %v4446_v21 = vld [vmem:[#allocation2 + $0xa8] ss:$16 sps:$4 sm:$0xff]   ;;  %v4449_v22 = vld [vmem:[#allocation2 + $0x8c] ss:$16 sps:$4 sm:$0xff]   ;;  %v4452_v23 = vld [vmem:[#allocation2 + $0x60] ss:$16 sps:$4 sm:$0xff]  }
 0x177   :  { %1079 = vmatpush1.bf16.msra.mxu0 %v4415_v4  ;;  %v4455_v24 = vld [vmem:[#allocation2 + $0x44] ss:$16 sps:$4 sm:$0xff]   ;;  %v4458_v25 = vld [vmem:[#allocation2 + $0x88] ss:$16 sps:$4 sm:$0xff]   ;;  %v4461_v26 = vld [vmem:[#allocation2 + $0x6c] ss:$16 sps:$4 sm:$0xff]  }
 0x178   :  { %1080 = vmatprep.subr.bf16.mxu0 %v4418_v5  ;;  %1120 = vmatpush1.bf16.msra.mxu1 %v4434_v15  ;;  %v4464_v27 = vld [vmem:[#allocation2 + $0x40] ss:$16 sps:$4 sm:$0xff]   ;;  %v4466_v28 = vld [vmem:[#allocation2 + $0x24] ss:$16 sps:$4 sm:$0xff]   ;;  %v4470_v30 = vld [vmem:[#allocation2 + $0x68] ss:$16 sps:$4 sm:$0xff]  }
 0x179   :  { %1121 = vmatprep.subr.bf16.mxu1 %v4442_v19  ;;  %v4473_v33 = vld [vmem:[#allocation2 + $0x4c] ss:$16 sps:$4 sm:$0xff]   ;;  %v4476_v34 = vld [vmem:[#allocation2 + $0x20] ss:$16 sps:$4 sm:$0xff]   ;;  %v4479_v36 = vld [vmem:[#allocation2 + $0x4] ss:$16 sps:$4 sm:$0xff]  }
 0x17a   :  { %v4482_v37 = vld [vmem:[#allocation2 + $0x48] ss:$16 sps:$4 sm:$0xff]   ;;  %v4485_v38 = vld [vmem:[#allocation2 + $0x2c] ss:$16 sps:$4 sm:$0xff]   ;;  %v4488_v39 = vld [vmem:[#allocation2] ss:$16 sps:$4 sm:$0xff]  }
 0x17b   :  { %1081 = vmatpush1.bf16.msra.mxu0 %v4425_v12  ;;  %v4490_v40 = vld [vmem:[#allocation2 + $0x1e4] ss:$16 sps:$4 sm:$0xff]   ;;  %v4494_v41 = vld [vmem:[#allocation2 + $0x28] ss:$16 sps:$4 sm:$0xff]   ;;  %v4497_v43 = vld [vmem:[#allocation2 + $0xc] ss:$16 sps:$4 sm:$0xff]  }
 0x17c   :  { %1082 = vmatprep.subr.bf16.mxu0 %v4429_v13  ;;  %1122 = vmatpush1.bf16.msra.mxu1 %v4446_v21  ;;  %v4500_v44 = vld [vmem:[#allocation2 + $0x1e0] ss:$16 sps:$4 sm:$0xff]   ;;  %v4503_v46 = vld [vmem:[#allocation2 + $0x1c4] ss:$16 sps:$4 sm:$0xff]   ;;  %v4506_v47 = vld [vmem:[#allocation2 + $0x8] ss:$16 sps:$4 sm:$0xff]  }
 0x17d   :  { %1123 = vmatprep.subr.bf16.mxu1 %v4449_v22  ;;  %6031 = vst [vmem:[#allocation39_spill] sm:$0xff] %v4500_v44  ;;  %6032 = vst [vmem:[#allocation40_spill] sm:$0xff] %v4503_v46  ;;  %v4509_v48 = vld [vmem:[#allocation2 + $0x1ec] ss:$16 sps:$4 sm:$0xff]   ;;  %v4512_v49 = vld [vmem:[#allocation2 + $0x1c0] ss:$16 sps:$4 sm:$0xff]  }
 0x17e   :  { %6033 = vst [vmem:[#allocation41_spill] sm:$0xff] %v4509_v48  ;;  %6034 = vst [vmem:[#allocation42_spill] sm:$0xff] %v4512_v49  ;;  %v4514_v50 = vld [vmem:[#allocation2 + $0x1a4] ss:$16 sps:$4 sm:$0xff]   ;;  %v4518_v51 = vld [vmem:[#allocation2 + $0x1e8] ss:$16 sps:$4 sm:$0xff]  }
 0x17f   :  { %1083 = vmatpush1.bf16.msra.mxu0 %v4438_v16  ;;  %6035 = vst [vmem:[#allocation43_spill] sm:$0xff] %v4514_v50  ;;  %6036 = vst [vmem:[#allocation44_spill] sm:$0xff] %v4518_v51  ;;  %v4521_v52 = vld [vmem:[#allocation2 + $0x1cc] ss:$16 sps:$4 sm:$0xff]   ;;  %v4524_v53 = vld [vmem:[#allocation2 + $0x1a0] ss:$16 sps:$4 sm:$0xff]  }
 0x180   :  { %1084 = vmatprep.subr.bf16.mxu0 %v4440_v17  ;;  %1124 = vmatpush1.bf16.msra.mxu1 %v4458_v25  ;;  %6037 = vst [vmem:[#allocation45_spill] sm:$0xff] %v4521_v52  ;;  %6038 = vst [vmem:[#allocation46_spill] sm:$0xff] %v4524_v53  ;;  %v4527_v54 = vld [vmem:[#allocation2 + $0x184] ss:$16 sps:$4 sm:$0xff]   ;;  %v4530_v55 = vld [vmem:[#allocation2 + $0x1c8] ss:$16 sps:$4 sm:$0xff]  }
 0x181   :  { %1125 = vmatprep.subr.bf16.mxu1 %v4461_v26  ;;  %6039 = vst [vmem:[#allocation47_spill] sm:$0xff] %v4527_v54  ;;  %6040 = vst [vmem:[#allocation48_spill] sm:$0xff] %v4530_v55  ;;  %v4533_v56 = vld [vmem:[#allocation2 + $0x1ac] ss:$16 sps:$4 sm:$0xff]   ;;  %v4536_v57 = vld [vmem:[#allocation2 + $0x180] ss:$16 sps:$4 sm:$0xff]  }
 0x182   :  { %6041 = vst [vmem:[#allocation49_spill] sm:$0xff] %v4533_v56  ;;  %6042 = vst [vmem:[#allocation50_spill] sm:$0xff] %v4536_v57  ;;  %v4538_v58 = vld [vmem:[#allocation2 + $0x164] ss:$16 sps:$4 sm:$0xff]   ;;  %v4542_v60 = vld [vmem:[#allocation2 + $0x1a8] ss:$16 sps:$4 sm:$0xff]  }
 0x183   :  { %1085 = vmatpush1.bf16.msra.mxu0 %v4452_v23  ;;  %6043 = vst [vmem:[#allocation51_spill] sm:$0xff] %v4538_v58  ;;  %6044 = vst [vmem:[#allocation52_spill] sm:$0xff] %v4542_v60  ;;  %v4545_v61 = vld [vmem:[#allocation2 + $0x18c] ss:$16 sps:$4 sm:$0xff]   ;;  %v4548_v62 = vld [vmem:[#allocation2 + $0x160] ss:$16 sps:$4 sm:$0xff]  }
 0x184   :  { %1086 = vmatprep.subr.bf16.mxu0 %v4455_v24  ;;  %1126 = vmatpush1.bf16.msra.mxu1 %v4470_v30  ;;  %6045 = vst [vmem:[#allocation53_spill] sm:$0xff] %v4545_v61  ;;  %6046 = vst [vmem:[#allocation54_spill] sm:$0xff] %v4548_v62  ;;  %v4551_v0 = vld [vmem:[#allocation2 + $0x144] ss:$16 sps:$4 sm:$0xff]   ;;  %v4554_v35 = vld [vmem:[#allocation2 + $0x188] ss:$16 sps:$4 sm:$0xff]  }
 0x185   :  { %1127 = vmatprep.subr.bf16.mxu1 %v4473_v33  ;;  %6047 = vst [vmem:[#allocation55_spill] sm:$0xff] %v4551_v0  ;;  %6048 = vst [vmem:[#allocation56_spill] sm:$0xff] %v4554_v35  ;;  %v4557_v31 = vld [vmem:[#allocation2 + $0x16c] ss:$16 sps:$4 sm:$0xff]   ;;  %v4560_v20 = vld [vmem:[#allocation2 + $0x140] ss:$16 sps:$4 sm:$0xff]  }
 0x186   :  { %6049 = vst [vmem:[#allocation57_spill] sm:$0xff] %v4557_v31  ;;  %6050 = vst [vmem:[#allocation58_spill] sm:$0xff] %v4560_v20  ;;  %v4562_v18 = vld [vmem:[#allocation2 + $0x124] ss:$16 sps:$4 sm:$0xff]   ;;  %v4566_v59 = vld [vmem:[#allocation2 + $0x168] ss:$16 sps:$4 sm:$0xff]  }
 0x187   :  { %1087 = vmatpush1.bf16.msra.mxu0 %v4464_v27  ;;  %6051 = vst [vmem:[#allocation59_spill] sm:$0xff] %v4562_v18  ;;  %6052 = vst [vmem:[#allocation60_spill] sm:$0xff] %v4566_v59  ;;  %v4569_v45 = vld [vmem:[#allocation2 + $0x14c] ss:$16 sps:$4 sm:$0xff]   ;;  %v4572_v42 = vld [vmem:[#allocation2 + $0x120] ss:$16 sps:$4 sm:$0xff]  }
 0x188   :  { %1088 = vmatprep.subr.bf16.mxu0 %v4466_v28  ;;  %1128 = vmatpush1.bf16.msra.mxu1 %v4482_v37  ;;  %6053 = vst [vmem:[#allocation61_spill] sm:$0xff] %v4569_v45  ;;  %6054 = vst [vmem:[#allocation62_spill] sm:$0xff] %v4572_v42  ;;  %v4575_v32 = vld [vmem:[#allocation2 + $0x104] ss:$16 sps:$4 sm:$0xff]   ;;  %v4578_v29 = vld [vmem:[#allocation2 + $0x148] ss:$16 sps:$4 sm:$0xff]  }
 0x189   :  { %1129 = vmatprep.subr.bf16.mxu1 %v4485_v38  ;;  %6055 = vst [vmem:[#allocation63_spill] sm:$0xff] %v4575_v32  ;;  %6056 = vst [vmem:[#allocation64_spill] sm:$0xff] %v4578_v29  ;;  %v4581_v11 = vld [vmem:[#allocation2 + $0x12c] ss:$16 sps:$4 sm:$0xff]   ;;  %v4584_v10 = vld [vmem:[#allocation2 + $0x100] ss:$16 sps:$4 sm:$0xff]  }
 0x18a   :  { %6057 = vst [vmem:[#allocation65_spill] sm:$0xff] %v4581_v11  ;;  %6058 = vst [vmem:[#allocation66_spill] sm:$0xff] %v4584_v10  ;;  %v4586_v7 = vld [vmem:[#allocation10 + $0xe4] ss:$16 sps:$4 sm:$0xff]   ;;  %v4590_v6 = vld [vmem:[#allocation2 + $0x128] ss:$16 sps:$4 sm:$0xff]  }
 0x18b   :  { %1089 = vmatpush1.bf16.msra.mxu0 %v4476_v34  ;;  %6059 = vst [vmem:[#allocation67_spill] sm:$0xff] %v4586_v7  ;;  %6060 = vst [vmem:[#allocation68_spill] sm:$0xff] %v4590_v6 }
 0x18c   :  { %1090 = vmatprep.subr.bf16.mxu0 %v4479_v36  ;;  %1130 = vmatpush1.bf16.msra.mxu1 %v4494_v41 }
 0x18d   :  { %1131 = vmatprep.subr.bf16.mxu1 %v4497_v43 }
 0x18f   :  { %1091 = vmatpush1.bf16.msra.mxu0 %v4488_v39 }
 0x190   :  { %1092 = vmatprep.subr.bf16.mxu0 %v4490_v40  ;;  %1132 = vmatpush1.bf16.msra.mxu1 %v4506_v47 }
 0x191   :  { %1133 = vmatprep.subr.bf16.mxu1 %v4509_v48 }
 0x193   :  { %1093 = vmatpush2.bf16.msra.mxu0 %v4500_v44 }
 0x194   :  { %1094 = vmatprep.subr.bf16.mxu0 %v4503_v46  ;;  %1134 = vmatpush2.bf16.msra.mxu1 %v4518_v51 }
 0x195   :  { %1135 = vmatprep.subr.bf16.mxu1 %v4521_v52 }
 0x197   :  { %1095 = vmatpush2.bf16.msra.mxu0 %v4512_v49 }
 0x198   :  { %1096 = vmatprep.subr.bf16.mxu0 %v4514_v50  ;;  %1136 = vmatpush2.bf16.msra.mxu1 %v4530_v55 }
 0x199   :  { %1137 = vmatprep.subr.bf16.mxu1 %v4533_v56 }
 0x19b   :  { %1097 = vmatpush2.bf16.msra.mxu0 %v4524_v53 }
 0x19c   :  { %1098 = vmatprep.subr.bf16.mxu0 %v4527_v54  ;;  %1138 = vmatpush2.bf16.msra.mxu1 %v4542_v60 }
 0x19d   :  { %1139 = vmatprep.subr.bf16.mxu1 %v4545_v61 }
 0x19f   :  { %1099 = vmatpush2.bf16.msra.mxu0 %v4536_v57 }
 0x1a0   :  { %1100 = vmatprep.subr.bf16.mxu0 %v4538_v58  ;;  %1140 = vmatpush2.bf16.msra.mxu1 %v4554_v35 }
 0x1a1   :  { %1141 = vmatprep.subr.bf16.mxu1 %v4557_v31 }
 0x1a3   :  { %1101 = vmatpush2.bf16.msra.mxu0 %v4548_v62 }
 0x1a4   :  { %1102 = vmatprep.subr.bf16.mxu0 %v4551_v0  ;;  %1142 = vmatpush2.bf16.msra.mxu1 %v4566_v59  ;;  %v4602_v59 = vld [vmem:[#allocation2 + $0x108] ss:$16 sps:$4 sm:$0xff]  }
 0x1a5   :  { %1143 = vmatprep.subr.bf16.mxu1 %v4569_v45  ;;  %v4596_v45 = vld [vmem:[#allocation10 + $0xe0] ss:$16 sps:$4 sm:$0xff]   ;;  %6064 = vst [vmem:[#allocation72_spill] sm:$0xff] %v4602_v59 }
 0x1a6   :  { %6062 = vst [vmem:[#allocation70_spill] sm:$0xff] %v4596_v45 }
 0x1a7   :  { %1103 = vmatpush2.bf16.msra.mxu0 %v4560_v20 }
 0x1a8   :  { %1104 = vmatprep.subr.bf16.mxu0 %v4562_v18  ;;  %1144 = vmatpush2.bf16.msra.mxu1 %v4578_v29  ;;  %v4593_v18 = vld [vmem:[#allocation2 + $0x10c] ss:$16 sps:$4 sm:$0xff]   ;;  %v4622_v29 = vld [vmem:[#allocation10 + $0xa0] ss:$16 sps:$4 sm:$0xff]  }
 0x1a9   :  { %1145 = vmatprep.subr.bf16.mxu1 %v4581_v11  ;;  %6061 = vst [vmem:[#allocation69_spill] sm:$0xff] %v4593_v18  ;;  %v4609_v11 = vld [vmem:[#allocation10 + $0xc0] ss:$16 sps:$4 sm:$0xff]   ;;  %6071 = vst [vmem:[#allocation78_spill] sm:$0xff] %v4622_v29 }
 0x1aa   :  { %6066 = vst [vmem:[#allocation74_spill] sm:$0xff] %v4609_v11 }
 0x1ab   :  { %1105 = vmatpush2.bf16.msra.mxu0 %v4572_v42  ;;  %v4599_v42 = vld [vmem:[#allocation10 + $0xc4] ss:$16 sps:$4 sm:$0xff]  }
 0x1ac   :  { %1106 = vmatprep.subr.bf16.mxu0 %v4575_v32  ;;  %6063 = vst [vmem:[#allocation71_spill] sm:$0xff] %v4599_v42  ;;  %1146 = vmatpush2.bf16.msra.mxu1 %v4590_v6  ;;  %v4605_v32 = vld [vmem:[#allocation10 + $0xec] ss:$16 sps:$4 sm:$0xff]   ;;  %v4616_v6 = vld [vmem:[#allocation10 + $0xe8] ss:$16 sps:$4 sm:$0xff]  }
 0x1ad   :  { %1147 = vmatprep.subr.bf16.mxu1 %v4593_v18  ;;  %6065 = vst [vmem:[#allocation73_spill] sm:$0xff] %v4605_v32  ;;  %6069 = vst [vmem:[#allocation76_spill] sm:$0xff] %v4616_v6  ;;  %v4619_v18 = vld [vmem:[#allocation10 + $0xcc] ss:$16 sps:$4 sm:$0xff]  }
 0x1ae   :  { %6070 = vst [vmem:[#allocation77_spill] sm:$0xff] %v4619_v18 }
 0x1af   :  { %1107 = vmatpush2.bf16.msra.mxu0 %v4584_v10  ;;  %v6067_v10 = vmov 0  }
 0x1b0   :  { %1375 = vmatprep.subr.bf16.mxu0 %v4586_v7  ;;  %v4613_v7 = vld [vmem:[#allocation10 + $0xa4] ss:$16 sps:$4 sm:$0xff]   ;;  %1148 = vmatpush2.bf16.msra.mxu1 %v4602_v59  ;;  %v4632_v59 = vld [vmem:[#allocation10 + $0xac] ss:$16 sps:$4 sm:$0xff]  }
 0x1b1   :  { %6068 = vst [vmem:[#allocation75_spill] sm:$0xff] %v4613_v7  ;;  %1416 = vmatprep.subr.bf16.mxu1 %v4605_v32  ;;  %6074 = vst [vmem:[#allocation81_spill] sm:$0xff] %v4632_v59  ;;  %v4639_v32 = vld [vmem:[#allocation10 + $0x64] ss:$16 sps:$4 sm:$0xff]  }
 0x1b2   :  { %1109 = vmatmul.mubr.bf16.vlgmr.msra.gmra.mxu0 %v4403_v63  ;;  %6076 = vst [vmem:[#allocation83_spill] sm:$0xff] %v4639_v32 }
 0x1b3   :  { %1376 = vmatpush1.bf16.msra.mxu0 %v4596_v45  ;;  %1407 = vmatprep.mubr.bf16.mxu0 %v6067_v10  ;;  %v4626_v45 = vld [vmem:[#allocation10 + $0x84] ss:$16 sps:$4 sm:$0xff]  }
 0x1b4   :  { %1377 = vmatprep.subr.bf16.mxu0 %v4599_v42  ;;  %1150 = vmatmul.mubr.bf16.vlgmr.msra.gmra.mxu1 %v4403_v63  ;;  %6072 = vst [vmem:[#allocation79_spill] sm:$0xff] %v4626_v45  ;;  %v4629_v42 = vld [vmem:[#allocation10 + $0xc8] ss:$16 sps:$4 sm:$0xff]  }
 0x1b5   :  { %1417 = vmatpush1.bf16.msra.mxu1 %v4616_v6  ;;  %6073 = vst [vmem:[#allocation80_spill] sm:$0xff] %v4629_v42  ;;  %1448 = vmatprep.mubr.bf16.mxu1 %v6067_v10  ;;  %v4645_v6 = vld [vmem:[#allocation10 + $0x8c] ss:$16 sps:$4 sm:$0xff]  }
 0x1b6   :  { %1418 = vmatprep.subr.bf16.mxu1 %v4619_v18  ;;  %6078 = vst [vmem:[#allocation85_spill] sm:$0xff] %v4645_v6  ;;  %v4648_v18 = vld [vmem:[#allocation10 + $0x60] ss:$16 sps:$4 sm:$0xff]  }
 0x1b7   :  { %1378 = vmatpush1.bf16.msra.mxu0 %v4609_v11  ;;  %v4636_v11 = vld [vmem:[#allocation10 + $0x80] ss:$16 sps:$4 sm:$0xff]   ;;  %6079 = vst [vmem:[#allocation86_spill] sm:$0xff] %v4648_v18 }
 0x1b8   :  { %1379 = vmatprep.subr.bf16.mxu0 %v4613_v7  ;;  %6075 = vst [vmem:[#allocation82_spill] sm:$0xff] %v4636_v11  ;;  %v4642_v7 = vld [vmem:[#allocation10 + $0xa8] ss:$16 sps:$4 sm:$0xff]  }
 0x1b9   :  { %1419 = vmatpush1.bf16.msra.mxu1 %v4629_v42  ;;  %6077 = vst [vmem:[#allocation84_spill] sm:$0xff] %v4642_v7  ;;  %v4657_v42 = vld [vmem:[#allocation10 + $0x6c] ss:$16 sps:$4 sm:$0xff]  }
 0x1ba   :  { %1420 = vmatprep.subr.bf16.mxu1 %v4632_v59  ;;  %6082 = vst [vmem:[#allocation89_spill] sm:$0xff] %v4657_v42  ;;  %v4660_v59 = vld [vmem:[#allocation10 + $0x40] ss:$16 sps:$4 sm:$0xff]  }
 0x1bb   :  { %1380 = vmatpush1.bf16.msra.mxu0 %v4622_v29  ;;  %v4651_v29 = vld [vmem:[#allocation10 + $0x44] ss:$16 sps:$4 sm:$0xff]   ;;  %6083 = vst [vmem:[#allocation90_spill] sm:$0xff] %v4660_v59 }
 0x1bc   :  { %1381 = vmatprep.subr.bf16.mxu0 %v4626_v45  ;;  %6080 = vst [vmem:[#allocation87_spill] sm:$0xff] %v4651_v29  ;;  %v4654_v45 = vld [vmem:[#allocation10 + $0x88] ss:$16 sps:$4 sm:$0xff]  }
 0x1bd   :  { %1421 = vmatpush1.bf16.msra.mxu1 %v4642_v7  ;;  %6081 = vst [vmem:[#allocation88_spill] sm:$0xff] %v4654_v45  ;;  %v4669_v7 = vld [vmem:[#allocation10 + $0x4c] ss:$16 sps:$4 sm:$0xff]  }
 0x1be   :  { %1422 = vmatprep.subr.bf16.mxu1 %v4645_v6  ;;  %6085 = vst [vmem:[#allocation92_spill] sm:$0xff] %v4669_v7  ;;  %v4672_v6 = vld [vmem:[#allocation10 + $0x20] ss:$16 sps:$4 sm:$0xff]  }
 0x1bf   :  { %1382 = vmatpush1.bf16.msra.mxu0 %v4636_v11  ;;  %v4663_v11 = vld [vmem:[#allocation10 + $0x24] ss:$16 sps:$4 sm:$0xff]  }
 0x1c0   :  { %1383 = vmatprep.subr.bf16.mxu0 %v4639_v32  ;;  %6084 = vst [vmem:[#allocation91_spill] sm:$0xff] %v4663_v11  ;;  %v4666_v32 = vld [vmem:[#allocation10 + $0x68] ss:$16 sps:$4 sm:$0xff]  }
 0x1c1   :  { %1423 = vmatpush1.bf16.msra.mxu1 %v4654_v45  ;;  %v4681_v45 = vld [vmem:[#allocation10 + $0x2c] ss:$16 sps:$4 sm:$0xff]  }
 0x1c2   :  { %1424 = vmatprep.subr.bf16.mxu1 %v4657_v42  ;;  %v4684_v42 = vld [vmem:[#allocation10] ss:$16 sps:$4 sm:$0xff]  }
 0x1c3   :  { %1384 = vmatpush1.bf16.msra.mxu0 %v4648_v18  ;;  %v4675_v18 = vld [vmem:[#allocation10 + $0x4] ss:$16 sps:$4 sm:$0xff]  }
 0x1c4   :  { %1385 = vmatprep.subr.bf16.mxu0 %v4651_v29  ;;  %v4678_v29 = vld [vmem:[#allocation10 + $0x48] ss:$16 sps:$4 sm:$0xff]  }
 0x1c5   :  { %1425 = vmatpush1.bf16.msra.mxu1 %v4666_v32 }
 0x1c6   :  { %1426 = vmatprep.subr.bf16.mxu1 %v4669_v7  ;;  %v4695_v7 = vld [vmem:[#allocation10 + $0x8] ss:$16 sps:$4 sm:$0xff]  }
 0x1c7   :  { %1386 = vmatpush1.bf16.msra.mxu0 %v4660_v59  ;;  %v4688_v59 = vld [vmem:[#allocation10 + $0x28] ss:$16 sps:$4 sm:$0xff]  }
 0x1c8   :  { %1387 = vmatprep.subr.bf16.mxu0 %v4663_v11  ;;  %v4691_v11 = vld [vmem:[#allocation10 + $0xc] ss:$16 sps:$4 sm:$0xff]  }
 0x1c9   :  { %1427 = vmatpush1.bf16.msra.mxu1 %v4678_v29 }
 0x1ca   :  { %1428 = vmatprep.subr.bf16.mxu1 %v4681_v45 }
 0x1cb   :  { %1388 = vmatpush1.bf16.msra.mxu0 %v4672_v6 }
 0x1cc   :  { %1389 = vmatprep.subr.bf16.mxu0 %v4675_v18 }
 0x1cd   :  { %1429 = vmatpush1.bf16.msra.mxu1 %v4688_v59 }
 0x1ce   :  { %1430 = vmatprep.subr.bf16.mxu1 %v4691_v11 }
 0x1cf   :  { %1390 = vmatpush1.bf16.msra.mxu0 %v4684_v42 }
 0x1d0   :  { %1508 = vmatprep.subr.bf16.mxu0 %v4407_v1 }
 0x1d1   :  { %1431 = vmatpush1.bf16.msra.mxu1 %v4695_v7 }
 0x1d2   :  { %1408 = vmatmul.mubr.bf16.vlgmr.msra.gmra.mxu0 %v4403_v63  ;;  %1549 = vmatprep.subr.bf16.mxu1 %v4420_v8 }
 0x1d3   :  { %1509 = vmatpush1.bf16.msra.mxu0 %v4409_v2 }
 0x1d4   :  { %1510 = vmatprep.subr.bf16.mxu0 %v4412_v3  ;;  %1449 = vmatmul.mubr.bf16.vlgmr.msra.gmra.mxu1 %v4403_v63  ;;  %v6086_v63 = vld [vmem:[#allocation60_spill] sm:$0xff] }
 0x1d5   :  { %1550 = vmatpush1.bf16.msra.mxu1 %v4422_v9 }
 0x1d6   :  { %1551 = vmatprep.subr.bf16.mxu1 %v4432_v14 }
 0x1d7   :  { %1511 = vmatpush1.bf16.msra.mxu0 %v4415_v4 }
 0x1d8   :  { %1512 = vmatprep.subr.bf16.mxu0 %v4418_v5 }
 0x1d9   :  { %1552 = vmatpush1.bf16.msra.mxu1 %v4434_v15 }
 0x1da   :  { %1553 = vmatprep.subr.bf16.mxu1 %v4442_v19 }
 0x1db   :  { %1513 = vmatpush1.bf16.msra.mxu0 %v4425_v12 }
 0x1dc   :  { %1514 = vmatprep.subr.bf16.mxu0 %v4429_v13 }
 0x1dd   :  { %1554 = vmatpush1.bf16.msra.mxu1 %v4446_v21 }
 0x1de   :  { %1555 = vmatprep.subr.bf16.mxu1 %v4449_v22 }
 0x1df   :  { %1515 = vmatpush1.bf16.msra.mxu0 %v4438_v16 }
 0x1e0   :  { %1516 = vmatprep.subr.bf16.mxu0 %v4440_v17 }
 0x1e1   :  { %1556 = vmatpush1.bf16.msra.mxu1 %v4458_v25 }
 0x1e2   :  { %1557 = vmatprep.subr.bf16.mxu1 %v4461_v26 }
 0x1e3   :  { %1517 = vmatpush1.bf16.msra.mxu0 %v4452_v23 }
 0x1e4   :  { %1518 = vmatprep.subr.bf16.mxu0 %v4455_v24 }
 0x1e5   :  { %1558 = vmatpush1.bf16.msra.mxu1 %v4470_v30 }
 0x1e6   :  { %1559 = vmatprep.subr.bf16.mxu1 %v4473_v33 }
 0x1e7   :  { %1519 = vmatpush1.bf16.msra.mxu0 %v4464_v27 }
 0x1e8   :  { %1520 = vmatprep.subr.bf16.mxu0 %v4466_v28 }
 0x1e9   :  { %1560 = vmatpush1.bf16.msra.mxu1 %v4482_v37 }
 0x1ea   :  { %1561 = vmatprep.subr.bf16.mxu1 %v4485_v38 }
 0x1eb   :  { %1521 = vmatpush1.bf16.msra.mxu0 %v4476_v34 }
 0x1ec   :  { %1522 = vmatprep.subr.bf16.mxu0 %v4479_v36 }
 0x1ed   :  { %1562 = vmatpush1.bf16.msra.mxu1 %v4494_v41 }
 0x1ee   :  { %1563 = vmatprep.subr.bf16.mxu1 %v4497_v43 }
 0x1ef   :  { %1523 = vmatpush1.bf16.msra.mxu0 %v4488_v39 }
 0x1f0   :  { %1524 = vmatprep.subr.bf16.mxu0 %v4490_v40 }
 0x1f1   :  { %1564 = vmatpush1.bf16.msra.mxu1 %v4506_v47 }
 0x1f2   :  { %1565 = vmatprep.subr.bf16.mxu1 %v4509_v48 }
 0x1f3   :  { %1525 = vmatpush2.bf16.msra.mxu0 %v4500_v44 }
 0x1f4   :  { %1526 = vmatprep.subr.bf16.mxu0 %v4503_v46 }
 0x1f5   :  { %1566 = vmatpush2.bf16.msra.mxu1 %v4518_v51 }
 0x1f6   :  { %1567 = vmatprep.subr.bf16.mxu1 %v4521_v52 }
 0x1f7   :  { %1527 = vmatpush2.bf16.msra.mxu0 %v4512_v49 }
 0x1f8   :  { %1528 = vmatprep.subr.bf16.mxu0 %v4514_v50 }
 0x1f9   :  { %1568 = vmatpush2.bf16.msra.mxu1 %v4530_v55 }
 0x1fa   :  { %1569 = vmatprep.subr.bf16.mxu1 %v4533_v56 }
 0x1fb   :  { %1529 = vmatpush2.bf16.msra.mxu0 %v4524_v53 }
 0x1fc   :  { %1530 = vmatprep.subr.bf16.mxu0 %v4527_v54  ;;  %v6087_v54 = vld [vmem:[#allocation59_spill] sm:$0xff] }
 0x1fd   :  { %1570 = vmatpush2.bf16.msra.mxu1 %v4542_v60  ;;  %v6089_v60 = vld [vmem:[#allocation62_spill] sm:$0xff] }
 0x1fe   :  { %1571 = vmatprep.subr.bf16.mxu1 %v4545_v61  ;;  %v6091_v61 = vld [vmem:[#allocation63_spill] sm:$0xff] }
 0x1ff   :  { %1531 = vmatpush2.bf16.msra.mxu0 %v4536_v57  ;;  %v6088_v57 = vld [vmem:[#allocation61_spill] sm:$0xff] }
 0x200   :  { %1532 = vmatprep.subr.bf16.mxu0 %v4538_v58  ;;  %v6090_v58 = vld [vmem:[#allocation64_spill] sm:$0xff] }
 0x201   :  { %1572 = vmatpush2.bf16.msra.mxu1 %v4554_v35  ;;  %v6093_v35 = vld [vmem:[#allocation66_spill] sm:$0xff] }
 0x202   :  { %1573 = vmatprep.subr.bf16.mxu1 %v4557_v31  ;;  %v6095_v31 = vld [vmem:[#allocation67_spill] sm:$0xff] }
 0x203   :  { %1533 = vmatpush2.bf16.msra.mxu0 %v4548_v62  ;;  %v6092_v62 = vld [vmem:[#allocation65_spill] sm:$0xff] }
 0x204   :  { %1534 = vmatprep.subr.bf16.mxu0 %v4551_v0  ;;  %v6094_v0 = vld [vmem:[#allocation68_spill] sm:$0xff] }
 0x205   :  { %1574 = vmatpush2.bf16.msra.mxu1 %v6086_v63  ;;  %v6097_v63 = vld [vmem:[#allocation72_spill] sm:$0xff] }
 0x206   :  { %1575 = vmatprep.subr.bf16.mxu1 %v6088_v57 }
 0x207   :  { %1535 = vmatpush2.bf16.msra.mxu0 %v4560_v20  ;;  %v6096_v20 = vld [vmem:[#allocation69_spill] sm:$0xff] }
 0x208   :  { %1536 = vmatprep.subr.bf16.mxu0 %v6087_v54  ;;  %v6098_v54 = vld [vmem:[#allocation73_spill] sm:$0xff] }
 0x209   :  { %1576 = vmatpush2.bf16.msra.mxu1 %v6090_v58 }
 0x20a   :  { %1577 = vmatprep.subr.bf16.mxu1 %v6092_v62 }
 0x20b   :  { %1537 = vmatpush2.bf16.msra.mxu0 %v6089_v60  ;;  %v6099_v60 = vld [vmem:[#allocation26_spill] sm:$0xff] }
 0x20c   :  { %1538 = vmatprep.subr.bf16.mxu0 %v6091_v61  ;;  %v6100_v61 = vld [vmem:[#allocation27_spill] sm:$0xff] }
 0x20d   :  { %1578 = vmatpush2.bf16.msra.mxu1 %v6094_v0 }
 0x20e   :  { %1579 = vmatprep.subr.bf16.mxu1 %v6096_v20  ;;  %v6101_v20 = vld [vmem:[#allocation28_spill] sm:$0xff] }
 0x20f   :  { %1539 = vmatpush2.bf16.msra.mxu0 %v6093_v35 }
 0x210   :  { %1615 = vmatprep.subr.bf16.mxu0 %v6095_v31 }
 0x211   :  { %1580 = vmatpush2.bf16.msra.mxu1 %v6097_v63 }
 0x212   :  { %1656 = vmatprep.subr.bf16.mxu1 %v6098_v54  ;;  %v6102_v54 = vld [vmem:[#allocation29_spill] sm:$0xff] }
 0x272   :  { %v1110_v57 = vpop.f32.mrf.mxu0 }
 0x273   :  { %v1111_v53 = vadd.f32 %v1110_v57, %v6099_v60 }
 0x274   :  { %v1112_v58 = vpop.f32.mrf.mxu0  ;;  %v1151_v55 = vpop.f32.mrf.mxu1 }
 0x275   :  { %v3309_v56 = vmul.f32 -1.442695, %v1111_v53  ;;  %v1113_v50 = vadd.f32 %v1112_v58, %v6100_v61  ;;  %v1152_v52 = vadd.f32 %v1151_v55, %v6101_v20 }
 0x276   :  { %v1114_v62 = vpop.f32.mrf.mxu0  ;;  %v1153_v31 = vpop.f32.mrf.mxu1 }
 0x277   :  { %3682 = vpow2.f32 %v3309_v56  ;;  %v3310_v35 = vmul.f32 -1.442695, %v1113_v50  ;;  %v3311_v46 = vmul.f32 -1.442695, %v1152_v52  ;;  %v1154_v51 = vadd.f32 %v1153_v31, %v6102_v54 }
 0x278   :  { %v1115_v0 = vpop.f32.mrf.mxu0  ;;  %v1155_v49 = vpop.f32.mrf.mxu1 }
 0x279   :  { %3684 = vpow2.f32 %v3310_v35 }
 0x27a   :  { %v1156_v63 = vpop.f32.mrf.mxu1  ;;  %3686 = vpow2.f32 %v3311_v46 }
 0x27b   :  { %3688 = vtanh.f32 %v1154_v51  ;;  %v6103_v63 = vld [vmem:[#allocation32_spill] sm:$0xff]  ;;  %v6104_v51 = vld [vmem:[#allocation34_spill] sm:$0xff] }
 0x284   :  { %v3683_v44 = vpop.eup %3682 }
 0x285   :  { %v1167_v57 = vadd.f32 1.0, %v3683_v44 }
 0x286   :  { %v3685_v53 = vpop.eup %3684 }
 0x287   :  { %3690 = vrcp.f32 %v1167_v57  ;;  %v1168_v58 = vadd.f32 1.0, %v3685_v53  ;;  %v3687_v50 = vpop.eup %3686 }
 0x288   :  { %v3689_v56 = vpop.eup %3688  ;;  %v1169_v49 = vadd.f32 1.0, %v3687_v50 }
 0x289   :  { %3692 = vrcp.f32 %v1168_v58 }
 0x28a   :  { %3694 = vrcp.f32 %v1169_v49 }
 0x292   :  { %v1409_v0 = vpop.f32.mrf.mxu0 }
 0x293   :  { %v1461_v35 = vrot.slane %v1409_v0, 6 }
 0x294   :  { %v3691_v62 = vpop.eup %3690  ;;  %v1411_v61 = vpop.f32.mrf.mxu0 }
 0x295   :  { %v1178_v55 = vmul.f32 %v3691_v62, %v3689_v56  ;;  %v1469_v52 = vadd.f32 %v1461_v35, %v6103_v63  ;;  %v1462_v20 = vrot.slane %v1411_v61, 6  ;;  %v1450_v57 = vpop.f32.mrf.mxu1  ;;  %v6106_v35 = vld [vmem:[#allocation36_spill] sm:$0xff] }
 0x296   :  { %v3693_v31 = vpop.eup %3692  ;;  %v1413_v54 = vpop.f32.mrf.mxu0  ;;  %v1463_v56 = vrot.slane %v1450_v57, 6 }
 0x297   :  { %v1177_v46 = vmul.f32 0.0, %v3693_v31  ;;  %v3344_v44 = vmul.f32 -1.442695, %v1469_v52  ;;  %v1470_v60 = vadd.f32 %v1462_v20, %v6104_v51  ;;  %v1452_v48 = vpop.f32.mrf.mxu1  ;;  %v3695_v31 = vpop.eup %3694  ;;  %v6107_v20 = vld [vmem:[#allocation37_spill] sm:$0xff] }
 0x298   :  { %v1414_v53 = vpop.f32.mrf.mxu0  ;;  %v1471_v54 = vadd.f32 %v1463_v56, %v6106_v35  ;;  %v1464_v62 = vrot.slane %v1452_v48, 6 }
 0x299   :  { %v4773_v58 = vadd.f32 %v1178_v55, %v1177_v46  ;;  %3696 = vpow2.f32 %v3344_v44  ;;  %v3345_v0 = vmul.f32 -1.442695, %v1470_v60  ;;  %v1454_v50 = vpop.f32.mrf.mxu1 }
 0x29a   :  { %v3346_v52 = vmul.f32 -1.442695, %v1471_v54  ;;  %v1472_v51 = vadd.f32 %v1464_v62, %v6107_v20 }
 0x29b   :  { %6105 = vst [vmem:[#allocation32_spill] sm:$0xff] %v4773_v58  ;;  %3698 = vtanh.f32 %v4773_v58  ;;  %v1455_v61 = vpop.f32.mrf.mxu1 }
 0x29c   :  { %3700 = vpow2.f32 %v3345_v0  ;;  %v6108_v61 = vld [vmem:[#allocation38_spill] sm:$0xff] }
 0x29d   :  { %3702 = vpow2.f32 %v3346_v52  ;;  %v1493_v54 = vrot.slane %v6108_v61, 6  ;;  %v6118_v61 = vld [vmem:[#allocation84_spill] sm:$0xff] }
 0x29e   :  { %3704 = vtanh.f32 %v1472_v51 }
 0x2a6   :  { %v3697_v49 = vpop.eup %3696 }
 0x2a7   :  { %v1482_v53 = vadd.f32 1.0, %v3697_v49 }
 0x2a8   :  { %v3699_v55 = vpop.eup %3698 }
 0x2a9   :  { %v3701_v46 = vpop.eup %3700  ;;  %v1181_v60 = vmul.f32 %v3699_v55, %v3695_v31  ;;  %3706 = vrcp.f32 %v1482_v53 }
 0x2aa   :  { %v1483_v44 = vadd.f32 1.0, %v3701_v46  ;;  %v3703_v48 = vpop.eup %3702 }
 0x2ab   :  { %v1182_v50 = vpack.c.bf16 %v1181_v60, %v1181_v60  ;;  %v3705_v56 = vpop.eup %3704  ;;  %v1484_v49 = vadd.f32 1.0, %v3703_v48  ;;  %v6109_v60 = vld [vmem:[#allocation70_spill] sm:$0xff]  ;;  %v6116_v48 = vld [vmem:[#allocation81_spill] sm:$0xff] }
 0x2ac   :  { %3708 = vrcp.f32 %v1483_v44  ;;  %v6110_v44 = vld [vmem:[#allocation76_spill] sm:$0xff] }
 0x2ad   :  { %v1502_v57 = vrot.slane %v1182_v50, 7  ;;  %3710 = vrcp.f32 %v1484_v49  ;;  %v6111_v50 = vld [vmem:[#allocation71_spill] sm:$0xff]  ;;  %v6121_v49 = vld [vmem:[#allocation82_spill] sm:$0xff] }
 0x2af   :  { %v1505_v0 = vrot.slane %v1502_v57, 1  ;;  %v6114_v57 = vld [vmem:[#allocation80_spill] sm:$0xff] }
 0x2b1   :  { %1540 = vmatprep.mubr.bf16.mxu0 %v1505_v0  ;;  %1581 = vmatprep.mubr.bf16.mxu1 %v1505_v0  ;;  %v6115_v0 = vld [vmem:[#allocation75_spill] sm:$0xff] }
 0x2b6   :  { %v3707_v62 = vpop.eup %3706 }
 0x2b7   :  { %v1496_v52 = vmul.f32 %v3707_v62, %v3705_v56  ;;  %v6117_v56 = vld [vmem:[#allocation78_spill] sm:$0xff]  ;;  %v6120_v62 = vld [vmem:[#allocation85_spill] sm:$0xff] }
 0x2b9   :  { %v3709_v20 = vpop.eup %3708 }
 0x2ba   :  { %v1495_v35 = vmul.f32 %v3709_v20, %v1493_v54  ;;  %v3711_v51 = vpop.eup %3710  ;;  %v6112_v20 = vld [vmem:[#allocation77_spill] sm:$0xff]  ;;  %v6119_v54 = vld [vmem:[#allocation79_spill] sm:$0xff] }
 0x2bc   :  { %v4779_v58 = vadd.f32 %v1496_v52, %v1495_v35  ;;  %v6113_v35 = vld [vmem:[#allocation74_spill] sm:$0xff]  ;;  %v6122_v52 = vld [vmem:[#allocation88_spill] sm:$0xff] }
 0x2be   :  { %3712 = vtanh.f32 %v4779_v58 }
 0x2cb   :  { %v3713_v31 = vpop.eup %3712 }
 0x2cc   :  { %v1499_v53 = vmul.f32 %v3713_v31, %v3711_v51  ;;  %v6123_v51 = vld [vmem:[#allocation83_spill] sm:$0xff]  ;;  %v6124_v31 = vld [vmem:[#allocation89_spill] sm:$0xff] }
 0x2ce   :  { %v1500_v55 = vpack.c.bf16 %v1499_v53, %v1499_v53  ;;  %v6125_v53 = vld [vmem:[#allocation86_spill] sm:$0xff] }
 0x2d0   :  { %v1504_v46 = vrot.slane %v1500_v55, 1  ;;  %v6126_v55 = vld [vmem:[#allocation87_spill] sm:$0xff] }
 0x2d2   :  { %1541 = vmatmul.mubr.bf16.vlgmr.msra.gmra.mxu0 %v1504_v46  ;;  %1582 = vmatmul.mubr.bf16.vlgmr.msra.gmra.mxu1 %v1504_v46 }
 0x2d3   :  { %1616 = vmatpush1.bf16.msra.mxu0 %v6109_v60  ;;  %1657 = vmatpush1.bf16.msra.mxu1 %v6110_v44 }
 0x2d4   :  { %1617 = vmatprep.subr.bf16.mxu0 %v6111_v50  ;;  %1658 = vmatprep.subr.bf16.mxu1 %v6112_v20 }
 0x2d5   :  { %1647 = vmatprep.mubr.bf16.mxu0 %v6067_v10  ;;  %1688 = vmatprep.mubr.bf16.mxu1 %v6067_v10 }
 0x2d7   :  { %1618 = vmatpush1.bf16.msra.mxu0 %v6113_v35  ;;  %1659 = vmatpush1.bf16.msra.mxu1 %v6114_v57 }
 0x2d8   :  { %1619 = vmatprep.subr.bf16.mxu0 %v6115_v0  ;;  %1660 = vmatprep.subr.bf16.mxu1 %v6116_v48 }
 0x2db   :  { %1620 = vmatpush1.bf16.msra.mxu0 %v6117_v56  ;;  %1661 = vmatpush1.bf16.msra.mxu1 %v6118_v61  ;;  %v6127_v56 = vld [vmem:[#allocation92_spill] sm:$0xff]  ;;  %v6128_v61 = vld [vmem:[#allocation90_spill] sm:$0xff] }
 0x2dc   :  { %1621 = vmatprep.subr.bf16.mxu0 %v6119_v54  ;;  %1662 = vmatprep.subr.bf16.mxu1 %v6120_v62  ;;  %v6129_v62 = vld [vmem:[#allocation91_spill] sm:$0xff] }
 0x2df   :  { %1622 = vmatpush1.bf16.msra.mxu0 %v6121_v49  ;;  %1663 = vmatpush1.bf16.msra.mxu1 %v6122_v52 }
 0x2e0   :  { %1623 = vmatprep.subr.bf16.mxu0 %v6123_v51  ;;  %1664 = vmatprep.subr.bf16.mxu1 %v6124_v31 }
 0x2e3   :  { %1624 = vmatpush1.bf16.msra.mxu0 %v6125_v53  ;;  %1665 = vmatpush1.bf16.msra.mxu1 %v4666_v32 }
 0x2e4   :  { %1625 = vmatprep.subr.bf16.mxu0 %v6126_v55  ;;  %1666 = vmatprep.subr.bf16.mxu1 %v6127_v56 }
 0x2e7   :  { %1626 = vmatpush1.bf16.msra.mxu0 %v6128_v61  ;;  %1667 = vmatpush1.bf16.msra.mxu1 %v4678_v29 }
 0x2e8   :  { %1627 = vmatprep.subr.bf16.mxu0 %v6129_v62  ;;  %1668 = vmatprep.subr.bf16.mxu1 %v4681_v45 }
 0x2eb   :  { %1628 = vmatpush1.bf16.msra.mxu0 %v4672_v6  ;;  %1669 = vmatpush1.bf16.msra.mxu1 %v4688_v59 }
 0x2ec   :  { %1629 = vmatprep.subr.bf16.mxu0 %v4675_v18  ;;  %1670 = vmatprep.subr.bf16.mxu1 %v4691_v11 }
 0x2ef   :  { %1630 = vmatpush1.bf16.msra.mxu0 %v4684_v42  ;;  %1671 = vmatpush1.bf16.msra.mxu1 %v4695_v7 }
 0x2f0   :  { %1748 = vmatprep.subr.bf16.mxu0 %v4407_v1  ;;  %1789 = vmatprep.subr.bf16.mxu1 %v4420_v8  ;;  %v6130_v1 = vld [vmem:[#allocation41_spill] sm:$0xff]  ;;  %v6135_v8 = vld [vmem:[#allocation42_spill] sm:$0xff] }
 0x2f2   :  { %1648 = vmatmul.mubr.bf16.vlgmr.msra.gmra.mxu0 %v1504_v46  ;;  %1689 = vmatmul.mubr.bf16.vlgmr.msra.gmra.mxu1 %v1504_v46 }
 0x2f3   :  { %1749 = vmatpush1.bf16.msra.mxu0 %v4409_v2  ;;  %1790 = vmatpush1.bf16.msra.mxu1 %v4422_v9  ;;  %v6131_v2 = vld [vmem:[#allocation39_spill] sm:$0xff]  ;;  %v6136_v9 = vld [vmem:[#allocation48_spill] sm:$0xff] }
 0x2f4   :  { %1750 = vmatprep.subr.bf16.mxu0 %v4412_v3  ;;  %1791 = vmatprep.subr.bf16.mxu1 %v4432_v14  ;;  %v6132_v3 = vld [vmem:[#allocation44_spill] sm:$0xff]  ;;  %v6139_v14 = vld [vmem:[#allocation46_spill] sm:$0xff] }
 0x2f7   :  { %1751 = vmatpush1.bf16.msra.mxu0 %v4415_v4  ;;  %1792 = vmatpush1.bf16.msra.mxu1 %v4434_v15  ;;  %v6133_v4 = vld [vmem:[#allocation40_spill] sm:$0xff] }
 0x2f8   :  { %1752 = vmatprep.subr.bf16.mxu0 %v4418_v5  ;;  %1793 = vmatprep.subr.bf16.mxu1 %v4442_v19  ;;  %v6134_v5 = vld [vmem:[#allocation45_spill] sm:$0xff]  ;;  %v6140_v15 = vld [vmem:[#allocation52_spill] sm:$0xff]  ;;  %v6143_v19 = vld [vmem:[#allocation50_spill] sm:$0xff] }
 0x2fb   :  { %1753 = vmatpush1.bf16.msra.mxu0 %v4425_v12  ;;  %1794 = vmatpush1.bf16.msra.mxu1 %v4446_v21  ;;  %v6137_v12 = vld [vmem:[#allocation43_spill] sm:$0xff]  ;;  %v6144_v21 = vld [vmem:[#allocation56_spill] sm:$0xff] }
 0x2fc   :  { %1754 = vmatprep.subr.bf16.mxu0 %v4429_v13  ;;  %1795 = vmatprep.subr.bf16.mxu1 %v4449_v22  ;;  %v6138_v13 = vld [vmem:[#allocation49_spill] sm:$0xff]  ;;  %v6145_v22 = vld [vmem:[#allocation51_spill] sm:$0xff] }
 0x2ff   :  { %1755 = vmatpush1.bf16.msra.mxu0 %v4438_v16  ;;  %1796 = vmatpush1.bf16.msra.mxu1 %v4458_v25  ;;  %v6141_v16 = vld [vmem:[#allocation47_spill] sm:$0xff]  ;;  %v6148_v25 = vld [vmem:[#allocation60_spill] sm:$0xff] }
 0x300   :  { %1756 = vmatprep.subr.bf16.mxu0 %v4440_v17  ;;  %1797 = vmatprep.subr.bf16.mxu1 %v4461_v26  ;;  %v6142_v17 = vld [vmem:[#allocation53_spill] sm:$0xff]  ;;  %v6149_v26 = vld [vmem:[#allocation55_spill] sm:$0xff] }
 0x303   :  { %1757 = vmatpush1.bf16.msra.mxu0 %v4452_v23  ;;  %1798 = vmatpush1.bf16.msra.mxu1 %v4470_v30  ;;  %v6146_v23 = vld [vmem:[#allocation57_spill] sm:$0xff]  ;;  %v6152_v30 = vld [vmem:[#allocation64_spill] sm:$0xff] }
 0x304   :  { %1758 = vmatprep.subr.bf16.mxu0 %v4455_v24  ;;  %1799 = vmatprep.subr.bf16.mxu1 %v4473_v33  ;;  %v6147_v24 = vld [vmem:[#allocation54_spill] sm:$0xff]  ;;  %v6153_v33 = vld [vmem:[#allocation59_spill] sm:$0xff] }
 0x307   :  { %1759 = vmatpush1.bf16.msra.mxu0 %v4464_v27  ;;  %1800 = vmatpush1.bf16.msra.mxu1 %v4482_v37  ;;  %v6150_v27 = vld [vmem:[#allocation61_spill] sm:$0xff]  ;;  %v6156_v37 = vld [vmem:[#allocation68_spill] sm:$0xff] }
 0x308   :  { %1760 = vmatprep.subr.bf16.mxu0 %v4466_v28  ;;  %1801 = vmatprep.subr.bf16.mxu1 %v4485_v38  ;;  %v6151_v28 = vld [vmem:[#allocation58_spill] sm:$0xff]  ;;  %v6157_v38 = vld [vmem:[#allocation63_spill] sm:$0xff] }
 0x30b   :  { %1761 = vmatpush1.bf16.msra.mxu0 %v4476_v34  ;;  %1802 = vmatpush1.bf16.msra.mxu1 %v4494_v41  ;;  %v6154_v34 = vld [vmem:[#allocation65_spill] sm:$0xff]  ;;  %v6160_v41 = vld [vmem:[#allocation72_spill] sm:$0xff] }
 0x30c   :  { %1762 = vmatprep.subr.bf16.mxu0 %v4479_v36  ;;  %1803 = vmatprep.subr.bf16.mxu1 %v4497_v43  ;;  %v6155_v36 = vld [vmem:[#allocation62_spill] sm:$0xff]  ;;  %v6161_v43 = vld [vmem:[#allocation67_spill] sm:$0xff] }
 0x30f   :  { %1763 = vmatpush1.bf16.msra.mxu0 %v4488_v39  ;;  %1804 = vmatpush1.bf16.msra.mxu1 %v4506_v47  ;;  %v6158_v39 = vld [vmem:[#allocation69_spill] sm:$0xff] }
 0x310   :  { %1764 = vmatprep.subr.bf16.mxu0 %v4490_v40  ;;  %1805 = vmatprep.subr.bf16.mxu1 %v6130_v1  ;;  %v6159_v40 = vld [vmem:[#allocation66_spill] sm:$0xff]  ;;  %v6162_v47 = vld [vmem:[#allocation73_spill] sm:$0xff] }
 0x313   :  { %1765 = vmatpush2.bf16.msra.mxu0 %v6131_v2  ;;  %1806 = vmatpush2.bf16.msra.mxu1 %v6132_v3  ;;  %v6163_v2 = vld [vmem:[#allocation26_spill] sm:$0xff] }
 0x314   :  { %1766 = vmatprep.subr.bf16.mxu0 %v6133_v4  ;;  %1807 = vmatprep.subr.bf16.mxu1 %v6134_v5 }
 0x317   :  { %1767 = vmatpush2.bf16.msra.mxu0 %v6135_v8  ;;  %1808 = vmatpush2.bf16.msra.mxu1 %v6136_v9  ;;  %v6164_v9 = vld [vmem:[#allocation27_spill] sm:$0xff] }
 0x318   :  { %1768 = vmatprep.subr.bf16.mxu0 %v6137_v12  ;;  %1809 = vmatprep.subr.bf16.mxu1 %v6138_v13 }
 0x31b   :  { %1769 = vmatpush2.bf16.msra.mxu0 %v6139_v14  ;;  %1810 = vmatpush2.bf16.msra.mxu1 %v6140_v15 }
 0x31c   :  { %1770 = vmatprep.subr.bf16.mxu0 %v6141_v16  ;;  %1811 = vmatprep.subr.bf16.mxu1 %v6142_v17 }
 0x31f   :  { %1771 = vmatpush2.bf16.msra.mxu0 %v6143_v19  ;;  %1812 = vmatpush2.bf16.msra.mxu1 %v6144_v21  ;;  %v6165_v19 = vld [vmem:[#allocation28_spill] sm:$0xff] }
 0x320   :  { %1772 = vmatprep.subr.bf16.mxu0 %v6145_v22  ;;  %1813 = vmatprep.subr.bf16.mxu1 %v6146_v23 }
 0x323   :  { %1773 = vmatpush2.bf16.msra.mxu0 %v6147_v24  ;;  %1814 = vmatpush2.bf16.msra.mxu1 %v6148_v25  ;;  %v6166_v24 = vld [vmem:[#allocation29_spill] sm:$0xff] }
 0x324   :  { %1774 = vmatprep.subr.bf16.mxu0 %v6149_v26  ;;  %1815 = vmatprep.subr.bf16.mxu1 %v6150_v27 }
 0x327   :  { %1775 = vmatpush2.bf16.msra.mxu0 %v6151_v28  ;;  %1816 = vmatpush2.bf16.msra.mxu1 %v6152_v30 }
 0x328   :  { %1776 = vmatprep.subr.bf16.mxu0 %v6153_v33  ;;  %1817 = vmatprep.subr.bf16.mxu1 %v6154_v34 }
 0x32b   :  { %1777 = vmatpush2.bf16.msra.mxu0 %v6155_v36  ;;  %1818 = vmatpush2.bf16.msra.mxu1 %v6156_v37 }
 0x32c   :  { %1778 = vmatprep.subr.bf16.mxu0 %v6157_v38  ;;  %1819 = vmatprep.subr.bf16.mxu1 %v6158_v39 }
 0x32f   :  { %1779 = vmatpush2.bf16.msra.mxu0 %v6159_v40  ;;  %1820 = vmatpush2.bf16.msra.mxu1 %v6160_v41 }
 0x330   :  { %1855 = vmatprep.subr.bf16.mxu0 %v6161_v43  ;;  %1896 = vmatprep.subr.bf16.mxu1 %v6162_v47 }
 0x392   :  { %v1542_v46 = vpop.f32.mrf.mxu0  ;;  %v1583_v1 = vpop.f32.mrf.mxu1 }
 0x393   :  { %v1543_v3 = vadd.f32 %v1542_v46, %v6163_v2  ;;  %v1584_v21 = vadd.f32 %v1583_v1, %v6165_v19 }
 0x394   :  { %v1544_v4 = vpop.f32.mrf.mxu0  ;;  %v1585_v5 = vpop.f32.mrf.mxu1 }
 0x395   :  { %v3347_v8 = vmul.f32 -1.442695, %v1543_v3  ;;  %v1545_v12 = vadd.f32 %v1544_v4, %v6164_v9  ;;  %v3349_v22 = vmul.f32 -1.442695, %v1584_v21  ;;  %v1586_v25 = vadd.f32 %v1585_v5, %v6166_v24  ;;  %v6167_v4 = vld [vmem:[#allocation32_spill] sm:$0xff] }
 0x396   :  { %v1546_v13 = vpop.f32.mrf.mxu0  ;;  %v1587_v14 = vpop.f32.mrf.mxu1 }
 0x397   :  { %3714 = vpow2.f32 %v3347_v8  ;;  %v3348_v15 = vmul.f32 -1.442695, %v1545_v12  ;;  %v6168_v13 = vld [vmem:[#allocation34_spill] sm:$0xff] }
 0x398   :  { %v1547_v16 = vpop.f32.mrf.mxu0  ;;  %v1588_v17 = vpop.f32.mrf.mxu1 }
 0x399   :  { %3716 = vpow2.f32 %v3348_v15 }
 0x39a   :  { %3718 = vpow2.f32 %v3349_v22 }
 0x3a4   :  { %v3715_v23 = vpop.eup %3714 }
 0x3a5   :  { %v1599_v26 = vadd.f32 1.0, %v3715_v23  ;;  %v6169_v23 = vld [vmem:[#allocation36_spill] sm:$0xff] }
 0x3a6   :  { %v3717_v27 = vpop.eup %3716 }
 0x3a7   :  { %3720 = vrcp.f32 %v1599_v26  ;;  %v1600_v28 = vadd.f32 1.0, %v3717_v27  ;;  %v3719_v34 = vpop.eup %3718 }
 0x3a8   :  { %3722 = vtanh.f32 %v1586_v25  ;;  %v1601_v46 = vadd.f32 1.0, %v3719_v34 }
 0x3a9   :  { %3724 = vrcp.f32 %v1600_v28 }
 0x3b2   :  { %v1649_v30 = vpop.f32.mrf.mxu0  ;;  %v1690_v33 = vpop.f32.mrf.mxu1 }
 0x3b3   :  { %v1701_v36 = vrot.slane %v1649_v30, 4  ;;  %v1703_v22 = vrot.slane %v1690_v33, 4 }
 0x3b4   :  { %v3721_v37 = vpop.eup %3720  ;;  %v1651_v38 = vpop.f32.mrf.mxu0 }
 0x3b5   :  { %v1692_v39 = vpop.f32.mrf.mxu1  ;;  %v3723_v40 = vpop.eup %3722  ;;  %v1709_v41 = vadd.f32 %v1701_v36, %v6103_v63  ;;  %v1702_v43 = vrot.slane %v1651_v38, 4  ;;  %v1711_v25 = vadd.f32 %v1703_v22, %v6169_v23  ;;  %v6170_v36 = vld [vmem:[#allocation37_spill] sm:$0xff] }
 0x3b6   :  { %v3725_v47 = vpop.eup %3724  ;;  %v1653_v1 = vpop.f32.mrf.mxu0  ;;  %v1610_v8 = vmul.f32 %v3723_v40, %v3721_v37  ;;  %v1704_v26 = vrot.slane %v1692_v39, 4 }
 0x3b7   :  { %v1694_v3 = vpop.f32.mrf.mxu1  ;;  %v1609_v5 = vmul.f32 %v3725_v47, %v6167_v4  ;;  %v3350_v12 = vmul.f32 -1.442695, %v1709_v41  ;;  %v1710_v14 = vadd.f32 %v1702_v43, %v6168_v13  ;;  %v3352_v27 = vmul.f32 -1.442695, %v1711_v25 }
 0x3b8   :  { %v1654_v15 = vpop.f32.mrf.mxu0  ;;  %v1712_v37 = vadd.f32 %v1704_v26, %v6170_v36  ;;  %v1733_v4 = vrot.slane %v4779_v58, 6  ;;  %v6171_v58 = vld [vmem:[#allocation78_spill] sm:$0xff] }
 0x3b9   :  { %v1695_v16 = vpop.f32.mrf.mxu1  ;;  %v4887_v17 = vadd.f32 %v1610_v8, %v1609_v5  ;;  %3726 = vpow2.f32 %v3350_v12  ;;  %v3351_v21 = vmul.f32 -1.442695, %v1710_v14 }
 0x3ba   :  { %3728 = vrcp.f32 %v1601_v46 }
 0x3bb   :  { %3730 = vtanh.f32 %v4887_v17 }
 0x3bc   :  { %3732 = vpow2.f32 %v3351_v21 }
 0x3bd   :  { %3734 = vpow2.f32 %v3352_v27  ;;  %v5003_v27 = vld [vmem:[#allocation2 + $0x2c] ss:$16 sps:$4 sm:$0xff]  }
 0x3be   :  { %6184 = vst [vmem:[#allocation82_spill] sm:$0xff] %v5003_v27 }
 0x3c6   :  { %v3727_v28 = vpop.eup %3726 }
 0x3c7   :  { %v3729_v30 = vpop.eup %3728  ;;  %v1722_v34 = vadd.f32 1.0, %v3727_v28  ;;  %v5006_v28 = vld [vmem:[#allocation2 + $0x20] ss:$16 sps:$4 sm:$0xff]  }
 0x3c8   :  { %v3731_v38 = vpop.eup %3730  ;;  %6185 = vst [vmem:[#allocation88_spill] sm:$0xff] %v5006_v28 }
 0x3c9   :  { %v3733_v40 = vpop.eup %3732  ;;  %v1613_v41 = vmul.f32 %v3731_v38, %v3729_v30  ;;  %3736 = vrcp.f32 %v1722_v34  ;;  %v5009_v30 = vld [vmem:[#allocation2 + $0x28] ss:$16 sps:$4 sm:$0xff]   ;;  %v5012_v34 = vld [vmem:[#allocation2 + $0x4] ss:$16 sps:$4 sm:$0xff]   ;;  %v5018_v38 = vld [vmem:[#allocation2] ss:$16 sps:$4 sm:$0xff]  }
 0x3ca   :  { %v1723_v43 = vadd.f32 1.0, %v3733_v40  ;;  %3738 = vtanh.f32 %v1712_v37  ;;  %v3735_v39 = vpop.eup %3734  ;;  %6186 = vst [vmem:[#allocation83_spill] sm:$0xff] %v5009_v30  ;;  %6187 = vst [vmem:[#allocation89_spill] sm:$0xff] %v5012_v34  ;;  %v5015_v37 = vld [vmem:[#allocation2 + $0xc] ss:$16 sps:$4 sm:$0xff]  }
 0x3cb   :  { %v1614_v47 = vpack.c.bf16 %v1613_v41, %v1613_v41  ;;  %v1724_v8 = vadd.f32 1.0, %v3735_v39  ;;  %6188 = vst [vmem:[#allocation86_spill] sm:$0xff] %v5015_v37  ;;  %6189 = vst [vmem:[#allocation87_spill] sm:$0xff] %v5018_v38  ;;  %v5021_v40 = vld [vmem:[#allocation2 + $0x8] ss:$16 sps:$4 sm:$0xff]  }
 0x3cc   :  { %3740 = vrcp.f32 %v1723_v43  ;;  %6190 = vst [vmem:[#allocation92_spill] sm:$0xff] %v5021_v40  ;;  %v5024_v41 = vld [vmem:[#allocation2 + $0x1e4] ss:$16 sps:$4 sm:$0xff]   ;;  %v5027_v43 = vld [vmem:[#allocation2 + $0x1ec] ss:$16 sps:$4 sm:$0xff]  }
 0x3cd   :  { %v1742_v46 = vrot.slane %v1614_v47, 6  ;;  %3742 = vrcp.f32 %v1724_v8  ;;  %6191 = vst [vmem:[#allocation90_spill] sm:$0xff] %v5024_v41  ;;  %6192 = vst [vmem:[#allocation91_spill] sm:$0xff] %v5027_v43  ;;  %v5030_v47 = vld [vmem:[#allocation2 + $0x1e0] ss:$16 sps:$4 sm:$0xff]  }
 0x3ce   :  { %6193 = vst [vmem:[#allocation41_spill] sm:$0xff] %v5030_v47  ;;  %v5039_v39 = vld [vmem:[#allocation2 + $0x1cc] ss:$16 sps:$4 sm:$0xff]   ;;  %v5054_v8 = vld [vmem:[#allocation2 + $0x1a0] ss:$16 sps:$4 sm:$0xff]  }
 0x3cf   :  { %v1745_v33 = vrot.slane %v1742_v46, 2  ;;  %v5033_v46 = vld [vmem:[#allocation2 + $0x1e8] ss:$16 sps:$4 sm:$0xff]   ;;  %6196 = vst [vmem:[#allocation40_spill] sm:$0xff] %v5039_v39  ;;  %6201 = vst [vmem:[#allocation49_spill] sm:$0xff] %v5054_v8 }
 0x3d0   :  { %6194 = vst [vmem:[#allocation39_spill] sm:$0xff] %v5033_v46 }
 0x3d1   :  { %1780 = vmatprep.mubr.bf16.mxu0 %v1745_v33  ;;  %1821 = vmatprep.mubr.bf16.mxu1 %v1745_v33  ;;  %v5036_v33 = vld [vmem:[#allocation2 + $0x1c4] ss:$16 sps:$4 sm:$0xff]  }
 0x3d2   :  { %6195 = vst [vmem:[#allocation44_spill] sm:$0xff] %v5036_v33 }
 0x3d6   :  { %v3737_v1 = vpop.eup %3736 }
 0x3d7   :  { %v3739_v3 = vpop.eup %3738 }
 0x3d8   :  { %v1736_v14 = vmul.f32 %v3739_v3, %v3737_v1  ;;  %v5042_v1 = vld [vmem:[#allocation2 + $0x1c0] ss:$16 sps:$4 sm:$0xff]   ;;  %v5045_v3 = vld [vmem:[#allocation2 + $0x1c8] ss:$16 sps:$4 sm:$0xff]  }
 0x3d9   :  { %v3741_v5 = vpop.eup %3740  ;;  %6197 = vst [vmem:[#allocation45_spill] sm:$0xff] %v5042_v1  ;;  %6198 = vst [vmem:[#allocation42_spill] sm:$0xff] %v5045_v3 }
 0x3da   :  { %v1735_v12 = vmul.f32 %v3741_v5, %v1733_v4  ;;  %v3743_v16 = vpop.eup %3742  ;;  %v5048_v4 = vld [vmem:[#allocation2 + $0x1a4] ss:$16 sps:$4 sm:$0xff]   ;;  %v5051_v5 = vld [vmem:[#allocation2 + $0x1ac] ss:$16 sps:$4 sm:$0xff]  }
 0x3db   :  { %6199 = vst [vmem:[#allocation48_spill] sm:$0xff] %v5048_v4  ;;  %6200 = vst [vmem:[#allocation43_spill] sm:$0xff] %v5051_v5 }
 0x3dc   :  { %v4893_v15 = vadd.f32 %v1736_v14, %v1735_v12  ;;  %v5057_v12 = vld [vmem:[#allocation2 + $0x1a8] ss:$16 sps:$4 sm:$0xff]   ;;  %v5060_v14 = vld [vmem:[#allocation2 + $0x184] ss:$16 sps:$4 sm:$0xff]  }
 0x3dd   :  { %6202 = vst [vmem:[#allocation46_spill] sm:$0xff] %v5057_v12  ;;  %6203 = vst [vmem:[#allocation52_spill] sm:$0xff] %v5060_v14 }
 0x3de   :  { %3744 = vtanh.f32 %v4893_v15 }
 0x3eb   :  { %v3745_v21 = vpop.eup %3744 }
 0x3ec   :  { %v1739_v22 = vmul.f32 %v3745_v21, %v3743_v16  ;;  %v5063_v16 = vld [vmem:[#allocation2 + $0x18c] ss:$16 sps:$4 sm:$0xff]   ;;  %v5066_v21 = vld [vmem:[#allocation2 + $0x180] ss:$16 sps:$4 sm:$0xff]  }
 0x3ed   :  { %6204 = vst [vmem:[#allocation47_spill] sm:$0xff] %v5063_v16  ;;  %6205 = vst [vmem:[#allocation53_spill] sm:$0xff] %v5066_v21 }
 0x3ee   :  { %v1740_v25 = vpack.c.bf16 %v1739_v22, %v1739_v22  ;;  %v5069_v22 = vld [vmem:[#allocation2 + $0x188] ss:$16 sps:$4 sm:$0xff]  }
 0x3ef   :  { %6206 = vst [vmem:[#allocation50_spill] sm:$0xff] %v5069_v22 }
 0x3f0   :  { %v1744_v26 = vrot.slane %v1740_v25, 2  ;;  %v5072_v25 = vld [vmem:[#allocation2 + $0x164] ss:$16 sps:$4 sm:$0xff]  }
 0x3f1   :  { %6207 = vst [vmem:[#allocation56_spill] sm:$0xff] %v5072_v25 }
 0x3f2   :  { %1781 = vmatmul.mubr.bf16.vlgmr.msra.gmra.mxu0 %v1744_v26  ;;  %1822 = vmatmul.mubr.bf16.vlgmr.msra.gmra.mxu1 %v1744_v26 }
 0x3f3   :  { %1856 = vmatpush1.bf16.msra.mxu0 %v6109_v60  ;;  %1897 = vmatpush1.bf16.msra.mxu1 %v6110_v44  ;;  %v6172_v60 = vld [vmem:[#allocation84_spill] sm:$0xff]  ;;  %v6173_v44 = vld [vmem:[#allocation85_spill] sm:$0xff] }
 0x3f4   :  { %1857 = vmatprep.subr.bf16.mxu0 %v6111_v50  ;;  %1898 = vmatprep.subr.bf16.mxu1 %v6112_v20  ;;  %v4955_v50 = vld [vmem:[#allocation2 + $0xac] ss:$16 sps:$4 sm:$0xff]   ;;  %v4958_v20 = vld [vmem:[#allocation2 + $0xa0] ss:$16 sps:$4 sm:$0xff]  }
 0x3f5   :  { %1887 = vmatprep.mubr.bf16.mxu0 %v6067_v10  ;;  %1928 = vmatprep.mubr.bf16.mxu1 %v6067_v10 }
 0x3f7   :  { %1858 = vmatpush1.bf16.msra.mxu0 %v6113_v35  ;;  %1899 = vmatpush1.bf16.msra.mxu1 %v6114_v57  ;;  %v4961_v35 = vld [vmem:[#allocation2 + $0xa8] ss:$16 sps:$4 sm:$0xff]   ;;  %v4964_v57 = vld [vmem:[#allocation2 + $0x84] ss:$16 sps:$4 sm:$0xff]  }
 0x3f8   :  { %1859 = vmatprep.subr.bf16.mxu0 %v6115_v0  ;;  %1900 = vmatprep.subr.bf16.mxu1 %v6116_v48  ;;  %v4967_v0 = vld [vmem:[#allocation2 + $0x8c] ss:$16 sps:$4 sm:$0xff]   ;;  %v4970_v48 = vld [vmem:[#allocation2 + $0x80] ss:$16 sps:$4 sm:$0xff]  }
 0x3fb   :  { %1860 = vmatpush1.bf16.msra.mxu0 %v6171_v58  ;;  %1901 = vmatpush1.bf16.msra.mxu1 %v6172_v60  ;;  %v5078_v58 = vld [vmem:[#allocation2 + $0x160] ss:$16 sps:$4 sm:$0xff]   ;;  %v5081_v60 = vld [vmem:[#allocation2 + $0x168] ss:$16 sps:$4 sm:$0xff]  }
 0x3fc   :  { %1861 = vmatprep.subr.bf16.mxu0 %v6119_v54  ;;  %1902 = vmatprep.subr.bf16.mxu1 %v6173_v44  ;;  %v4979_v54 = vld [vmem:[#allocation2 + $0x6c] ss:$16 sps:$4 sm:$0xff]   ;;  %6209 = vst [vmem:[#allocation57_spill] sm:$0xff] %v5078_v58  ;;  %6210 = vst [vmem:[#allocation54_spill] sm:$0xff] %v5081_v60  ;;  %v5084_v44 = vld [vmem:[#allocation2 + $0x144] ss:$16 sps:$4 sm:$0xff]  }
 0x3fd   :  { %6176 = vst [vmem:[#allocation76_spill] sm:$0xff] %v4979_v54  ;;  %6211 = vst [vmem:[#allocation60_spill] sm:$0xff] %v5084_v44 }
 0x3ff   :  { %1862 = vmatpush1.bf16.msra.mxu0 %v6121_v49  ;;  %1903 = vmatpush1.bf16.msra.mxu1 %v6122_v52  ;;  %v4985_v49 = vld [vmem:[#allocation2 + $0x68] ss:$16 sps:$4 sm:$0xff]   ;;  %v4988_v52 = vld [vmem:[#allocation2 + $0x44] ss:$16 sps:$4 sm:$0xff]  }
 0x400   :  { %1863 = vmatprep.subr.bf16.mxu0 %v6123_v51  ;;  %1904 = vmatprep.subr.bf16.mxu1 %v6124_v31  ;;  %6178 = vst [vmem:[#allocation77_spill] sm:$0xff] %v4985_v49  ;;  %6179 = vst [vmem:[#allocation74_spill] sm:$0xff] %v4988_v52  ;;  %v4991_v51 = vld [vmem:[#allocation2 + $0x4c] ss:$16 sps:$4 sm:$0xff]   ;;  %v4994_v31 = vld [vmem:[#allocation2 + $0x40] ss:$16 sps:$4 sm:$0xff]  }
 0x401   :  { %6180 = vst [vmem:[#allocation80_spill] sm:$0xff] %v4991_v51  ;;  %6181 = vst [vmem:[#allocation75_spill] sm:$0xff] %v4994_v31 }
 0x403   :  { %1864 = vmatpush1.bf16.msra.mxu0 %v6125_v53  ;;  %1905 = vmatpush1.bf16.msra.mxu1 %v4666_v32  ;;  %v4928_v32 = vld [vmem:[#allocation2 + $0xe4] ss:$16 sps:$4 sm:$0xff]   ;;  %v4997_v53 = vld [vmem:[#allocation2 + $0x48] ss:$16 sps:$4 sm:$0xff]  }
 0x404   :  { %1865 = vmatprep.subr.bf16.mxu0 %v6126_v55  ;;  %1906 = vmatprep.subr.bf16.mxu1 %v6127_v56  ;;  %v4973_v56 = vld [vmem:[#allocation2 + $0x88] ss:$16 sps:$4 sm:$0xff]   ;;  %6182 = vst [vmem:[#allocation81_spill] sm:$0xff] %v4997_v53  ;;  %v5000_v55 = vld [vmem:[#allocation2 + $0x24] ss:$16 sps:$4 sm:$0xff]  }
 0x405   :  { %6174 = vst [vmem:[#allocation38_spill] sm:$0xff] %v4973_v56  ;;  %6183 = vst [vmem:[#allocation79_spill] sm:$0xff] %v5000_v55 }
 0x407   :  { %1866 = vmatpush1.bf16.msra.mxu0 %v6128_v61  ;;  %1907 = vmatpush1.bf16.msra.mxu1 %v4678_v29  ;;  %v4931_v29 = vld [vmem:[#allocation2 + $0xec] ss:$16 sps:$4 sm:$0xff]   ;;  %v4976_v61 = vld [vmem:[#allocation2 + $0x64] ss:$16 sps:$4 sm:$0xff]  }
 0x408   :  { %1867 = vmatprep.subr.bf16.mxu0 %v6129_v62  ;;  %1908 = vmatprep.subr.bf16.mxu1 %v4681_v45  ;;  %v4949_v45 = vld [vmem:[#allocation2 + $0xc8] ss:$16 sps:$4 sm:$0xff]   ;;  %6175 = vst [vmem:[#allocation70_spill] sm:$0xff] %v4976_v61  ;;  %v4982_v62 = vld [vmem:[#allocation2 + $0x60] ss:$16 sps:$4 sm:$0xff]  }
 0x409   :  { %6177 = vst [vmem:[#allocation71_spill] sm:$0xff] %v4982_v62 }
 0x40b   :  { %1868 = vmatpush1.bf16.msra.mxu0 %v4672_v6  ;;  %1909 = vmatpush1.bf16.msra.mxu1 %v4688_v59  ;;  %v4934_v6 = vld [vmem:[#allocation2 + $0xe0] ss:$16 sps:$4 sm:$0xff]   ;;  %v4952_v59 = vld [vmem:[#allocation2 + $0xa4] ss:$16 sps:$4 sm:$0xff]  }
 0x40c   :  { %1869 = vmatprep.subr.bf16.mxu0 %v4675_v18  ;;  %1910 = vmatprep.subr.bf16.mxu1 %v4691_v11  ;;  %v4937_v18 = vld [vmem:[#allocation2 + $0xe8] ss:$16 sps:$4 sm:$0xff]   ;;  %v4940_v11 = vld [vmem:[#allocation2 + $0xc4] ss:$16 sps:$4 sm:$0xff]  }
 0x40f   :  { %1870 = vmatpush1.bf16.msra.mxu0 %v4684_v42  ;;  %1911 = vmatpush1.bf16.msra.mxu1 %v4695_v7  ;;  %v4943_v7 = vld [vmem:[#allocation2 + $0xcc] ss:$16 sps:$4 sm:$0xff]   ;;  %v4946_v42 = vld [vmem:[#allocation2 + $0xc0] ss:$16 sps:$4 sm:$0xff]  }
 0x410   :  { %1988 = vmatprep.subr.bf16.mxu0 %v4928_v32  ;;  %2029 = vmatprep.subr.bf16.mxu1 %v4931_v29 }
 0x412   :  { %1888 = vmatmul.mubr.bf16.vlgmr.msra.gmra.mxu0 %v1744_v26  ;;  %1929 = vmatmul.mubr.bf16.vlgmr.msra.gmra.mxu1 %v1744_v26  ;;  %v5075_v26 = vld [vmem:[#allocation2 + $0x16c] ss:$16 sps:$4 sm:$0xff]  }
 0x413   :  { %1989 = vmatpush1.bf16.msra.mxu0 %v4934_v6  ;;  %2030 = vmatpush1.bf16.msra.mxu1 %v4937_v18  ;;  %6208 = vst [vmem:[#allocation51_spill] sm:$0xff] %v5075_v26 }
 0x414   :  { %1990 = vmatprep.subr.bf16.mxu0 %v4940_v11  ;;  %2031 = vmatprep.subr.bf16.mxu1 %v4943_v7 }
 0x417   :  { %1991 = vmatpush1.bf16.msra.mxu0 %v4946_v42  ;;  %2032 = vmatpush1.bf16.msra.mxu1 %v4949_v45 }
 0x418   :  { %1992 = vmatprep.subr.bf16.mxu0 %v4952_v59  ;;  %2033 = vmatprep.subr.bf16.mxu1 %v4955_v50 }
 0x41b   :  { %1993 = vmatpush1.bf16.msra.mxu0 %v4958_v20  ;;  %2034 = vmatpush1.bf16.msra.mxu1 %v4961_v35 }
 0x41c   :  { %1994 = vmatprep.subr.bf16.mxu0 %v4964_v57  ;;  %2035 = vmatprep.subr.bf16.mxu1 %v4967_v0 }
 0x41f   :  { %1995 = vmatpush1.bf16.msra.mxu0 %v4970_v48  ;;  %2036 = vmatpush1.bf16.msra.mxu1 %v4973_v56 }
 0x420   :  { %1996 = vmatprep.subr.bf16.mxu0 %v4976_v61  ;;  %2037 = vmatprep.subr.bf16.mxu1 %v4979_v54 }
 0x423   :  { %1997 = vmatpush1.bf16.msra.mxu0 %v4982_v62  ;;  %2038 = vmatpush1.bf16.msra.mxu1 %v4985_v49 }
 0x424   :  { %1998 = vmatprep.subr.bf16.mxu0 %v4988_v52  ;;  %2039 = vmatprep.subr.bf16.mxu1 %v4991_v51 }
 0x427   :  { %1999 = vmatpush1.bf16.msra.mxu0 %v4994_v31  ;;  %2040 = vmatpush1.bf16.msra.mxu1 %v4997_v53 }
 0x428   :  { %2000 = vmatprep.subr.bf16.mxu0 %v5000_v55  ;;  %2041 = vmatprep.subr.bf16.mxu1 %v5003_v27 }
 0x42b   :  { %2001 = vmatpush1.bf16.msra.mxu0 %v5006_v28  ;;  %2042 = vmatpush1.bf16.msra.mxu1 %v5009_v30 }
 0x42c   :  { %2002 = vmatprep.subr.bf16.mxu0 %v5012_v34  ;;  %2043 = vmatprep.subr.bf16.mxu1 %v5015_v37 }
 0x42f   :  { %2003 = vmatpush1.bf16.msra.mxu0 %v5018_v38  ;;  %2044 = vmatpush1.bf16.msra.mxu1 %v5021_v40 }
 0x430   :  { %2004 = vmatprep.subr.bf16.mxu0 %v5024_v41  ;;  %2045 = vmatprep.subr.bf16.mxu1 %v5027_v43 }
 0x433   :  { %2005 = vmatpush2.bf16.msra.mxu0 %v5030_v47  ;;  %2046 = vmatpush2.bf16.msra.mxu1 %v5033_v46 }
 0x434   :  { %2006 = vmatprep.subr.bf16.mxu0 %v5036_v33  ;;  %2047 = vmatprep.subr.bf16.mxu1 %v5039_v39 }
 0x437   :  { %2007 = vmatpush2.bf16.msra.mxu0 %v5042_v1  ;;  %2048 = vmatpush2.bf16.msra.mxu1 %v5045_v3 }
 0x438   :  { %2008 = vmatprep.subr.bf16.mxu0 %v5048_v4  ;;  %2049 = vmatprep.subr.bf16.mxu1 %v5051_v5 }
 0x43b   :  { %2009 = vmatpush2.bf16.msra.mxu0 %v5054_v8  ;;  %2050 = vmatpush2.bf16.msra.mxu1 %v5057_v12 }
 0x43c   :  { %2010 = vmatprep.subr.bf16.mxu0 %v5060_v14  ;;  %2051 = vmatprep.subr.bf16.mxu1 %v5063_v16 }
 0x43f   :  { %2011 = vmatpush2.bf16.msra.mxu0 %v5066_v21  ;;  %2052 = vmatpush2.bf16.msra.mxu1 %v5069_v22  ;;  %v5087_v22 = vld [vmem:[#allocation2 + $0x14c] ss:$16 sps:$4 sm:$0xff]  }
 0x440   :  { %2012 = vmatprep.subr.bf16.mxu0 %v5072_v25  ;;  %2053 = vmatprep.subr.bf16.mxu1 %v5075_v26  ;;  %6212 = vst [vmem:[#allocation55_spill] sm:$0xff] %v5087_v22  ;;  %v5090_v25 = vld [vmem:[#allocation2 + $0x140] ss:$16 sps:$4 sm:$0xff]   ;;  %v5093_v26 = vld [vmem:[#allocation2 + $0x148] ss:$16 sps:$4 sm:$0xff]  }
 0x441   :  { %6213 = vst [vmem:[#allocation61_spill] sm:$0xff] %v5090_v25  ;;  %6214 = vst [vmem:[#allocation58_spill] sm:$0xff] %v5093_v26 }
 0x443   :  { %2013 = vmatpush2.bf16.msra.mxu0 %v5078_v58  ;;  %2054 = vmatpush2.bf16.msra.mxu1 %v5081_v60  ;;  %v5096_v58 = vld [vmem:[#allocation2 + $0x124] ss:$16 sps:$4 sm:$0xff]   ;;  %v5099_v60 = vld [vmem:[#allocation2 + $0x12c] ss:$16 sps:$4 sm:$0xff]  }
 0x444   :  { %2014 = vmatprep.subr.bf16.mxu0 %v5084_v44  ;;  %2055 = vmatprep.subr.bf16.mxu1 %v5087_v22  ;;  %6215 = vst [vmem:[#allocation64_spill] sm:$0xff] %v5096_v58  ;;  %6216 = vst [vmem:[#allocation59_spill] sm:$0xff] %v5099_v60  ;;  %v5102_v44 = vld [vmem:[#allocation2 + $0x120] ss:$16 sps:$4 sm:$0xff]   ;;  %v5105_v22 = vld [vmem:[#allocation2 + $0x128] ss:$16 sps:$4 sm:$0xff]  }
 0x445   :  { %6217 = vst [vmem:[#allocation65_spill] sm:$0xff] %v5102_v44  ;;  %6218 = vst [vmem:[#allocation62_spill] sm:$0xff] %v5105_v22 }
 0x447   :  { %2015 = vmatpush2.bf16.msra.mxu0 %v5090_v25  ;;  %2056 = vmatpush2.bf16.msra.mxu1 %v5093_v26  ;;  %v5108_v25 = vld [vmem:[#allocation2 + $0x104] ss:$16 sps:$4 sm:$0xff]   ;;  %v5111_v26 = vld [vmem:[#allocation2 + $0x10c] ss:$16 sps:$4 sm:$0xff]  }
 0x448   :  { %2016 = vmatprep.subr.bf16.mxu0 %v5096_v58  ;;  %2057 = vmatprep.subr.bf16.mxu1 %v5099_v60  ;;  %6219 = vst [vmem:[#allocation68_spill] sm:$0xff] %v5108_v25  ;;  %6220 = vst [vmem:[#allocation63_spill] sm:$0xff] %v5111_v26  ;;  %v5114_v58 = vld [vmem:[#allocation2 + $0x100] ss:$16 sps:$4 sm:$0xff]   ;;  %v5117_v60 = vld [vmem:[#allocation2 + $0x108] ss:$16 sps:$4 sm:$0xff]  }
 0x449   :  { %6221 = vst [vmem:[#allocation69_spill] sm:$0xff] %v5114_v58  ;;  %6222 = vst [vmem:[#allocation66_spill] sm:$0xff] %v5117_v60 }
 0x44b   :  { %2017 = vmatpush2.bf16.msra.mxu0 %v5102_v44  ;;  %2058 = vmatpush2.bf16.msra.mxu1 %v5105_v22  ;;  %v5120_v44 = vld [vmem:[#allocation10 + $0xe4] ss:$16 sps:$4 sm:$0xff]   ;;  %v5123_v22 = vld [vmem:[#allocation10 + $0xec] ss:$16 sps:$4 sm:$0xff]  }
 0x44c   :  { %2018 = vmatprep.subr.bf16.mxu0 %v5108_v25  ;;  %2059 = vmatprep.subr.bf16.mxu1 %v5111_v26  ;;  %6223 = vst [vmem:[#allocation72_spill] sm:$0xff] %v5120_v44  ;;  %6224 = vst [vmem:[#allocation67_spill] sm:$0xff] %v5123_v22 }
 0x44f   :  { %2019 = vmatpush2.bf16.msra.mxu0 %v5114_v58  ;;  %2060 = vmatpush2.bf16.msra.mxu1 %v5117_v60 }
 0x450   :  { %2095 = vmatprep.subr.bf16.mxu0 %v5120_v44  ;;  %2136 = vmatprep.subr.bf16.mxu1 %v5123_v22 }
 0x4b2   :  { %v1782_v25 = vpop.f32.mrf.mxu0  ;;  %v1823_v21 = vpop.f32.mrf.mxu1 }
 0x4b3   :  { %v1783_v26 = vadd.f32 %v1782_v25, %v6163_v2  ;;  %v1824_v44 = vadd.f32 %v1823_v21, %v6165_v19 }
 0x4b4   :  { %v1784_v16 = vpop.f32.mrf.mxu0  ;;  %v1825_v14 = vpop.f32.mrf.mxu1 }
 0x4b5   :  { %v3353_v12 = vmul.f32 -1.442695, %v1783_v26  ;;  %v1785_v58 = vadd.f32 %v1784_v16, %v6164_v9  ;;  %v3355_v1 = vmul.f32 -1.442695, %v1824_v44  ;;  %v1826_v39 = vadd.f32 %v1825_v14, %v6166_v24 }
 0x4b6   :  { %v1786_v8 = vpop.f32.mrf.mxu0  ;;  %v1827_v5 = vpop.f32.mrf.mxu1 }
 0x4b7   :  { %3746 = vpow2.f32 %v3353_v12  ;;  %v3354_v60 = vmul.f32 -1.442695, %v1785_v58 }
 0x4b8   :  { %v1787_v4 = vpop.f32.mrf.mxu0  ;;  %v1828_v3 = vpop.f32.mrf.mxu1 }
 0x4b9   :  { %3748 = vpow2.f32 %v3354_v60 }
 0x4ba   :  { %3750 = vpow2.f32 %v3355_v1 }
 0x4c4   :  { %v3747_v22 = vpop.eup %3746 }
 0x4c5   :  { %v1839_v33 = vadd.f32 1.0, %v3747_v22 }
 0x4c6   :  { %v3749_v25 = vpop.eup %3748 }
 0x4c7   :  { %3752 = vrcp.f32 %v1839_v33  ;;  %v1840_v26 = vadd.f32 1.0, %v3749_v25  ;;  %v3751_v12 = vpop.eup %3750 }
 0x4c8   :  { %3754 = vtanh.f32 %v1826_v39  ;;  %v1841_v14 = vadd.f32 1.0, %v3751_v12 }
 0x4c9   :  { %3756 = vrcp.f32 %v1840_v26 }
 0x4d2   :  { %v1889_v8 = vpop.f32.mrf.mxu0  ;;  %v1930_v5 = vpop.f32.mrf.mxu1 }
 0x4d3   :  { %v1941_v16 = vrot.slane %v1889_v8, 2 }
 0x4d4   :  { %v3753_v4 = vpop.eup %3752  ;;  %v1891_v3 = vpop.f32.mrf.mxu0 }
 0x4d5   :  { %v1932_v58 = vpop.f32.mrf.mxu1  ;;  %v3755_v60 = vpop.eup %3754  ;;  %v1949_v21 = vadd.f32 %v1941_v16, %v6103_v63  ;;  %v1942_v44 = vrot.slane %v1891_v3, 2  ;;  %v1943_v63 = vrot.slane %v1930_v5, 2 }
 0x4d6   :  { %v3757_v19 = vpop.eup %3756  ;;  %v1893_v22 = vpop.f32.mrf.mxu0  ;;  %v1850_v1 = vmul.f32 %v3755_v60, %v3753_v4 }
 0x4d7   :  { %v1934_v24 = vpop.f32.mrf.mxu1  ;;  %v1849_v33 = vmul.f32 %v3757_v19, %v4887_v17  ;;  %v3356_v39 = vmul.f32 -1.442695, %v1949_v21  ;;  %v1950_v25 = vadd.f32 %v1942_v44, %v6168_v13  ;;  %v1951_v12 = vadd.f32 %v1943_v63, %v6169_v23 }
 0x4d8   :  { %v1894_v26 = vpop.f32.mrf.mxu0  ;;  %v1944_v24 = vrot.slane %v1932_v58, 2  ;;  %v1973_v22 = vrot.slane %v4893_v15, 6  ;;  %v5146_v15 = vld [vmem:[#allocation10 + $0xe0] ss:$16 sps:$4 sm:$0xff]  }
 0x4d9   :  { %v1935_v9 = vpop.f32.mrf.mxu1  ;;  %v5133_v8 = vadd.f32 %v1850_v1, %v1849_v33  ;;  %3758 = vpow2.f32 %v3356_v39  ;;  %v3357_v2 = vmul.f32 -1.442695, %v1950_v25  ;;  %v3358_v16 = vmul.f32 -1.442695, %v1951_v12 }
 0x4da   :  { %3760 = vrcp.f32 %v1841_v14  ;;  %v1952_v13 = vadd.f32 %v1944_v24, %v6170_v36 }
 0x4db   :  { %3762 = vtanh.f32 %v5133_v8 }
 0x4dc   :  { %3764 = vpow2.f32 %v3357_v2 }
 0x4dd   :  { %3766 = vpow2.f32 %v3358_v16 }
 0x4e6   :  { %v3759_v19 = vpop.eup %3758 }
 0x4e7   :  { %v3761_v17 = vpop.eup %3760  ;;  %v1962_v4 = vadd.f32 1.0, %v3759_v19  ;;  %v5149_v19 = vld [vmem:[#allocation10 + $0xe8] ss:$16 sps:$4 sm:$0xff]  }
 0x4e8   :  { %v3763_v3 = vpop.eup %3762 }
 0x4e9   :  { %v3765_v9 = vpop.eup %3764  ;;  %v1853_v60 = vmul.f32 %v3763_v3, %v3761_v17  ;;  %3768 = vrcp.f32 %v1962_v4  ;;  %v5152_v17 = vld [vmem:[#allocation10 + $0xc4] ss:$16 sps:$4 sm:$0xff]   ;;  %v5155_v4 = vld [vmem:[#allocation10 + $0xcc] ss:$16 sps:$4 sm:$0xff]   ;;  %v5163_v3 = vld [vmem:[#allocation10 + $0xc8] ss:$16 sps:$4 sm:$0xff]  }
 0x4ea   :  { %v1963_v21 = vadd.f32 1.0, %v3765_v9  ;;  %3770 = vtanh.f32 %v1952_v13  ;;  %v3767_v23 = vpop.eup %3766  ;;  %v5160_v13 = vld [vmem:[#allocation10 + $0xc0] ss:$16 sps:$4 sm:$0xff]   ;;  %v5166_v9 = vld [vmem:[#allocation10 + $0xa4] ss:$16 sps:$4 sm:$0xff]  }
 0x4eb   :  { %v1854_v44 = vpack.c.bf16 %v1853_v60, %v1853_v60  ;;  %v1964_v36 = vadd.f32 1.0, %v3767_v23  ;;  %v5169_v60 = vld [vmem:[#allocation10 + $0xac] ss:$16 sps:$4 sm:$0xff]   ;;  %v5184_v23 = vld [vmem:[#allocation10 + $0x80] ss:$16 sps:$4 sm:$0xff]  }
 0x4ec   :  { %3772 = vrcp.f32 %v1963_v21  ;;  %v5172_v21 = vld [vmem:[#allocation10 + $0xa0] ss:$16 sps:$4 sm:$0xff]  }
 0x4ed   :  { %v1982_v2 = vrot.slane %v1854_v44, 5  ;;  %3774 = vrcp.f32 %v1964_v36  ;;  %v5175_v44 = vld [vmem:[#allocation10 + $0xa8] ss:$16 sps:$4 sm:$0xff]  }
 0x4ee   :  { %v5199_v36 = vld [vmem:[#allocation10 + $0x68] ss:$16 sps:$4 sm:$0xff]  }
 0x4ef   :  { %v1985_v5 = vrot.slane %v1982_v2, 3  ;;  %v5178_v2 = vld [vmem:[#allocation10 + $0x84] ss:$16 sps:$4 sm:$0xff]  }
 0x4f1   :  { %2020 = vmatprep.mubr.bf16.mxu0 %v1985_v5  ;;  %2061 = vmatprep.mubr.bf16.mxu1 %v1985_v5  ;;  %v5181_v5 = vld [vmem:[#allocation10 + $0x8c] ss:$16 sps:$4 sm:$0xff]  }
 0x4f6   :  { %v3769_v58 = vpop.eup %3768 }
 0x4f7   :  { %v3771_v14 = vpop.eup %3770 }
 0x4f8   :  { %v1976_v39 = vmul.f32 %v3771_v14, %v3769_v58  ;;  %v5187_v58 = vld [vmem:[#allocation10 + $0x88] ss:$16 sps:$4 sm:$0xff]   ;;  %v5190_v14 = vld [vmem:[#allocation10 + $0x64] ss:$16 sps:$4 sm:$0xff]  }
 0x4f9   :  { %v3773_v33 = vpop.eup %3772 }
 0x4fa   :  { %v1975_v1 = vmul.f32 %v3773_v33, %v1973_v22  ;;  %v3775_v26 = vpop.eup %3774  ;;  %v5193_v22 = vld [vmem:[#allocation10 + $0x6c] ss:$16 sps:$4 sm:$0xff]   ;;  %v5196_v33 = vld [vmem:[#allocation10 + $0x60] ss:$16 sps:$4 sm:$0xff]  }
 0x4fc   :  { %v5139_v25 = vadd.f32 %v1976_v39, %v1975_v1  ;;  %v5202_v1 = vld [vmem:[#allocation10 + $0x44] ss:$16 sps:$4 sm:$0xff]   ;;  %v5205_v39 = vld [vmem:[#allocation10 + $0x4c] ss:$16 sps:$4 sm:$0xff]  }
 0x4fd   :  { %6225 = vst [vmem:[#allocation73_spill] sm:$0xff] %v5202_v1  ;;  %6226 = vst [vmem:[#allocation32_spill] sm:$0xff] %v5205_v39 }
 0x4fe   :  { %3776 = vtanh.f32 %v5139_v25 }
 0x50b   :  { %v3777_v63 = vpop.eup %3776 }
 0x50c   :  { %v1979_v12 = vmul.f32 %v3777_v63, %v3775_v26  ;;  %v5208_v26 = vld [vmem:[#allocation10 + $0x40] ss:$16 sps:$4 sm:$0xff]   ;;  %v5211_v63 = vld [vmem:[#allocation10 + $0x48] ss:$16 sps:$4 sm:$0xff]  }
 0x50d   :  { %6227 = vst [vmem:[#allocation34_spill] sm:$0xff] %v5208_v26  ;;  %6228 = vst [vmem:[#allocation36_spill] sm:$0xff] %v5211_v63 }
 0x50e   :  { %v1980_v24 = vpack.c.bf16 %v1979_v12, %v1979_v12  ;;  %v5214_v12 = vld [vmem:[#allocation10 + $0x24] ss:$16 sps:$4 sm:$0xff]  }
 0x50f   :  { %6229 = vst [vmem:[#allocation37_spill] sm:$0xff] %v5214_v12 }
 0x510   :  { %v5142_v16 = vrot.slane %v1980_v24, 3  ;;  %v5217_v24 = vld [vmem:[#allocation10 + $0x2c] ss:$16 sps:$4 sm:$0xff]  }
 0x511   :  { %6230 = vst [vmem:[#allocation78_spill] sm:$0xff] %v5217_v24 }
 0x512   :  { %2021 = vmatmul.mubr.bf16.vlgmr.msra.gmra.mxu0 %v5142_v16  ;;  %2062 = vmatmul.mubr.bf16.vlgmr.msra.gmra.mxu1 %v5142_v16 }
 0x513   :  { %2096 = vmatpush1.bf16.msra.mxu0 %v5146_v15  ;;  %2137 = vmatpush1.bf16.msra.mxu1 %v5149_v19 }
 0x514   :  { %2097 = vmatprep.subr.bf16.mxu0 %v5152_v17  ;;  %2138 = vmatprep.subr.bf16.mxu1 %v5155_v4 }
 0x515   :  { %2127 = vmatprep.mubr.bf16.mxu0 %v6067_v10  ;;  %2168 = vmatprep.mubr.bf16.mxu1 %v6067_v10 }
 0x517   :  { %2098 = vmatpush1.bf16.msra.mxu0 %v5160_v13  ;;  %2139 = vmatpush1.bf16.msra.mxu1 %v5163_v3 }
 0x518   :  { %2099 = vmatprep.subr.bf16.mxu0 %v5166_v9  ;;  %2140 = vmatprep.subr.bf16.mxu1 %v5169_v60 }
 0x51b   :  { %2100 = vmatpush1.bf16.msra.mxu0 %v5172_v21  ;;  %2141 = vmatpush1.bf16.msra.mxu1 %v5175_v44 }
 0x51c   :  { %2101 = vmatprep.subr.bf16.mxu0 %v5178_v2  ;;  %2142 = vmatprep.subr.bf16.mxu1 %v5181_v5 }
 0x51f   :  { %2102 = vmatpush1.bf16.msra.mxu0 %v5184_v23  ;;  %2143 = vmatpush1.bf16.msra.mxu1 %v5187_v58 }
 0x520   :  { %2103 = vmatprep.subr.bf16.mxu0 %v5190_v14  ;;  %2144 = vmatprep.subr.bf16.mxu1 %v5193_v22 }
 0x523   :  { %2104 = vmatpush1.bf16.msra.mxu0 %v5196_v33  ;;  %2145 = vmatpush1.bf16.msra.mxu1 %v5199_v36 }
 0x524   :  { %2105 = vmatprep.subr.bf16.mxu0 %v5202_v1  ;;  %2146 = vmatprep.subr.bf16.mxu1 %v5205_v39  ;;  %v5220_v1 = vld [vmem:[#allocation10 + $0x20] ss:$16 sps:$4 sm:$0xff]   ;;  %v5223_v39 = vld [vmem:[#allocation10 + $0x28] ss:$16 sps:$4 sm:$0xff]  }
 0x527   :  { %2106 = vmatpush1.bf16.msra.mxu0 %v5208_v26  ;;  %2147 = vmatpush1.bf16.msra.mxu1 %v5211_v63  ;;  %v5226_v26 = vld [vmem:[#allocation10 + $0x4] ss:$16 sps:$4 sm:$0xff]   ;;  %v5229_v63 = vld [vmem:[#allocation10 + $0xc] ss:$16 sps:$4 sm:$0xff]  }
 0x528   :  { %2107 = vmatprep.subr.bf16.mxu0 %v5214_v12  ;;  %2148 = vmatprep.subr.bf16.mxu1 %v5217_v24  ;;  %v5232_v12 = vld [vmem:[#allocation10] ss:$16 sps:$4 sm:$0xff]   ;;  %v5235_v24 = vld [vmem:[#allocation10 + $0x8] ss:$16 sps:$4 sm:$0xff]  }
 0x52b   :  { %2108 = vmatpush1.bf16.msra.mxu0 %v5220_v1  ;;  %2149 = vmatpush1.bf16.msra.mxu1 %v5223_v39 }
 0x52c   :  { %2109 = vmatprep.subr.bf16.mxu0 %v5226_v26  ;;  %2150 = vmatprep.subr.bf16.mxu1 %v5229_v63 }
 0x52f   :  { %2110 = vmatpush1.bf16.msra.mxu0 %v5232_v12  ;;  %2151 = vmatpush1.bf16.msra.mxu1 %v5235_v24 }
 0x530   :  { %2209 = vmatprep.subr.bf16.mxu0 %v4928_v32  ;;  %2250 = vmatprep.subr.bf16.mxu1 %v4931_v29 }
 0x532   :  { %2128 = vmatmul.mubr.bf16.vlgmr.msra.gmra.mxu0 %v5142_v16  ;;  %2169 = vmatmul.mubr.bf16.vlgmr.msra.gmra.mxu1 %v5142_v16  ;;  %v6231_v16 = vld [vmem:[#allocation44_spill] sm:$0xff] }
 0x533   :  { %2210 = vmatpush1.bf16.msra.mxu0 %v4934_v6  ;;  %2251 = vmatpush1.bf16.msra.mxu1 %v4937_v18 }
 0x534   :  { %2211 = vmatprep.subr.bf16.mxu0 %v4940_v11  ;;  %2252 = vmatprep.subr.bf16.mxu1 %v4943_v7 }
 0x537   :  { %2212 = vmatpush1.bf16.msra.mxu0 %v4946_v42  ;;  %2253 = vmatpush1.bf16.msra.mxu1 %v4949_v45 }
 0x538   :  { %2213 = vmatprep.subr.bf16.mxu0 %v4952_v59  ;;  %2254 = vmatprep.subr.bf16.mxu1 %v4955_v50 }
 0x53b   :  { %2214 = vmatpush1.bf16.msra.mxu0 %v4958_v20  ;;  %2255 = vmatpush1.bf16.msra.mxu1 %v4961_v35 }
 0x53c   :  { %2215 = vmatprep.subr.bf16.mxu0 %v4964_v57  ;;  %2256 = vmatprep.subr.bf16.mxu1 %v4967_v0 }
 0x53f   :  { %2216 = vmatpush1.bf16.msra.mxu0 %v4970_v48  ;;  %2257 = vmatpush1.bf16.msra.mxu1 %v4973_v56 }
 0x540   :  { %2217 = vmatprep.subr.bf16.mxu0 %v4976_v61  ;;  %2258 = vmatprep.subr.bf16.mxu1 %v4979_v54 }
 0x543   :  { %2218 = vmatpush1.bf16.msra.mxu0 %v4982_v62  ;;  %2259 = vmatpush1.bf16.msra.mxu1 %v4985_v49  ;;  %v6264_v62 = vld [vmem:[#allocation29_spill] sm:$0xff] }
 0x544   :  { %2219 = vmatprep.subr.bf16.mxu0 %v4988_v52  ;;  %2260 = vmatprep.subr.bf16.mxu1 %v4991_v51 }
 0x547   :  { %2220 = vmatpush1.bf16.msra.mxu0 %v4994_v31  ;;  %2261 = vmatpush1.bf16.msra.mxu1 %v4997_v53 }
 0x548   :  { %2221 = vmatprep.subr.bf16.mxu0 %v5000_v55  ;;  %2262 = vmatprep.subr.bf16.mxu1 %v5003_v27  ;;  %v6261_v27 = vld [vmem:[#allocation26_spill] sm:$0xff] }
 0x54b   :  { %2222 = vmatpush1.bf16.msra.mxu0 %v5006_v28  ;;  %2263 = vmatpush1.bf16.msra.mxu1 %v5009_v30  ;;  %v6232_v28 = vld [vmem:[#allocation40_spill] sm:$0xff]  ;;  %v6233_v30 = vld [vmem:[#allocation45_spill] sm:$0xff] }
 0x54c   :  { %2223 = vmatprep.subr.bf16.mxu0 %v5012_v34  ;;  %2264 = vmatprep.subr.bf16.mxu1 %v5015_v37  ;;  %v6234_v34 = vld [vmem:[#allocation42_spill] sm:$0xff]  ;;  %v6235_v37 = vld [vmem:[#allocation48_spill] sm:$0xff] }
 0x54f   :  { %2224 = vmatpush1.bf16.msra.mxu0 %v5018_v38  ;;  %2265 = vmatpush1.bf16.msra.mxu1 %v5021_v40  ;;  %v6236_v38 = vld [vmem:[#allocation43_spill] sm:$0xff]  ;;  %v6237_v40 = vld [vmem:[#allocation49_spill] sm:$0xff] }
 0x550   :  { %2225 = vmatprep.subr.bf16.mxu0 %v5024_v41  ;;  %2266 = vmatprep.subr.bf16.mxu1 %v5027_v43  ;;  %v6238_v41 = vld [vmem:[#allocation46_spill] sm:$0xff]  ;;  %v6239_v43 = vld [vmem:[#allocation52_spill] sm:$0xff] }
 0x553   :  { %2226 = vmatpush2.bf16.msra.mxu0 %v5030_v47  ;;  %2267 = vmatpush2.bf16.msra.mxu1 %v5033_v46  ;;  %v6240_v47 = vld [vmem:[#allocation47_spill] sm:$0xff]  ;;  %v6241_v46 = vld [vmem:[#allocation53_spill] sm:$0xff] }
 0x554   :  { %2227 = vmatprep.subr.bf16.mxu0 %v6231_v16  ;;  %2268 = vmatprep.subr.bf16.mxu1 %v6232_v28  ;;  %v6242_v16 = vld [vmem:[#allocation50_spill] sm:$0xff]  ;;  %v6243_v28 = vld [vmem:[#allocation56_spill] sm:$0xff] }
 0x557   :  { %2228 = vmatpush2.bf16.msra.mxu0 %v6233_v30  ;;  %2269 = vmatpush2.bf16.msra.mxu1 %v6234_v34  ;;  %v6244_v30 = vld [vmem:[#allocation51_spill] sm:$0xff]  ;;  %v6245_v34 = vld [vmem:[#allocation57_spill] sm:$0xff] }
 0x558   :  { %2229 = vmatprep.subr.bf16.mxu0 %v6235_v37  ;;  %2270 = vmatprep.subr.bf16.mxu1 %v6236_v38  ;;  %v6246_v37 = vld [vmem:[#allocation54_spill] sm:$0xff]  ;;  %v6247_v38 = vld [vmem:[#allocation60_spill] sm:$0xff] }
 0x55b   :  { %2230 = vmatpush2.bf16.msra.mxu0 %v6237_v40  ;;  %2271 = vmatpush2.bf16.msra.mxu1 %v6238_v41  ;;  %v6248_v40 = vld [vmem:[#allocation55_spill] sm:$0xff]  ;;  %v6249_v41 = vld [vmem:[#allocation61_spill] sm:$0xff] }
 0x55c   :  { %2231 = vmatprep.subr.bf16.mxu0 %v6239_v43  ;;  %2272 = vmatprep.subr.bf16.mxu1 %v6240_v47  ;;  %v6250_v43 = vld [vmem:[#allocation58_spill] sm:$0xff]  ;;  %v6251_v47 = vld [vmem:[#allocation64_spill] sm:$0xff] }
 0x55f   :  { %2232 = vmatpush2.bf16.msra.mxu0 %v6241_v46  ;;  %2273 = vmatpush2.bf16.msra.mxu1 %v6242_v16  ;;  %v6252_v46 = vld [vmem:[#allocation59_spill] sm:$0xff]  ;;  %v6253_v16 = vld [vmem:[#allocation65_spill] sm:$0xff] }
 0x560   :  { %2233 = vmatprep.subr.bf16.mxu0 %v6243_v28  ;;  %2274 = vmatprep.subr.bf16.mxu1 %v6244_v30  ;;  %v6254_v28 = vld [vmem:[#allocation62_spill] sm:$0xff]  ;;  %v6255_v30 = vld [vmem:[#allocation68_spill] sm:$0xff] }
 0x563   :  { %2234 = vmatpush2.bf16.msra.mxu0 %v6245_v34  ;;  %2275 = vmatpush2.bf16.msra.mxu1 %v6246_v37  ;;  %v6256_v34 = vld [vmem:[#allocation63_spill] sm:$0xff]  ;;  %v6257_v37 = vld [vmem:[#allocation69_spill] sm:$0xff] }
 0x564   :  { %2235 = vmatprep.subr.bf16.mxu0 %v6247_v38  ;;  %2276 = vmatprep.subr.bf16.mxu1 %v6248_v40  ;;  %v6258_v38 = vld [vmem:[#allocation66_spill] sm:$0xff]  ;;  %v6259_v40 = vld [vmem:[#allocation72_spill] sm:$0xff] }
 0x567   :  { %2236 = vmatpush2.bf16.msra.mxu0 %v6249_v41  ;;  %2277 = vmatpush2.bf16.msra.mxu1 %v6250_v43  ;;  %v6260_v41 = vld [vmem:[#allocation67_spill] sm:$0xff] }
 0x568   :  { %2237 = vmatprep.subr.bf16.mxu0 %v6251_v47  ;;  %2278 = vmatprep.subr.bf16.mxu1 %v6252_v46 }
 0x56b   :  { %2238 = vmatpush2.bf16.msra.mxu0 %v6253_v16  ;;  %2279 = vmatpush2.bf16.msra.mxu1 %v6254_v28  ;;  %v6262_v28 = vld [vmem:[#allocation27_spill] sm:$0xff] }
 0x56c   :  { %2239 = vmatprep.subr.bf16.mxu0 %v6255_v30  ;;  %2280 = vmatprep.subr.bf16.mxu1 %v6256_v34 }
 0x56f   :  { %2240 = vmatpush2.bf16.msra.mxu0 %v6257_v37  ;;  %2281 = vmatpush2.bf16.msra.mxu1 %v6258_v38  ;;  %v6263_v38 = vld [vmem:[#allocation28_spill] sm:$0xff] }
 0x570   :  { %2316 = vmatprep.subr.bf16.mxu0 %v6259_v40  ;;  %2357 = vmatprep.subr.bf16.mxu1 %v6260_v41 }
 0x5d2   :  { %v2022_v43 = vpop.f32.mrf.mxu0  ;;  %v2063_v47 = vpop.f32.mrf.mxu1 }
 0x5d3   :  { %v2023_v46 = vadd.f32 %v2022_v43, %v6261_v27  ;;  %v2064_v40 = vadd.f32 %v2063_v47, %v6263_v38  ;;  %v6266_v38 = vld [vmem:[#allocation31_spill] sm:$0xff] }
 0x5d4   :  { %v2024_v55 = vpop.f32.mrf.mxu0  ;;  %v2065_v16 = vpop.f32.mrf.mxu1 }
 0x5d5   :  { %v3359_v53 = vmul.f32 -1.442695, %v2023_v46  ;;  %v2025_v31 = vadd.f32 %v2024_v55, %v6262_v28  ;;  %v3361_v49 = vmul.f32 -1.442695, %v2064_v40  ;;  %v2066_v54 = vadd.f32 %v2065_v16, %v6264_v62 }
 0x5d6   :  { %v2026_v30 = vpop.f32.mrf.mxu0  ;;  %v2067_v51 = vpop.f32.mrf.mxu1 }
 0x5d7   :  { %3778 = vpow2.f32 %v3359_v53  ;;  %v3360_v34 = vmul.f32 -1.442695, %v2025_v31  ;;  %v6265_v31 = vld [vmem:[#allocation30_spill] sm:$0xff] }
 0x5d8   :  { %v2027_v37 = vpop.f32.mrf.mxu0  ;;  %v2068_v52 = vpop.f32.mrf.mxu1 }
 0x5d9   :  { %3780 = vpow2.f32 %v3360_v34 }
 0x5da   :  { %3782 = vpow2.f32 %v3361_v49 }
 0x5e4   :  { %v3779_v41 = vpop.eup %3778 }
 0x5e5   :  { %v2079_v61 = vadd.f32 1.0, %v3779_v41 }
 0x5e6   :  { %v3781_v43 = vpop.eup %3780 }
 0x5e7   :  { %3784 = vrcp.f32 %v2079_v61  ;;  %v2080_v46 = vadd.f32 1.0, %v3781_v43  ;;  %v3783_v53 = vpop.eup %3782 }
 0x5e8   :  { %3786 = vtanh.f32 %v2066_v54  ;;  %v2081_v41 = vadd.f32 1.0, %v3783_v53  ;;  %v6268_v53 = vld [vmem:[#allocation35_spill] sm:$0xff] }
 0x5e9   :  { %3788 = vrcp.f32 %v2080_v46 }
 0x5f2   :  { %v2129_v55 = vpop.f32.mrf.mxu0  ;;  %v2170_v51 = vpop.f32.mrf.mxu1 }
 0x5f3   :  { %v2177_v30 = vadd.f32 %v2129_v55, %v6265_v31  ;;  %v6267_v55 = vld [vmem:[#allocation33_spill] sm:$0xff] }
 0x5f4   :  { %v3785_v52 = vpop.eup %3784  ;;  %v2131_v34 = vpop.f32.mrf.mxu0 }
 0x5f5   :  { %v2172_v37 = vpop.f32.mrf.mxu1  ;;  %v3787_v47 = vpop.eup %3786  ;;  %v3362_v40 = vmul.f32 -1.442695, %v2177_v30  ;;  %v2178_v28 = vadd.f32 %v2131_v34, %v6266_v38  ;;  %v2179_v30 = vadd.f32 %v2170_v51, %v6267_v55 }
 0x5f6   :  { %v3789_v16 = vpop.eup %3788  ;;  %v2133_v62 = vpop.f32.mrf.mxu0  ;;  %v2090_v54 = vmul.f32 %v3787_v47, %v3785_v52 }
 0x5f7   :  { %v2174_v49 = vpop.f32.mrf.mxu1  ;;  %v2089_v61 = vmul.f32 %v3789_v16, %v5133_v8  ;;  %3790 = vpow2.f32 %v3362_v40  ;;  %v3363_v43 = vmul.f32 -1.442695, %v2178_v28  ;;  %v3364_v34 = vmul.f32 -1.442695, %v2179_v30 }
 0x5f8   :  { %v2134_v46 = vpop.f32.mrf.mxu0  ;;  %v2180_v62 = vadd.f32 %v2172_v37, %v6268_v53 }
 0x5f9   :  { %v2175_v27 = vpop.f32.mrf.mxu1  ;;  %v5313_v56 = vadd.f32 %v2090_v54, %v2089_v61  ;;  %3792 = vpow2.f32 %v3363_v43 }
 0x5fa   :  { %3794 = vrcp.f32 %v2081_v41  ;;  %v2201_v41 = vrot.slane %v5139_v25, 6  ;;  %v6269_v25 = vld [vmem:[#allocation73_spill] sm:$0xff] }
 0x5fb   :  { %3796 = vtanh.f32 %v5313_v56 }
 0x5fc   :  { %3798 = vpow2.f32 %v3364_v34 }
 0x604   :  { %v3791_v38 = vpop.eup %3790 }
 0x605   :  { %v2190_v49 = vadd.f32 1.0, %v3791_v38 }
 0x606   :  { %v3793_v31 = vpop.eup %3792 }
 0x607   :  { %v3795_v8 = vpop.eup %3794  ;;  %3800 = vrcp.f32 %v2190_v49  ;;  %v2191_v28 = vadd.f32 1.0, %v3793_v31  ;;  %v6271_v49 = vld [vmem:[#allocation34_spill] sm:$0xff] }
 0x608   :  { %v3797_v52 = vpop.eup %3796  ;;  %3802 = vtanh.f32 %v2180_v62  ;;  %v6270_v62 = vld [vmem:[#allocation32_spill] sm:$0xff] }
 0x609   :  { %3804 = vrcp.f32 %v2191_v28  ;;  %v2093_v27 = vmul.f32 %v3797_v52, %v3795_v8  ;;  %v3799_v40 = vpop.eup %3798  ;;  %v6272_v8 = vld [vmem:[#allocation36_spill] sm:$0xff]  ;;  %v6273_v28 = vld [vmem:[#allocation37_spill] sm:$0xff]  ;;  %v6274_v52 = vld [vmem:[#allocation78_spill] sm:$0xff] }
 0x60a   :  { %v2192_v37 = vadd.f32 1.0, %v3799_v40  ;;  %v6292_v40 = vld [vmem:[#allocation90_spill] sm:$0xff] }
 0x60b   :  { %v2094_v47 = vpack.c.bf16 %v2093_v27, %v2093_v27  ;;  %v6290_v27 = vld [vmem:[#allocation87_spill] sm:$0xff] }
 0x60c   :  { %3806 = vrcp.f32 %v2192_v37  ;;  %v6297_v37 = vld [vmem:[#allocation40_spill] sm:$0xff] }
 0x60d   :  { %2241 = vmatprep.mubr.bf16.mxu0 %v2094_v47  ;;  %2282 = vmatprep.mubr.bf16.mxu1 %v2094_v47  ;;  %v6291_v47 = vld [vmem:[#allocation92_spill] sm:$0xff] }
 0x614   :  { %v3801_v16 = vpop.eup %3800 }
 0x615   :  { %v3803_v51 = vpop.eup %3802 }
 0x616   :  { %v3805_v61 = vpop.eup %3804  ;;  %v2204_v54 = vmul.f32 %v3803_v51, %v3801_v16  ;;  %v6293_v16 = vld [vmem:[#allocation91_spill] sm:$0xff]  ;;  %v6294_v51 = vld [vmem:[#allocation41_spill] sm:$0xff] }
 0x617   :  { %v2203_v38 = vmul.f32 %v3805_v61, %v2201_v41  ;;  %v6295_v41 = vld [vmem:[#allocation39_spill] sm:$0xff]  ;;  %v6296_v61 = vld [vmem:[#allocation44_spill] sm:$0xff] }
 0x619   :  { %v5319_v43 = vadd.f32 %v2204_v54, %v2203_v38  ;;  %v3807_v31 = vpop.eup %3806  ;;  %v6298_v38 = vld [vmem:[#allocation45_spill] sm:$0xff]  ;;  %v6299_v54 = vld [vmem:[#allocation42_spill] sm:$0xff] }
 0x61b   :  { %3808 = vtanh.f32 %v5319_v43 }
 0x628   :  { %v3809_v46 = vpop.eup %3808 }
 0x629   :  { %v2207_v30 = vmul.f32 %v3809_v46, %v3807_v31  ;;  %v6300_v31 = vld [vmem:[#allocation48_spill] sm:$0xff]  ;;  %v6301_v46 = vld [vmem:[#allocation43_spill] sm:$0xff] }
 0x62b   :  { %v2208_v34 = vpack.c.bf16 %v2207_v30, %v2207_v30  ;;  %v6302_v30 = vld [vmem:[#allocation49_spill] sm:$0xff] }
 0x62d   :  { %2242 = vmatmul.mubr.bf16.vlgmr.msra.gmra.mxu0 %v2208_v34  ;;  %2283 = vmatmul.mubr.bf16.vlgmr.msra.gmra.mxu1 %v2208_v34 }
 0x62e   :  { %2317 = vmatpush1.bf16.msra.mxu0 %v5146_v15  ;;  %2358 = vmatpush1.bf16.msra.mxu1 %v5149_v19 }
 0x62f   :  { %2318 = vmatprep.subr.bf16.mxu0 %v5152_v17  ;;  %2359 = vmatprep.subr.bf16.mxu1 %v5155_v4 }
 0x630   :  { %2348 = vmatprep.mubr.bf16.mxu0 %v6067_v10  ;;  %2389 = vmatprep.mubr.bf16.mxu1 %v6067_v10 }
 0x632   :  { %2319 = vmatpush1.bf16.msra.mxu0 %v5160_v13  ;;  %2360 = vmatpush1.bf16.msra.mxu1 %v5163_v3 }
 0x633   :  { %2320 = vmatprep.subr.bf16.mxu0 %v5166_v9  ;;  %2361 = vmatprep.subr.bf16.mxu1 %v5169_v60 }
 0x636   :  { %2321 = vmatpush1.bf16.msra.mxu0 %v5172_v21  ;;  %2362 = vmatpush1.bf16.msra.mxu1 %v5175_v44 }
 0x637   :  { %2322 = vmatprep.subr.bf16.mxu0 %v5178_v2  ;;  %2363 = vmatprep.subr.bf16.mxu1 %v5181_v5 }
 0x63a   :  { %2323 = vmatpush1.bf16.msra.mxu0 %v5184_v23  ;;  %2364 = vmatpush1.bf16.msra.mxu1 %v5187_v58 }
 0x63b   :  { %2324 = vmatprep.subr.bf16.mxu0 %v5190_v14  ;;  %2365 = vmatprep.subr.bf16.mxu1 %v5193_v22 }
 0x63e   :  { %2325 = vmatpush1.bf16.msra.mxu0 %v5196_v33  ;;  %2366 = vmatpush1.bf16.msra.mxu1 %v5199_v36 }
 0x63f   :  { %2326 = vmatprep.subr.bf16.mxu0 %v6269_v25  ;;  %2367 = vmatprep.subr.bf16.mxu1 %v6270_v62 }
 0x642   :  { %2327 = vmatpush1.bf16.msra.mxu0 %v6271_v49  ;;  %2368 = vmatpush1.bf16.msra.mxu1 %v6272_v8 }
 0x643   :  { %2328 = vmatprep.subr.bf16.mxu0 %v6273_v28  ;;  %2369 = vmatprep.subr.bf16.mxu1 %v6274_v52 }
 0x646   :  { %2329 = vmatpush1.bf16.msra.mxu0 %v5220_v1  ;;  %2370 = vmatpush1.bf16.msra.mxu1 %v5223_v39 }
 0x647   :  { %2330 = vmatprep.subr.bf16.mxu0 %v5226_v26  ;;  %2371 = vmatprep.subr.bf16.mxu1 %v5229_v63 }
 0x64a   :  { %2331 = vmatpush1.bf16.msra.mxu0 %v5232_v12  ;;  %2372 = vmatpush1.bf16.msra.mxu1 %v5235_v24 }
 0x64b   :  { %2449 = vmatprep.subr.bf16.mxu0 %v4928_v32  ;;  %2490 = vmatprep.subr.bf16.mxu1 %v4931_v29  ;;  %v6275_v32 = vld [vmem:[#allocation38_spill] sm:$0xff] }
 0x64c   :  { %v6276_v29 = vld [vmem:[#allocation70_spill] sm:$0xff] }
 0x64d   :  { %2349 = vmatmul.mubr.bf16.vlgmr.msra.gmra.mxu0 %v2208_v34  ;;  %2390 = vmatmul.mubr.bf16.vlgmr.msra.gmra.mxu1 %v2208_v34  ;;  %v6303_v34 = vld [vmem:[#allocation46_spill] sm:$0xff] }
 0x64e   :  { %2450 = vmatpush1.bf16.msra.mxu0 %v4934_v6  ;;  %2491 = vmatpush1.bf16.msra.mxu1 %v4937_v18  ;;  %v6277_v6 = vld [vmem:[#allocation76_spill] sm:$0xff]  ;;  %v6278_v18 = vld [vmem:[#allocation71_spill] sm:$0xff] }
 0x64f   :  { %2451 = vmatprep.subr.bf16.mxu0 %v4940_v11  ;;  %2492 = vmatprep.subr.bf16.mxu1 %v4943_v7  ;;  %v6279_v11 = vld [vmem:[#allocation77_spill] sm:$0xff]  ;;  %v6280_v7 = vld [vmem:[#allocation74_spill] sm:$0xff] }
 0x652   :  { %2452 = vmatpush1.bf16.msra.mxu0 %v4946_v42  ;;  %2493 = vmatpush1.bf16.msra.mxu1 %v4949_v45  ;;  %v6281_v42 = vld [vmem:[#allocation80_spill] sm:$0xff]  ;;  %v6282_v45 = vld [vmem:[#allocation75_spill] sm:$0xff] }
 0x653   :  { %2453 = vmatprep.subr.bf16.mxu0 %v4952_v59  ;;  %2494 = vmatprep.subr.bf16.mxu1 %v4955_v50  ;;  %v6283_v59 = vld [vmem:[#allocation81_spill] sm:$0xff]  ;;  %v6284_v50 = vld [vmem:[#allocation79_spill] sm:$0xff] }
 0x656   :  { %2454 = vmatpush1.bf16.msra.mxu0 %v4958_v20  ;;  %2495 = vmatpush1.bf16.msra.mxu1 %v4961_v35  ;;  %v6285_v20 = vld [vmem:[#allocation82_spill] sm:$0xff]  ;;  %v6286_v35 = vld [vmem:[#allocation88_spill] sm:$0xff] }
 0x657   :  { %2455 = vmatprep.subr.bf16.mxu0 %v4964_v57  ;;  %2496 = vmatprep.subr.bf16.mxu1 %v4967_v0  ;;  %v6287_v57 = vld [vmem:[#allocation83_spill] sm:$0xff]  ;;  %v6288_v0 = vld [vmem:[#allocation89_spill] sm:$0xff] }
 0x65a   :  { %2456 = vmatpush1.bf16.msra.mxu0 %v4970_v48  ;;  %2497 = vmatpush1.bf16.msra.mxu1 %v6275_v32  ;;  %v6289_v48 = vld [vmem:[#allocation86_spill] sm:$0xff]  ;;  %v6304_v32 = vld [vmem:[#allocation52_spill] sm:$0xff] }
 0x65b   :  { %2457 = vmatprep.subr.bf16.mxu0 %v6276_v29  ;;  %2498 = vmatprep.subr.bf16.mxu1 %v6277_v6  ;;  %v6305_v29 = vld [vmem:[#allocation47_spill] sm:$0xff]  ;;  %v6306_v6 = vld [vmem:[#allocation53_spill] sm:$0xff] }
 0x65e   :  { %2458 = vmatpush1.bf16.msra.mxu0 %v6278_v18  ;;  %2499 = vmatpush1.bf16.msra.mxu1 %v6279_v11  ;;  %v6307_v18 = vld [vmem:[#allocation50_spill] sm:$0xff]  ;;  %v6308_v11 = vld [vmem:[#allocation56_spill] sm:$0xff] }
 0x65f   :  { %2459 = vmatprep.subr.bf16.mxu0 %v6280_v7  ;;  %2500 = vmatprep.subr.bf16.mxu1 %v6281_v42  ;;  %v6309_v7 = vld [vmem:[#allocation51_spill] sm:$0xff]  ;;  %v6310_v42 = vld [vmem:[#allocation57_spill] sm:$0xff] }
 0x662   :  { %2460 = vmatpush1.bf16.msra.mxu0 %v6282_v45  ;;  %2501 = vmatpush1.bf16.msra.mxu1 %v6283_v59  ;;  %v6311_v45 = vld [vmem:[#allocation54_spill] sm:$0xff]  ;;  %v6312_v59 = vld [vmem:[#allocation60_spill] sm:$0xff] }
 0x663   :  { %2461 = vmatprep.subr.bf16.mxu0 %v6284_v50  ;;  %2502 = vmatprep.subr.bf16.mxu1 %v6285_v20  ;;  %v6313_v50 = vld [vmem:[#allocation55_spill] sm:$0xff]  ;;  %v6314_v20 = vld [vmem:[#allocation61_spill] sm:$0xff] }
 0x666   :  { %2462 = vmatpush1.bf16.msra.mxu0 %v6286_v35  ;;  %2503 = vmatpush1.bf16.msra.mxu1 %v6287_v57  ;;  %v6315_v35 = vld [vmem:[#allocation58_spill] sm:$0xff]  ;;  %v6316_v57 = vld [vmem:[#allocation64_spill] sm:$0xff] }
 0x667   :  { %2463 = vmatprep.subr.bf16.mxu0 %v6288_v0  ;;  %2504 = vmatprep.subr.bf16.mxu1 %v6289_v48  ;;  %v6317_v0 = vld [vmem:[#allocation59_spill] sm:$0xff]  ;;  %v6318_v48 = vld [vmem:[#allocation65_spill] sm:$0xff] }
 0x66a   :  { %2464 = vmatpush1.bf16.msra.mxu0 %v6290_v27  ;;  %2505 = vmatpush1.bf16.msra.mxu1 %v6291_v47  ;;  %v6319_v27 = vld [vmem:[#allocation62_spill] sm:$0xff]  ;;  %v6320_v47 = vld [vmem:[#allocation68_spill] sm:$0xff] }
 0x66b   :  { %2465 = vmatprep.subr.bf16.mxu0 %v6292_v40  ;;  %2506 = vmatprep.subr.bf16.mxu1 %v6293_v16  ;;  %v6321_v40 = vld [vmem:[#allocation63_spill] sm:$0xff]  ;;  %v6322_v16 = vld [vmem:[#allocation69_spill] sm:$0xff] }
 0x66e   :  { %2466 = vmatpush2.bf16.msra.mxu0 %v6294_v51  ;;  %2507 = vmatpush2.bf16.msra.mxu1 %v6295_v41  ;;  %v6323_v51 = vld [vmem:[#allocation66_spill] sm:$0xff]  ;;  %v6324_v41 = vld [vmem:[#allocation72_spill] sm:$0xff] }
 0x66f   :  { %2467 = vmatprep.subr.bf16.mxu0 %v6296_v61  ;;  %2508 = vmatprep.subr.bf16.mxu1 %v6297_v37  ;;  %v6325_v61 = vld [vmem:[#allocation67_spill] sm:$0xff] }
 0x672   :  { %2468 = vmatpush2.bf16.msra.mxu0 %v6298_v38  ;;  %2509 = vmatpush2.bf16.msra.mxu1 %v6299_v54  ;;  %v6326_v54 = vld [vmem:[#allocation26_spill] sm:$0xff] }
 0x673   :  { %2469 = vmatprep.subr.bf16.mxu0 %v6300_v31  ;;  %2510 = vmatprep.subr.bf16.mxu1 %v6301_v46 }
 0x676   :  { %2470 = vmatpush2.bf16.msra.mxu0 %v6302_v30  ;;  %2511 = vmatpush2.bf16.msra.mxu1 %v6303_v34 }
 0x677   :  { %2471 = vmatprep.subr.bf16.mxu0 %v6304_v32  ;;  %2512 = vmatprep.subr.bf16.mxu1 %v6305_v29  ;;  %v6327_v32 = vld [vmem:[#allocation27_spill] sm:$0xff] }
 0x67a   :  { %2472 = vmatpush2.bf16.msra.mxu0 %v6306_v6  ;;  %2513 = vmatpush2.bf16.msra.mxu1 %v6307_v18 }
 0x67b   :  { %2473 = vmatprep.subr.bf16.mxu0 %v6308_v11  ;;  %2514 = vmatprep.subr.bf16.mxu1 %v6309_v7 }
 0x67e   :  { %2474 = vmatpush2.bf16.msra.mxu0 %v6310_v42  ;;  %2515 = vmatpush2.bf16.msra.mxu1 %v6311_v45  ;;  %v6328_v45 = vld [vmem:[#allocation28_spill] sm:$0xff] }
 0x67f   :  { %2475 = vmatprep.subr.bf16.mxu0 %v6312_v59  ;;  %2516 = vmatprep.subr.bf16.mxu1 %v6313_v50 }
 0x682   :  { %2476 = vmatpush2.bf16.msra.mxu0 %v6314_v20  ;;  %2517 = vmatpush2.bf16.msra.mxu1 %v6315_v35  ;;  %v6329_v35 = vld [vmem:[#allocation29_spill] sm:$0xff] }
 0x683   :  { %2477 = vmatprep.subr.bf16.mxu0 %v6316_v57  ;;  %2518 = vmatprep.subr.bf16.mxu1 %v6317_v0 }
 0x686   :  { %2478 = vmatpush2.bf16.msra.mxu0 %v6318_v48  ;;  %2519 = vmatpush2.bf16.msra.mxu1 %v6319_v27 }
 0x687   :  { %2479 = vmatprep.subr.bf16.mxu0 %v6320_v47  ;;  %2520 = vmatprep.subr.bf16.mxu1 %v6321_v40 }
 0x68a   :  { %2480 = vmatpush2.bf16.msra.mxu0 %v6322_v16  ;;  %2521 = vmatpush2.bf16.msra.mxu1 %v6323_v51 }
 0x68b   :  { %2556 = vmatprep.subr.bf16.mxu0 %v6324_v41  ;;  %2597 = vmatprep.subr.bf16.mxu1 %v6325_v61 }
 0x6ed   :  { %v2243_v37 = vpop.f32.mrf.mxu0  ;;  %v2284_v38 = vpop.f32.mrf.mxu1 }
 0x6ee   :  { %v2244_v31 = vadd.f32 %v2243_v37, %v6326_v54  ;;  %v2285_v59 = vadd.f32 %v2284_v38, %v6328_v45  ;;  %v6330_v38 = vld [vmem:[#allocation30_spill] sm:$0xff] }
 0x6ef   :  { %v2245_v46 = vpop.f32.mrf.mxu0  ;;  %v2286_v30 = vpop.f32.mrf.mxu1 }
 0x6f0   :  { %v3365_v34 = vmul.f32 -1.442695, %v2244_v31  ;;  %v2246_v29 = vadd.f32 %v2245_v46, %v6327_v32  ;;  %v3367_v50 = vmul.f32 -1.442695, %v2285_v59  ;;  %v2287_v57 = vadd.f32 %v2286_v30, %v6329_v35  ;;  %v6331_v59 = vld [vmem:[#allocation31_spill] sm:$0xff] }
 0x6f1   :  { %v2247_v6 = vpop.f32.mrf.mxu0  ;;  %v2288_v18 = vpop.f32.mrf.mxu1 }
 0x6f2   :  { %3810 = vpow2.f32 %v3365_v34  ;;  %v3366_v11 = vmul.f32 -1.442695, %v2246_v29 }
 0x6f3   :  { %v2248_v7 = vpop.f32.mrf.mxu0  ;;  %v2289_v42 = vpop.f32.mrf.mxu1 }
 0x6f4   :  { %3812 = vpow2.f32 %v3366_v11 }
 0x6f5   :  { %3814 = vpow2.f32 %v3367_v50 }
 0x6ff   :  { %v3811_v20 = vpop.eup %3810 }
 0x700   :  { %v2300_v0 = vadd.f32 1.0, %v3811_v20 }
 0x701   :  { %v3813_v48 = vpop.eup %3812 }
 0x702   :  { %3816 = vrcp.f32 %v2300_v0  ;;  %v2301_v27 = vadd.f32 1.0, %v3813_v48  ;;  %v3815_v16 = vpop.eup %3814 }
 0x703   :  { %3818 = vtanh.f32 %v2287_v57  ;;  %v2302_v30 = vadd.f32 1.0, %v3815_v16 }
 0x704   :  { %3820 = vrcp.f32 %v2301_v27 }
 0x70d   :  { %v2350_v47 = vpop.f32.mrf.mxu0  ;;  %v2391_v40 = vpop.f32.mrf.mxu1 }
 0x70e   :  { %v2402_v51 = vrot.slane %v2350_v47, 6  ;;  %v2404_v27 = vrot.slane %v2391_v40, 6 }
 0x70f   :  { %v3817_v41 = vpop.eup %3816  ;;  %v2352_v61 = vpop.f32.mrf.mxu0 }
 0x710   :  { %v2393_v37 = vpop.f32.mrf.mxu1  ;;  %v3819_v31 = vpop.eup %3818  ;;  %v2410_v46 = vadd.f32 %v2402_v51, %v6330_v38  ;;  %v2403_v34 = vrot.slane %v2352_v61, 6  ;;  %v2412_v47 = vadd.f32 %v2404_v27, %v6267_v55 }
 0x711   :  { %v3821_v29 = vpop.eup %3820  ;;  %v2354_v6 = vpop.f32.mrf.mxu0  ;;  %v2311_v7 = vmul.f32 %v3819_v31, %v3817_v41  ;;  %v2405_v16 = vrot.slane %v2393_v37, 6 }
 0x712   :  { %v2395_v18 = vpop.f32.mrf.mxu1  ;;  %v2310_v11 = vmul.f32 %v3821_v29, %v5313_v56  ;;  %v3368_v42 = vmul.f32 -1.442695, %v2410_v46  ;;  %v2411_v50 = vadd.f32 %v2403_v34, %v6331_v59  ;;  %v3370_v51 = vmul.f32 -1.442695, %v2412_v47 }
 0x713   :  { %v2355_v20 = vpop.f32.mrf.mxu0  ;;  %v2413_v31 = vadd.f32 %v2405_v16, %v6268_v53 }
 0x714   :  { %v2396_v57 = vpop.f32.mrf.mxu1  ;;  %v5427_v0 = vadd.f32 %v2311_v7, %v2310_v11  ;;  %3822 = vpow2.f32 %v3368_v42  ;;  %v3369_v48 = vmul.f32 -1.442695, %v2411_v50  ;;  %v2434_v42 = vrot.slane %v5319_v43, 6  ;;  %v5540_v43 = vld [vmem:[#allocation2 + $0x24] ss:$16 sps:$4 sm:$0xff]  }
 0x715   :  { %3824 = vrcp.f32 %v2302_v30 }
 0x716   :  { %3826 = vtanh.f32 %v5427_v0 }
 0x717   :  { %3828 = vpow2.f32 %v3369_v48 }
 0x718   :  { %3830 = vpow2.f32 %v3370_v51 }
 0x721   :  { %v3823_v56 = vpop.eup %3822 }
 0x722   :  { %v3825_v41 = vpop.eup %3824  ;;  %v2423_v61 = vadd.f32 1.0, %v3823_v56 }
 0x723   :  { %v3827_v46 = vpop.eup %3826 }
 0x724   :  { %v3829_v34 = vpop.eup %3828  ;;  %v2314_v29 = vmul.f32 %v3827_v46, %v3825_v41  ;;  %3832 = vrcp.f32 %v2423_v61  ;;  %v5561_v61 = vld [vmem:[#allocation2 + $0x8] ss:$16 sps:$4 sm:$0xff]   ;;  %v5567_v46 = vld [vmem:[#allocation2 + $0x1ec] ss:$16 sps:$4 sm:$0xff]  }
 0x725   :  { %v2424_v6 = vadd.f32 1.0, %v3829_v34  ;;  %3834 = vtanh.f32 %v2413_v31  ;;  %v3831_v37 = vpop.eup %3830  ;;  %v5564_v31 = vld [vmem:[#allocation2 + $0x1e4] ss:$16 sps:$4 sm:$0xff]   ;;  %v5570_v34 = vld [vmem:[#allocation2 + $0x1e0] ss:$16 sps:$4 sm:$0xff]  }
 0x726   :  { %v2315_v30 = vpack.c.bf16 %v2314_v29, %v2314_v29  ;;  %v2425_v20 = vadd.f32 1.0, %v3831_v37  ;;  %v5573_v29 = vld [vmem:[#allocation2 + $0x1e8] ss:$16 sps:$4 sm:$0xff]   ;;  %v5588_v37 = vld [vmem:[#allocation2 + $0x1a4] ss:$16 sps:$4 sm:$0xff]  }
 0x727   :  { %3836 = vrcp.f32 %v2424_v6  ;;  %v5576_v6 = vld [vmem:[#allocation2 + $0x1c4] ss:$16 sps:$4 sm:$0xff]   ;;  %6336 = vst [vmem:[#allocation73_spill] sm:$0xff] %v5588_v37 }
 0x728   :  { %v2443_v18 = vrot.slane %v2315_v30, 7  ;;  %3838 = vrcp.f32 %v2425_v20  ;;  %6332 = vst [vmem:[#allocation84_spill] sm:$0xff] %v5576_v6  ;;  %v5579_v30 = vld [vmem:[#allocation2 + $0x1cc] ss:$16 sps:$4 sm:$0xff]  }
 0x729   :  { %6333 = vst [vmem:[#allocation85_spill] sm:$0xff] %v5579_v30  ;;  %v5603_v20 = vld [vmem:[#allocation2 + $0x18c] ss:$16 sps:$4 sm:$0xff]  }
 0x72a   :  { %v2446_v40 = vrot.slane %v2443_v18, 1  ;;  %v5582_v18 = vld [vmem:[#allocation2 + $0x1c0] ss:$16 sps:$4 sm:$0xff]   ;;  %6341 = vst [vmem:[#allocation78_spill] sm:$0xff] %v5603_v20 }
 0x72b   :  { %6334 = vst [vmem:[#allocation33_spill] sm:$0xff] %v5582_v18 }
 0x72c   :  { %2481 = vmatprep.mubr.bf16.mxu0 %v2446_v40  ;;  %2522 = vmatprep.mubr.bf16.mxu1 %v2446_v40  ;;  %v5585_v40 = vld [vmem:[#allocation2 + $0x1c8] ss:$16 sps:$4 sm:$0xff]  }
 0x72d   :  { %6335 = vst [vmem:[#allocation35_spill] sm:$0xff] %v5585_v40 }
 0x731   :  { %v3833_v11 = vpop.eup %3832 }
 0x732   :  { %v3835_v7 = vpop.eup %3834 }
 0x733   :  { %v2437_v48 = vmul.f32 %v3835_v7, %v3833_v11  ;;  %v5591_v11 = vld [vmem:[#allocation2 + $0x1ac] ss:$16 sps:$4 sm:$0xff]   ;;  %v5594_v7 = vld [vmem:[#allocation2 + $0x1a0] ss:$16 sps:$4 sm:$0xff]  }
 0x734   :  { %v3837_v50 = vpop.eup %3836  ;;  %6337 = vst [vmem:[#allocation32_spill] sm:$0xff] %v5591_v11  ;;  %6338 = vst [vmem:[#allocation34_spill] sm:$0xff] %v5594_v7 }
 0x735   :  { %v2436_v57 = vmul.f32 %v3837_v50, %v2434_v42  ;;  %v3839_v47 = vpop.eup %3838  ;;  %v5597_v42 = vld [vmem:[#allocation2 + $0x1a8] ss:$16 sps:$4 sm:$0xff]   ;;  %v5600_v50 = vld [vmem:[#allocation2 + $0x184] ss:$16 sps:$4 sm:$0xff]  }
 0x736   :  { %6339 = vst [vmem:[#allocation36_spill] sm:$0xff] %v5597_v42  ;;  %6340 = vst [vmem:[#allocation37_spill] sm:$0xff] %v5600_v50 }
 0x737   :  { %v5433_v27 = vadd.f32 %v2437_v48, %v2436_v57  ;;  %v5606_v57 = vld [vmem:[#allocation2 + $0x180] ss:$16 sps:$4 sm:$0xff]   ;;  %v5609_v48 = vld [vmem:[#allocation2 + $0x188] ss:$16 sps:$4 sm:$0xff]  }
 0x738   :  { %6342 = vst [vmem:[#allocation38_spill] sm:$0xff] %v5606_v57  ;;  %6343 = vst [vmem:[#allocation70_spill] sm:$0xff] %v5609_v48 }
 0x739   :  { %3840 = vtanh.f32 %v5433_v27 }
 0x746   :  { %v3841_v16 = vpop.eup %3840 }
 0x747   :  { %v2440_v51 = vmul.f32 %v3841_v16, %v3839_v47  ;;  %v5612_v47 = vld [vmem:[#allocation2 + $0x164] ss:$16 sps:$4 sm:$0xff]   ;;  %v5615_v16 = vld [vmem:[#allocation2 + $0x16c] ss:$16 sps:$4 sm:$0xff]  }
 0x748   :  { %6344 = vst [vmem:[#allocation76_spill] sm:$0xff] %v5612_v47  ;;  %6345 = vst [vmem:[#allocation71_spill] sm:$0xff] %v5615_v16 }
 0x749   :  { %v2441_v56 = vpack.c.bf16 %v2440_v51, %v2440_v51  ;;  %v5618_v51 = vld [vmem:[#allocation2 + $0x160] ss:$16 sps:$4 sm:$0xff]  }
 0x74a   :  { %6346 = vst [vmem:[#allocation77_spill] sm:$0xff] %v5618_v51 }
 0x74b   :  { %v2445_v41 = vrot.slane %v2441_v56, 1  ;;  %v5621_v56 = vld [vmem:[#allocation2 + $0x168] ss:$16 sps:$4 sm:$0xff]  }
 0x74c   :  { %6347 = vst [vmem:[#allocation74_spill] sm:$0xff] %v5621_v56 }
 0x74d   :  { %2482 = vmatmul.mubr.bf16.vlgmr.msra.gmra.mxu0 %v2445_v41  ;;  %2523 = vmatmul.mubr.bf16.vlgmr.msra.gmra.mxu1 %v2445_v41 }
 0x74e   :  { %2557 = vmatpush1.bf16.msra.mxu0 %v5146_v15  ;;  %2598 = vmatpush1.bf16.msra.mxu1 %v5149_v19  ;;  %v5468_v15 = vld [vmem:[#allocation2 + $0xe4] ss:$16 sps:$4 sm:$0xff]   ;;  %v5471_v19 = vld [vmem:[#allocation2 + $0xec] ss:$16 sps:$4 sm:$0xff]  }
 0x74f   :  { %2558 = vmatprep.subr.bf16.mxu0 %v5152_v17  ;;  %2599 = vmatprep.subr.bf16.mxu1 %v5155_v4  ;;  %v5474_v17 = vld [vmem:[#allocation2 + $0xe0] ss:$16 sps:$4 sm:$0xff]   ;;  %v5477_v4 = vld [vmem:[#allocation2 + $0xe8] ss:$16 sps:$4 sm:$0xff]  }
 0x750   :  { %2588 = vmatprep.mubr.bf16.mxu0 %v6067_v10  ;;  %2629 = vmatprep.mubr.bf16.mxu1 %v6067_v10 }
 0x752   :  { %2559 = vmatpush1.bf16.msra.mxu0 %v5160_v13  ;;  %2600 = vmatpush1.bf16.msra.mxu1 %v5163_v3  ;;  %v5480_v13 = vld [vmem:[#allocation2 + $0xc4] ss:$16 sps:$4 sm:$0xff]   ;;  %v5483_v3 = vld [vmem:[#allocation2 + $0xcc] ss:$16 sps:$4 sm:$0xff]  }
 0x753   :  { %2560 = vmatprep.subr.bf16.mxu0 %v5166_v9  ;;  %2601 = vmatprep.subr.bf16.mxu1 %v5169_v60  ;;  %v5486_v9 = vld [vmem:[#allocation2 + $0xc0] ss:$16 sps:$4 sm:$0xff]   ;;  %v5489_v60 = vld [vmem:[#allocation2 + $0xc8] ss:$16 sps:$4 sm:$0xff]  }
 0x756   :  { %2561 = vmatpush1.bf16.msra.mxu0 %v5172_v21  ;;  %2602 = vmatpush1.bf16.msra.mxu1 %v5175_v44  ;;  %v5492_v21 = vld [vmem:[#allocation2 + $0xa4] ss:$16 sps:$4 sm:$0xff]   ;;  %v5495_v44 = vld [vmem:[#allocation2 + $0xac] ss:$16 sps:$4 sm:$0xff]  }
 0x757   :  { %2562 = vmatprep.subr.bf16.mxu0 %v5178_v2  ;;  %2603 = vmatprep.subr.bf16.mxu1 %v5181_v5  ;;  %v5498_v2 = vld [vmem:[#allocation2 + $0xa0] ss:$16 sps:$4 sm:$0xff]   ;;  %v5501_v5 = vld [vmem:[#allocation2 + $0xa8] ss:$16 sps:$4 sm:$0xff]  }
 0x75a   :  { %2563 = vmatpush1.bf16.msra.mxu0 %v5184_v23  ;;  %2604 = vmatpush1.bf16.msra.mxu1 %v5187_v58  ;;  %v5504_v23 = vld [vmem:[#allocation2 + $0x84] ss:$16 sps:$4 sm:$0xff]   ;;  %v5507_v58 = vld [vmem:[#allocation2 + $0x8c] ss:$16 sps:$4 sm:$0xff]  }
 0x75b   :  { %2564 = vmatprep.subr.bf16.mxu0 %v5190_v14  ;;  %2605 = vmatprep.subr.bf16.mxu1 %v5193_v22  ;;  %v5510_v14 = vld [vmem:[#allocation2 + $0x80] ss:$16 sps:$4 sm:$0xff]   ;;  %v5513_v22 = vld [vmem:[#allocation2 + $0x88] ss:$16 sps:$4 sm:$0xff]  }
 0x75e   :  { %2565 = vmatpush1.bf16.msra.mxu0 %v5196_v33  ;;  %2606 = vmatpush1.bf16.msra.mxu1 %v5199_v36  ;;  %v5516_v33 = vld [vmem:[#allocation2 + $0x64] ss:$16 sps:$4 sm:$0xff]   ;;  %v5519_v36 = vld [vmem:[#allocation2 + $0x6c] ss:$16 sps:$4 sm:$0xff]  }
 0x75f   :  { %2566 = vmatprep.subr.bf16.mxu0 %v6269_v25  ;;  %2607 = vmatprep.subr.bf16.mxu1 %v6270_v62  ;;  %v5543_v25 = vld [vmem:[#allocation2 + $0x2c] ss:$16 sps:$4 sm:$0xff]   ;;  %v5546_v62 = vld [vmem:[#allocation2 + $0x20] ss:$16 sps:$4 sm:$0xff]  }
 0x762   :  { %2567 = vmatpush1.bf16.msra.mxu0 %v6271_v49  ;;  %2608 = vmatpush1.bf16.msra.mxu1 %v6272_v8  ;;  %v5549_v49 = vld [vmem:[#allocation2 + $0x28] ss:$16 sps:$4 sm:$0xff]   ;;  %v5552_v8 = vld [vmem:[#allocation2 + $0x4] ss:$16 sps:$4 sm:$0xff]  }
 0x763   :  { %2568 = vmatprep.subr.bf16.mxu0 %v6273_v28  ;;  %2609 = vmatprep.subr.bf16.mxu1 %v6274_v52  ;;  %v5555_v28 = vld [vmem:[#allocation2 + $0xc] ss:$16 sps:$4 sm:$0xff]   ;;  %v5558_v52 = vld [vmem:[#allocation2] ss:$16 sps:$4 sm:$0xff]  }
 0x766   :  { %2569 = vmatpush1.bf16.msra.mxu0 %v5220_v1  ;;  %2610 = vmatpush1.bf16.msra.mxu1 %v5223_v39  ;;  %v5522_v1 = vld [vmem:[#allocation2 + $0x60] ss:$16 sps:$4 sm:$0xff]   ;;  %v5525_v39 = vld [vmem:[#allocation2 + $0x68] ss:$16 sps:$4 sm:$0xff]  }
 0x767   :  { %2570 = vmatprep.subr.bf16.mxu0 %v5226_v26  ;;  %2611 = vmatprep.subr.bf16.mxu1 %v5229_v63  ;;  %v5528_v26 = vld [vmem:[#allocation2 + $0x44] ss:$16 sps:$4 sm:$0xff]   ;;  %v5531_v63 = vld [vmem:[#allocation2 + $0x4c] ss:$16 sps:$4 sm:$0xff]  }
 0x76a   :  { %2571 = vmatpush1.bf16.msra.mxu0 %v5232_v12  ;;  %2612 = vmatpush1.bf16.msra.mxu1 %v5235_v24  ;;  %v5534_v12 = vld [vmem:[#allocation2 + $0x40] ss:$16 sps:$4 sm:$0xff]   ;;  %v5537_v24 = vld [vmem:[#allocation2 + $0x48] ss:$16 sps:$4 sm:$0xff]  }
 0x76b   :  { %2689 = vmatprep.subr.bf16.mxu0 %v5468_v15  ;;  %2730 = vmatprep.subr.bf16.mxu1 %v5471_v19 }
 0x76d   :  { %2589 = vmatmul.mubr.bf16.vlgmr.msra.gmra.mxu0 %v2445_v41  ;;  %2630 = vmatmul.mubr.bf16.vlgmr.msra.gmra.mxu1 %v2445_v41  ;;  %v5624_v41 = vld [vmem:[#allocation2 + $0x144] ss:$16 sps:$4 sm:$0xff]  }
 0x76e   :  { %2690 = vmatpush1.bf16.msra.mxu0 %v5474_v17  ;;  %2731 = vmatpush1.bf16.msra.mxu1 %v5477_v4  ;;  %6348 = vst [vmem:[#allocation80_spill] sm:$0xff] %v5624_v41 }
 0x76f   :  { %2691 = vmatprep.subr.bf16.mxu0 %v5480_v13  ;;  %2732 = vmatprep.subr.bf16.mxu1 %v5483_v3 }
 0x772   :  { %2692 = vmatpush1.bf16.msra.mxu0 %v5486_v9  ;;  %2733 = vmatpush1.bf16.msra.mxu1 %v5489_v60 }
 0x773   :  { %2693 = vmatprep.subr.bf16.mxu0 %v5492_v21  ;;  %2734 = vmatprep.subr.bf16.mxu1 %v5495_v44 }
 0x776   :  { %2694 = vmatpush1.bf16.msra.mxu0 %v5498_v2  ;;  %2735 = vmatpush1.bf16.msra.mxu1 %v5501_v5 }
 0x777   :  { %2695 = vmatprep.subr.bf16.mxu0 %v5504_v23  ;;  %2736 = vmatprep.subr.bf16.mxu1 %v5507_v58 }
 0x77a   :  { %2696 = vmatpush1.bf16.msra.mxu0 %v5510_v14  ;;  %2737 = vmatpush1.bf16.msra.mxu1 %v5513_v22 }
 0x77b   :  { %2697 = vmatprep.subr.bf16.mxu0 %v5516_v33  ;;  %2738 = vmatprep.subr.bf16.mxu1 %v5519_v36 }
 0x77e   :  { %2698 = vmatpush1.bf16.msra.mxu0 %v5522_v1  ;;  %2739 = vmatpush1.bf16.msra.mxu1 %v5525_v39 }
 0x77f   :  { %2699 = vmatprep.subr.bf16.mxu0 %v5528_v26  ;;  %2740 = vmatprep.subr.bf16.mxu1 %v5531_v63 }
 0x782   :  { %2700 = vmatpush1.bf16.msra.mxu0 %v5534_v12  ;;  %2741 = vmatpush1.bf16.msra.mxu1 %v5537_v24 }
 0x783   :  { %2701 = vmatprep.subr.bf16.mxu0 %v5540_v43  ;;  %2742 = vmatprep.subr.bf16.mxu1 %v5543_v25 }
 0x786   :  { %2702 = vmatpush1.bf16.msra.mxu0 %v5546_v62  ;;  %2743 = vmatpush1.bf16.msra.mxu1 %v5549_v49 }
 0x787   :  { %2703 = vmatprep.subr.bf16.mxu0 %v5552_v8  ;;  %2744 = vmatprep.subr.bf16.mxu1 %v5555_v28 }
 0x78a   :  { %2704 = vmatpush1.bf16.msra.mxu0 %v5558_v52  ;;  %2745 = vmatpush1.bf16.msra.mxu1 %v5561_v61 }
 0x78b   :  { %2705 = vmatprep.subr.bf16.mxu0 %v5564_v31  ;;  %2746 = vmatprep.subr.bf16.mxu1 %v5567_v46 }
 0x78e   :  { %2706 = vmatpush2.bf16.msra.mxu0 %v5570_v34  ;;  %2747 = vmatpush2.bf16.msra.mxu1 %v5573_v29 }
 0x78f   :  { %2707 = vmatprep.subr.bf16.mxu0 %v5576_v6  ;;  %2748 = vmatprep.subr.bf16.mxu1 %v5579_v30 }
 0x792   :  { %2708 = vmatpush2.bf16.msra.mxu0 %v5582_v18  ;;  %2749 = vmatpush2.bf16.msra.mxu1 %v5585_v40 }
 0x793   :  { %2709 = vmatprep.subr.bf16.mxu0 %v5588_v37  ;;  %2750 = vmatprep.subr.bf16.mxu1 %v5591_v11 }
 0x796   :  { %2710 = vmatpush2.bf16.msra.mxu0 %v5594_v7  ;;  %2751 = vmatpush2.bf16.msra.mxu1 %v5597_v42 }
 0x797   :  { %2711 = vmatprep.subr.bf16.mxu0 %v5600_v50  ;;  %2752 = vmatprep.subr.bf16.mxu1 %v5603_v20 }
 0x79a   :  { %2712 = vmatpush2.bf16.msra.mxu0 %v5606_v57  ;;  %2753 = vmatpush2.bf16.msra.mxu1 %v5609_v48  ;;  %v5627_v48 = vld [vmem:[#allocation2 + $0x14c] ss:$16 sps:$4 sm:$0xff]  }
 0x79b   :  { %2713 = vmatprep.subr.bf16.mxu0 %v5612_v47  ;;  %2754 = vmatprep.subr.bf16.mxu1 %v5615_v16  ;;  %6349 = vst [vmem:[#allocation75_spill] sm:$0xff] %v5627_v48  ;;  %v5630_v47 = vld [vmem:[#allocation2 + $0x140] ss:$16 sps:$4 sm:$0xff]   ;;  %v5633_v16 = vld [vmem:[#allocation2 + $0x148] ss:$16 sps:$4 sm:$0xff]  }
 0x79c   :  { %6350 = vst [vmem:[#allocation81_spill] sm:$0xff] %v5630_v47  ;;  %6351 = vst [vmem:[#allocation79_spill] sm:$0xff] %v5633_v16  ;;  %v4083_v57 = vld [vmem:[#allocation10 + $0xec] ss:$16 sps:$4 sm:$0xff]  }
 0x79e   :  { %2714 = vmatpush2.bf16.msra.mxu0 %v5618_v51  ;;  %2755 = vmatpush2.bf16.msra.mxu1 %v5621_v56  ;;  %v5636_v51 = vld [vmem:[#allocation2 + $0x124] ss:$16 sps:$4 sm:$0xff]   ;;  %v5639_v56 = vld [vmem:[#allocation2 + $0x12c] ss:$16 sps:$4 sm:$0xff]  }
 0x79f   :  { %2715 = vmatprep.subr.bf16.mxu0 %v5624_v41  ;;  %2756 = vmatprep.subr.bf16.mxu1 %v5627_v48  ;;  %6352 = vst [vmem:[#allocation82_spill] sm:$0xff] %v5636_v51  ;;  %6353 = vst [vmem:[#allocation88_spill] sm:$0xff] %v5639_v56  ;;  %v5642_v41 = vld [vmem:[#allocation2 + $0x120] ss:$16 sps:$4 sm:$0xff]   ;;  %v5645_v48 = vld [vmem:[#allocation2 + $0x128] ss:$16 sps:$4 sm:$0xff]  }
 0x7a0   :  { %6354 = vst [vmem:[#allocation83_spill] sm:$0xff] %v5642_v41  ;;  %6355 = vst [vmem:[#allocation89_spill] sm:$0xff] %v5645_v48 }
 0x7a2   :  { %2716 = vmatpush2.bf16.msra.mxu0 %v5630_v47  ;;  %2757 = vmatpush2.bf16.msra.mxu1 %v5633_v16  ;;  %v5648_v47 = vld [vmem:[#allocation2 + $0x104] ss:$16 sps:$4 sm:$0xff]   ;;  %v5651_v16 = vld [vmem:[#allocation2 + $0x10c] ss:$16 sps:$4 sm:$0xff]  }
 0x7a3   :  { %2717 = vmatprep.subr.bf16.mxu0 %v5636_v51  ;;  %2758 = vmatprep.subr.bf16.mxu1 %v5639_v56  ;;  %6356 = vst [vmem:[#allocation86_spill] sm:$0xff] %v5648_v47  ;;  %6357 = vst [vmem:[#allocation87_spill] sm:$0xff] %v5651_v16  ;;  %v5654_v51 = vld [vmem:[#allocation2 + $0x100] ss:$16 sps:$4 sm:$0xff]   ;;  %v5657_v56 = vld [vmem:[#allocation2 + $0x108] ss:$16 sps:$4 sm:$0xff]  }
 0x7a4   :  { %6358 = vst [vmem:[#allocation92_spill] sm:$0xff] %v5654_v51  ;;  %6359 = vst [vmem:[#allocation90_spill] sm:$0xff] %v5657_v56 }
 0x7a6   :  { %2718 = vmatpush2.bf16.msra.mxu0 %v5642_v41  ;;  %2759 = vmatpush2.bf16.msra.mxu1 %v5645_v48  ;;  %v4082_v41 = vld [vmem:[#allocation10 + $0xe4] ss:$16 sps:$4 sm:$0xff]  }
 0x7a7   :  { %2719 = vmatprep.subr.bf16.mxu0 %v5648_v47  ;;  %2760 = vmatprep.subr.bf16.mxu1 %v5651_v16 }
 0x7aa   :  { %2720 = vmatpush2.bf16.msra.mxu0 %v5654_v51  ;;  %2761 = vmatpush2.bf16.msra.mxu1 %v5657_v56 }
 0x7ab   :  { %2796 = vmatprep.subr.bf16.mxu0 %v4082_v41  ;;  %2837 = vmatprep.subr.bf16.mxu1 %v4083_v57 }
 0x80d   :  { %v2483_v48 = vpop.f32.mrf.mxu0  ;;  %v2524_v20 = vpop.f32.mrf.mxu1 }
 0x80e   :  { %v2484_v47 = vadd.f32 %v2483_v48, %v6326_v54  ;;  %v2525_v41 = vadd.f32 %v2524_v20, %v6328_v45 }
 0x80f   :  { %v2485_v50 = vpop.f32.mrf.mxu0  ;;  %v2526_v42 = vpop.f32.mrf.mxu1 }
 0x810   :  { %v3371_v7 = vmul.f32 -1.442695, %v2484_v47  ;;  %v2486_v16 = vadd.f32 %v2485_v50, %v6327_v32  ;;  %v3373_v56 = vmul.f32 -1.442695, %v2525_v41  ;;  %v2527_v30 = vadd.f32 %v2526_v42, %v6329_v35 }
 0x811   :  { %v2487_v11 = vpop.f32.mrf.mxu0  ;;  %v2528_v37 = vpop.f32.mrf.mxu1 }
 0x812   :  { %3842 = vpow2.f32 %v3371_v7  ;;  %v3372_v51 = vmul.f32 -1.442695, %v2486_v16 }
 0x813   :  { %v2488_v40 = vpop.f32.mrf.mxu0  ;;  %v2529_v18 = vpop.f32.mrf.mxu1 }
 0x814   :  { %3844 = vpow2.f32 %v3372_v51 }
 0x815   :  { %3846 = vpow2.f32 %v3373_v56 }
 0x81f   :  { %v3843_v57 = vpop.eup %3842 }
 0x820   :  { %v2540_v6 = vadd.f32 1.0, %v3843_v57 }
 0x821   :  { %v3845_v48 = vpop.eup %3844 }
 0x822   :  { %3848 = vrcp.f32 %v2540_v6  ;;  %v2541_v47 = vadd.f32 1.0, %v3845_v48  ;;  %v3847_v7 = vpop.eup %3846 }
 0x823   :  { %3850 = vtanh.f32 %v2527_v30  ;;  %v2542_v42 = vadd.f32 1.0, %v3847_v7 }
 0x824   :  { %3852 = vrcp.f32 %v2541_v47 }
 0x82d   :  { %v2590_v11 = vpop.f32.mrf.mxu0  ;;  %v2631_v37 = vpop.f32.mrf.mxu1 }
 0x82e   :  { %v2642_v50 = vrot.slane %v2590_v11, 4 }
 0x82f   :  { %v3849_v40 = vpop.eup %3848  ;;  %v2592_v18 = vpop.f32.mrf.mxu0 }
 0x830   :  { %v2633_v16 = vpop.f32.mrf.mxu1  ;;  %v3851_v51 = vpop.eup %3850  ;;  %v2650_v20 = vadd.f32 %v2642_v50, %v6330_v38  ;;  %v2643_v41 = vrot.slane %v2592_v18, 4  ;;  %v2644_v50 = vrot.slane %v2631_v37, 4 }
 0x831   :  { %v3853_v45 = vpop.eup %3852  ;;  %v2594_v57 = vpop.f32.mrf.mxu0  ;;  %v2551_v56 = vmul.f32 %v3851_v51, %v3849_v40 }
 0x832   :  { %v2635_v35 = vpop.f32.mrf.mxu1  ;;  %v2550_v6 = vmul.f32 %v3853_v45, %v5427_v0  ;;  %v3374_v30 = vmul.f32 -1.442695, %v2650_v20  ;;  %v2651_v48 = vadd.f32 %v2643_v41, %v6331_v59  ;;  %v2652_v7 = vadd.f32 %v2644_v50, %v6267_v55 }
 0x833   :  { %v2595_v47 = vpop.f32.mrf.mxu0  ;;  %v2645_v35 = vrot.slane %v2633_v16, 4 }
 0x834   :  { %v2636_v32 = vpop.f32.mrf.mxu1  ;;  %v5667_v11 = vadd.f32 %v2551_v56, %v2550_v6  ;;  %3854 = vpow2.f32 %v3374_v30  ;;  %v3375_v54 = vmul.f32 -1.442695, %v2651_v48  ;;  %v3376_v18 = vmul.f32 -1.442695, %v2652_v7 }
 0x835   :  { %3856 = vrcp.f32 %v2542_v42  ;;  %v2653_v51 = vadd.f32 %v2645_v35, %v6268_v53  ;;  %v2674_v30 = vrot.slane %v5433_v27, 6  ;;  %v4084_v27 = vld [vmem:[#allocation10 + $0xe0] ss:$16 sps:$4 sm:$0xff]  }
 0x836   :  { %3858 = vtanh.f32 %v5667_v11 }
 0x837   :  { %3860 = vpow2.f32 %v3375_v54 }
 0x838   :  { %3862 = vpow2.f32 %v3376_v18 }
 0x841   :  { %v3855_v45 = vpop.eup %3854 }
 0x842   :  { %v3857_v0 = vpop.eup %3856  ;;  %v2663_v40 = vadd.f32 1.0, %v3855_v45 }
 0x843   :  { %v3859_v20 = vpop.eup %3858 }
 0x844   :  { %v3861_v32 = vpop.eup %3860  ;;  %v2554_v41 = vmul.f32 %v3859_v20, %v3857_v0  ;;  %3864 = vrcp.f32 %v2663_v40  ;;  %v4085_v20 = vld [vmem:[#allocation10 + $0xe8] ss:$16 sps:$4 sm:$0xff]  }
 0x845   :  { %v2664_v57 = vadd.f32 1.0, %v3861_v32  ;;  %3866 = vtanh.f32 %v2653_v51  ;;  %v3863_v16 = vpop.eup %3862  ;;  %v4086_v32 = vld [vmem:[#allocation10 + $0xc4] ss:$16 sps:$4 sm:$0xff]  }
 0x846   :  { %v2555_v42 = vpack.c.bf16 %v2554_v41, %v2554_v41  ;;  %v2665_v47 = vadd.f32 1.0, %v3863_v16  ;;  %v4087_v41 = vld [vmem:[#allocation10 + $0xcc] ss:$16 sps:$4 sm:$0xff]   ;;  %v4092_v16 = vld [vmem:[#allocation10 + $0xa0] ss:$16 sps:$4 sm:$0xff]  }
 0x847   :  { %3868 = vrcp.f32 %v2664_v57  ;;  %v4088_v57 = vld [vmem:[#allocation10 + $0xc0] ss:$16 sps:$4 sm:$0xff]  }
 0x848   :  { %v2683_v54 = vrot.slane %v2555_v42, 6  ;;  %3870 = vrcp.f32 %v2665_v47  ;;  %v4089_v42 = vld [vmem:[#allocation10 + $0xc8] ss:$16 sps:$4 sm:$0xff]  }
 0x849   :  { %v4097_v47 = vld [vmem:[#allocation10 + $0x88] ss:$16 sps:$4 sm:$0xff]  }
 0x84a   :  { %v2686_v37 = vrot.slane %v2683_v54, 2  ;;  %v4090_v54 = vld [vmem:[#allocation10 + $0xa4] ss:$16 sps:$4 sm:$0xff]  }
 0x84c   :  { %2721 = vmatprep.mubr.bf16.mxu0 %v2686_v37  ;;  %2762 = vmatprep.mubr.bf16.mxu1 %v2686_v37  ;;  %v4091_v37 = vld [vmem:[#allocation10 + $0xac] ss:$16 sps:$4 sm:$0xff]  }
 0x851   :  { %v3865_v6 = vpop.eup %3864 }
 0x852   :  { %v3867_v56 = vpop.eup %3866 }
 0x853   :  { %v2677_v7 = vmul.f32 %v3867_v56, %v3865_v6  ;;  %v4093_v6 = vld [vmem:[#allocation10 + $0xa8] ss:$16 sps:$4 sm:$0xff]   ;;  %v4094_v56 = vld [vmem:[#allocation10 + $0x84] ss:$16 sps:$4 sm:$0xff]  }
 0x854   :  { %v3869_v48 = vpop.eup %3868 }
 0x855   :  { %v2676_v50 = vmul.f32 %v3869_v48, %v2674_v30  ;;  %v3871_v18 = vpop.eup %3870  ;;  %v4095_v30 = vld [vmem:[#allocation10 + $0x8c] ss:$16 sps:$4 sm:$0xff]   ;;  %v4096_v48 = vld [vmem:[#allocation10 + $0x80] ss:$16 sps:$4 sm:$0xff]  }
 0x857   :  { %v5673_v35 = vadd.f32 %v2677_v7, %v2676_v50  ;;  %v4099_v50 = vld [vmem:[#allocation10 + $0x6c] ss:$16 sps:$4 sm:$0xff]   ;;  %v4100_v7 = vld [vmem:[#allocation10 + $0x60] ss:$16 sps:$4 sm:$0xff]  }
 0x859   :  { %3872 = vtanh.f32 %v5673_v35 }
 0x866   :  { %v3873_v45 = vpop.eup %3872 }
 0x867   :  { %v2680_v0 = vmul.f32 %v3873_v45, %v3871_v18  ;;  %v4101_v18 = vld [vmem:[#allocation10 + $0x68] ss:$16 sps:$4 sm:$0xff]   ;;  %v4102_v45 = vld [vmem:[#allocation10 + $0x44] ss:$16 sps:$4 sm:$0xff]  }
 0x869   :  { %v2681_v40 = vpack.c.bf16 %v2680_v0, %v2680_v0  ;;  %v4103_v0 = vld [vmem:[#allocation10 + $0x4c] ss:$16 sps:$4 sm:$0xff]  }
 0x86b   :  { %v5676_v51 = vrot.slane %v2681_v40, 2  ;;  %v4104_v40 = vld [vmem:[#allocation10 + $0x40] ss:$16 sps:$4 sm:$0xff]  }
 0x86d   :  { %2722 = vmatmul.mubr.bf16.vlgmr.msra.gmra.mxu0 %v5676_v51  ;;  %2763 = vmatmul.mubr.bf16.vlgmr.msra.gmra.mxu1 %v5676_v51 }
 0x86e   :  { %2797 = vmatpush1.bf16.msra.mxu0 %v4084_v27  ;;  %2838 = vmatpush1.bf16.msra.mxu1 %v4085_v20  ;;  %v4105_v27 = vld [vmem:[#allocation10 + $0x48] ss:$16 sps:$4 sm:$0xff]   ;;  %v4106_v20 = vld [vmem:[#allocation10 + $0x24] ss:$16 sps:$4 sm:$0xff]  }
 0x86f   :  { %2798 = vmatprep.subr.bf16.mxu0 %v4086_v32  ;;  %2839 = vmatprep.subr.bf16.mxu1 %v4087_v41  ;;  %v4107_v32 = vld [vmem:[#allocation10 + $0x2c] ss:$16 sps:$4 sm:$0xff]   ;;  %v4108_v41 = vld [vmem:[#allocation10 + $0x20] ss:$16 sps:$4 sm:$0xff]  }
 0x870   :  { %2828 = vmatprep.mubr.bf16.mxu0 %v6067_v10  ;;  %2869 = vmatprep.mubr.bf16.mxu1 %v6067_v10  ;;  %v4098_v10 = vld [vmem:[#allocation10 + $0x64] ss:$16 sps:$4 sm:$0xff]  }
 0x872   :  { %2799 = vmatpush1.bf16.msra.mxu0 %v4088_v57  ;;  %2840 = vmatpush1.bf16.msra.mxu1 %v4089_v42  ;;  %v4109_v57 = vld [vmem:[#allocation10 + $0x28] ss:$16 sps:$4 sm:$0xff]   ;;  %v4110_v42 = vld [vmem:[#allocation10 + $0x4] ss:$16 sps:$4 sm:$0xff]  }
 0x873   :  { %2800 = vmatprep.subr.bf16.mxu0 %v4090_v54  ;;  %2841 = vmatprep.subr.bf16.mxu1 %v4091_v37  ;;  %v4111_v54 = vld [vmem:[#allocation10 + $0xc] ss:$16 sps:$4 sm:$0xff]   ;;  %v4112_v37 = vld [vmem:[#allocation10] ss:$16 sps:$4 sm:$0xff]  }
 0x876   :  { %2801 = vmatpush1.bf16.msra.mxu0 %v4092_v16  ;;  %2842 = vmatpush1.bf16.msra.mxu1 %v4093_v6  ;;  %v4113_v16 = vld [vmem:[#allocation10 + $0x8] ss:$16 sps:$4 sm:$0xff]  }
 0x877   :  { %2802 = vmatprep.subr.bf16.mxu0 %v4094_v56  ;;  %2843 = vmatprep.subr.bf16.mxu1 %v4095_v30 }
 0x87a   :  { %2803 = vmatpush1.bf16.msra.mxu0 %v4096_v48  ;;  %2844 = vmatpush1.bf16.msra.mxu1 %v4097_v47 }
 0x87b   :  { %2804 = vmatprep.subr.bf16.mxu0 %v4098_v10  ;;  %2845 = vmatprep.subr.bf16.mxu1 %v4099_v50  ;;  %v6390_v10 = vld [vmem:[#allocation28_spill] sm:$0xff] }
 0x87e   :  { %2805 = vmatpush1.bf16.msra.mxu0 %v4100_v7  ;;  %2846 = vmatpush1.bf16.msra.mxu1 %v4101_v18 }
 0x87f   :  { %2806 = vmatprep.subr.bf16.mxu0 %v4102_v45  ;;  %2847 = vmatprep.subr.bf16.mxu1 %v4103_v0  ;;  %v6391_v45 = vld [vmem:[#allocation29_spill] sm:$0xff] }
 0x882   :  { %2807 = vmatpush1.bf16.msra.mxu0 %v4104_v40  ;;  %2848 = vmatpush1.bf16.msra.mxu1 %v4105_v27 }
 0x883   :  { %2808 = vmatprep.subr.bf16.mxu0 %v4106_v20  ;;  %2849 = vmatprep.subr.bf16.mxu1 %v4107_v32 }
 0x886   :  { %2809 = vmatpush1.bf16.msra.mxu0 %v4108_v41  ;;  %2850 = vmatpush1.bf16.msra.mxu1 %v4109_v57 }
 0x887   :  { %2810 = vmatprep.subr.bf16.mxu0 %v4110_v42  ;;  %2851 = vmatprep.subr.bf16.mxu1 %v4111_v54 }
 0x88a   :  { %2811 = vmatpush1.bf16.msra.mxu0 %v4112_v37  ;;  %2852 = vmatpush1.bf16.msra.mxu1 %v4113_v16 }
 0x88b   :  { %2929 = vmatprep.subr.bf16.mxu0 %v5468_v15  ;;  %2970 = vmatprep.subr.bf16.mxu1 %v5471_v19  ;;  %v6360_v15 = vld [vmem:[#allocation84_spill] sm:$0xff]  ;;  %v6361_v19 = vld [vmem:[#allocation85_spill] sm:$0xff] }
 0x88d   :  { %2829 = vmatmul.mubr.bf16.vlgmr.msra.gmra.mxu0 %v5676_v51  ;;  %2870 = vmatmul.mubr.bf16.vlgmr.msra.gmra.mxu1 %v5676_v51 }
 0x88e   :  { %2930 = vmatpush1.bf16.msra.mxu0 %v5474_v17  ;;  %2971 = vmatpush1.bf16.msra.mxu1 %v5477_v4  ;;  %v6362_v17 = vld [vmem:[#allocation33_spill] sm:$0xff]  ;;  %v6363_v4 = vld [vmem:[#allocation35_spill] sm:$0xff] }
 0x88f   :  { %2931 = vmatprep.subr.bf16.mxu0 %v5480_v13  ;;  %2972 = vmatprep.subr.bf16.mxu1 %v5483_v3  ;;  %v6364_v13 = vld [vmem:[#allocation73_spill] sm:$0xff]  ;;  %v6365_v3 = vld [vmem:[#allocation32_spill] sm:$0xff] }
 0x892   :  { %2932 = vmatpush1.bf16.msra.mxu0 %v5486_v9  ;;  %2973 = vmatpush1.bf16.msra.mxu1 %v5489_v60  ;;  %v6366_v9 = vld [vmem:[#allocation34_spill] sm:$0xff]  ;;  %v6367_v60 = vld [vmem:[#allocation36_spill] sm:$0xff] }
 0x893   :  { %2933 = vmatprep.subr.bf16.mxu0 %v5492_v21  ;;  %2974 = vmatprep.subr.bf16.mxu1 %v5495_v44  ;;  %v6368_v21 = vld [vmem:[#allocation37_spill] sm:$0xff]  ;;  %v6369_v44 = vld [vmem:[#allocation78_spill] sm:$0xff] }
 0x896   :  { %2934 = vmatpush1.bf16.msra.mxu0 %v5498_v2  ;;  %2975 = vmatpush1.bf16.msra.mxu1 %v5501_v5  ;;  %v6370_v2 = vld [vmem:[#allocation38_spill] sm:$0xff] }
 0x897   :  { %2935 = vmatprep.subr.bf16.mxu0 %v5504_v23  ;;  %2976 = vmatprep.subr.bf16.mxu1 %v5507_v58  ;;  %v6371_v5 = vld [vmem:[#allocation70_spill] sm:$0xff]  ;;  %v6372_v23 = vld [vmem:[#allocation76_spill] sm:$0xff]  ;;  %v6373_v58 = vld [vmem:[#allocation71_spill] sm:$0xff] }
 0x89a   :  { %2936 = vmatpush1.bf16.msra.mxu0 %v5510_v14  ;;  %2977 = vmatpush1.bf16.msra.mxu1 %v5513_v22  ;;  %v6374_v14 = vld [vmem:[#allocation77_spill] sm:$0xff]  ;;  %v6375_v22 = vld [vmem:[#allocation74_spill] sm:$0xff] }
 0x89b   :  { %2937 = vmatprep.subr.bf16.mxu0 %v5516_v33  ;;  %2978 = vmatprep.subr.bf16.mxu1 %v5519_v36  ;;  %v6376_v33 = vld [vmem:[#allocation80_spill] sm:$0xff]  ;;  %v6377_v36 = vld [vmem:[#allocation75_spill] sm:$0xff] }
 0x89e   :  { %2938 = vmatpush1.bf16.msra.mxu0 %v5522_v1  ;;  %2979 = vmatpush1.bf16.msra.mxu1 %v5525_v39  ;;  %v6378_v1 = vld [vmem:[#allocation81_spill] sm:$0xff]  ;;  %v6379_v39 = vld [vmem:[#allocation79_spill] sm:$0xff] }
 0x89f   :  { %2939 = vmatprep.subr.bf16.mxu0 %v5528_v26  ;;  %2980 = vmatprep.subr.bf16.mxu1 %v5531_v63  ;;  %v6380_v26 = vld [vmem:[#allocation82_spill] sm:$0xff]  ;;  %v6381_v63 = vld [vmem:[#allocation88_spill] sm:$0xff] }
 0x8a2   :  { %2940 = vmatpush1.bf16.msra.mxu0 %v5534_v12  ;;  %2981 = vmatpush1.bf16.msra.mxu1 %v5537_v24  ;;  %v6382_v12 = vld [vmem:[#allocation83_spill] sm:$0xff]  ;;  %v6383_v24 = vld [vmem:[#allocation89_spill] sm:$0xff] }
 0x8a3   :  { %2941 = vmatprep.subr.bf16.mxu0 %v5540_v43  ;;  %2982 = vmatprep.subr.bf16.mxu1 %v5543_v25  ;;  %v6384_v43 = vld [vmem:[#allocation86_spill] sm:$0xff]  ;;  %v6385_v25 = vld [vmem:[#allocation87_spill] sm:$0xff] }
 0x8a6   :  { %2942 = vmatpush1.bf16.msra.mxu0 %v5546_v62  ;;  %2983 = vmatpush1.bf16.msra.mxu1 %v5549_v49  ;;  %v6386_v62 = vld [vmem:[#allocation92_spill] sm:$0xff]  ;;  %v6387_v49 = vld [vmem:[#allocation90_spill] sm:$0xff] }
 0x8a7   :  { %2943 = vmatprep.subr.bf16.mxu0 %v5552_v8  ;;  %2984 = vmatprep.subr.bf16.mxu1 %v5555_v28 }
 0x8aa   :  { %2944 = vmatpush1.bf16.msra.mxu0 %v5558_v52  ;;  %2985 = vmatpush1.bf16.msra.mxu1 %v5561_v61  ;;  %v6388_v52 = vld [vmem:[#allocation26_spill] sm:$0xff] }
 0x8ab   :  { %2945 = vmatprep.subr.bf16.mxu0 %v5564_v31  ;;  %2986 = vmatprep.subr.bf16.mxu1 %v5567_v46 }
 0x8ae   :  { %2946 = vmatpush2.bf16.msra.mxu0 %v5570_v34  ;;  %2987 = vmatpush2.bf16.msra.mxu1 %v5573_v29  ;;  %v6389_v29 = vld [vmem:[#allocation27_spill] sm:$0xff] }
 0x8af   :  { %2947 = vmatprep.subr.bf16.mxu0 %v6360_v15  ;;  %2988 = vmatprep.subr.bf16.mxu1 %v6361_v19 }
 0x8b2   :  { %2948 = vmatpush2.bf16.msra.mxu0 %v6362_v17  ;;  %2989 = vmatpush2.bf16.msra.mxu1 %v6363_v4 }
 0x8b3   :  { %2949 = vmatprep.subr.bf16.mxu0 %v6364_v13  ;;  %2990 = vmatprep.subr.bf16.mxu1 %v6365_v3 }
 0x8b6   :  { %2950 = vmatpush2.bf16.msra.mxu0 %v6366_v9  ;;  %2991 = vmatpush2.bf16.msra.mxu1 %v6367_v60 }
 0x8b7   :  { %2951 = vmatprep.subr.bf16.mxu0 %v6368_v21  ;;  %2992 = vmatprep.subr.bf16.mxu1 %v6369_v44 }
 0x8ba   :  { %2952 = vmatpush2.bf16.msra.mxu0 %v6370_v2  ;;  %2993 = vmatpush2.bf16.msra.mxu1 %v6371_v5 }
 0x8bb   :  { %2953 = vmatprep.subr.bf16.mxu0 %v6372_v23  ;;  %2994 = vmatprep.subr.bf16.mxu1 %v6373_v58 }
 0x8be   :  { %2954 = vmatpush2.bf16.msra.mxu0 %v6374_v14  ;;  %2995 = vmatpush2.bf16.msra.mxu1 %v6375_v22 }
 0x8bf   :  { %2955 = vmatprep.subr.bf16.mxu0 %v6376_v33  ;;  %2996 = vmatprep.subr.bf16.mxu1 %v6377_v36 }
 0x8c2   :  { %2956 = vmatpush2.bf16.msra.mxu0 %v6378_v1  ;;  %2997 = vmatpush2.bf16.msra.mxu1 %v6379_v39 }
 0x8c3   :  { %2957 = vmatprep.subr.bf16.mxu0 %v6380_v26  ;;  %2998 = vmatprep.subr.bf16.mxu1 %v6381_v63 }
 0x8c6   :  { %2958 = vmatpush2.bf16.msra.mxu0 %v6382_v12  ;;  %2999 = vmatpush2.bf16.msra.mxu1 %v6383_v24 }
 0x8c7   :  { %2959 = vmatprep.subr.bf16.mxu0 %v6384_v43  ;;  %3000 = vmatprep.subr.bf16.mxu1 %v6385_v25 }
 0x8ca   :  { %2960 = vmatpush2.bf16.msra.mxu0 %v6386_v62  ;;  %3001 = vmatpush2.bf16.msra.mxu1 %v6387_v49 }
 0x92d   :  { %v2723_v8 = vpop.f32.mrf.mxu0  ;;  %v2764_v28 = vpop.f32.mrf.mxu1 }
 0x92e   :  { %v2724_v61 = vadd.f32 %v2723_v8, %v6388_v52  ;;  %v2765_v50 = vadd.f32 %v2764_v28, %v6390_v10  ;;  %v2914_v28 = vrot.slane %v5673_v35, 6 }
 0x92f   :  { %v2725_v31 = vpop.f32.mrf.mxu0  ;;  %v2766_v46 = vpop.f32.mrf.mxu1 }
 0x930   :  { %v3377_v34 = vmul.f32 -1.442695, %v2724_v61  ;;  %v2726_v51 = vadd.f32 %v2725_v31, %v6389_v29  ;;  %v3379_v7 = vmul.f32 -1.442695, %v2765_v50  ;;  %v2767_v0 = vadd.f32 %v2766_v46, %v6391_v45 }
 0x931   :  { %v2727_v6 = vpop.f32.mrf.mxu0  ;;  %v2768_v56 = vpop.f32.mrf.mxu1 }
 0x932   :  { %3874 = vpow2.f32 %v3377_v34  ;;  %v3378_v30 = vmul.f32 -1.442695, %v2726_v51 }
 0x933   :  { %v2728_v48 = vpop.f32.mrf.mxu0  ;;  %v2769_v47 = vpop.f32.mrf.mxu1 }
 0x934   :  { %3876 = vpow2.f32 %v3378_v30 }
 0x935   :  { %3878 = vpow2.f32 %v3379_v7 }
 0x93f   :  { %v3875_v18 = vpop.eup %3874 }
 0x940   :  { %v2780_v40 = vadd.f32 1.0, %v3875_v18 }
 0x941   :  { %v3877_v27 = vpop.eup %3876 }
 0x942   :  { %3880 = vrcp.f32 %v2780_v40  ;;  %v2781_v20 = vadd.f32 1.0, %v3877_v27  ;;  %v3879_v57 = vpop.eup %3878 }
 0x943   :  { %3882 = vtanh.f32 %v2767_v0  ;;  %v2782_v13 = vadd.f32 1.0, %v3879_v57 }
 0x944   :  { %3884 = vrcp.f32 %v2781_v20 }
 0x94d   :  { %v2830_v32 = vpop.f32.mrf.mxu0  ;;  %v2871_v41 = vpop.f32.mrf.mxu1 }
 0x94e   :  { %v2882_v42 = vrot.slane %v2830_v32, 2 }
 0x94f   :  { %v3881_v54 = vpop.eup %3880  ;;  %v2832_v37 = vpop.f32.mrf.mxu0 }
 0x950   :  { %v2873_v16 = vpop.f32.mrf.mxu1  ;;  %v3883_v15 = vpop.eup %3882  ;;  %v2890_v19 = vadd.f32 %v2882_v42, %v6330_v38  ;;  %v2883_v17 = vrot.slane %v2832_v37, 2  ;;  %v2884_v38 = vrot.slane %v2871_v41, 2 }
 0x951   :  { %v3885_v4 = vpop.eup %3884  ;;  %v2834_v3 = vpop.f32.mrf.mxu0  ;;  %v2791_v21 = vmul.f32 %v3883_v15, %v3881_v54  ;;  %v2885_v33 = vrot.slane %v2873_v16, 2 }
 0x952   :  { %v2875_v9 = vpop.f32.mrf.mxu1  ;;  %v2790_v60 = vmul.f32 %v3885_v4, %v5667_v11  ;;  %v3380_v44 = vmul.f32 -1.442695, %v2890_v19  ;;  %v2891_v2 = vadd.f32 %v2883_v17, %v6331_v59  ;;  %v2892_v22 = vadd.f32 %v2884_v38, %v6267_v55 }
 0x953   :  { %v2835_v5 = vpop.f32.mrf.mxu0  ;;  %v2893_v59 = vadd.f32 %v2885_v33, %v6268_v53 }
 0x954   :  { %v2876_v23 = vpop.f32.mrf.mxu1  ;;  %v5755_v58 = vadd.f32 %v2791_v21, %v2790_v60  ;;  %3886 = vpow2.f32 %v3380_v44  ;;  %v3381_v14 = vmul.f32 -1.442695, %v2891_v2  ;;  %v3382_v36 = vmul.f32 -1.442695, %v2892_v22 }
 0x955   :  { %3888 = vrcp.f32 %v2782_v13 }
 0x956   :  { %3890 = vtanh.f32 %v5755_v58 }
 0x957   :  { %3892 = vpow2.f32 %v3381_v14 }
 0x958   :  { %3894 = vpow2.f32 %v3382_v36 }
 0x961   :  { %v3887_v11 = vpop.eup %3886 }
 0x962   :  { %v3889_v1 = vpop.eup %3888  ;;  %v2903_v39 = vadd.f32 1.0, %v3887_v11 }
 0x963   :  { %v3891_v26 = vpop.eup %3890 }
 0x964   :  { %v3893_v63 = vpop.eup %3892  ;;  %v2794_v12 = vmul.f32 %v3891_v26, %v3889_v1  ;;  %3896 = vrcp.f32 %v2903_v39 }
 0x965   :  { %v2904_v24 = vadd.f32 1.0, %v3893_v63  ;;  %3898 = vtanh.f32 %v2893_v59  ;;  %v3895_v55 = vpop.eup %3894 }
 0x966   :  { %v2795_v43 = vpack.c.bf16 %v2794_v12, %v2794_v12  ;;  %v2905_v53 = vadd.f32 1.0, %v3895_v55 }
 0x967   :  { %3900 = vrcp.f32 %v2904_v24 }
 0x968   :  { %v2923_v25 = vrot.slane %v2795_v43, 5  ;;  %3902 = vrcp.f32 %v2905_v53 }
 0x96a   :  { %v2926_v62 = vrot.slane %v2923_v25, 3 }
 0x96c   :  { %2961 = vmatprep.mubr.bf16.mxu0 %v2926_v62  ;;  %3002 = vmatprep.mubr.bf16.mxu1 %v2926_v62 }
 0x971   :  { %v3897_v49 = vpop.eup %3896 }
 0x972   :  { %v3899_v8 = vpop.eup %3898 }
 0x973   :  { %v2917_v46 = vmul.f32 %v3899_v8, %v3897_v49 }
 0x974   :  { %v3901_v61 = vpop.eup %3900 }
 0x975   :  { %v2916_v31 = vmul.f32 %v3901_v61, %v2914_v28  ;;  %v3903_v51 = vpop.eup %3902 }
 0x977   :  { %v2918_v34 = vadd.f32 %v2917_v46, %v2916_v31 }
 0x979   :  { %3904 = vtanh.f32 %v2918_v34 }
 0x986   :  { %v3905_v6 = vpop.eup %3904 }
 0x987   :  { %v2920_v56 = vmul.f32 %v3905_v6, %v3903_v51 }
 0x989   :  { %v2921_v30 = vpack.c.bf16 %v2920_v56, %v2920_v56 }
 0x98b   :  { %v2925_v48 = vrot.slane %v2921_v30, 3 }
 0x98d   :  { %2962 = vmatmul.mubr.bf16.vlgmr.msra.gmra.mxu0 %v2925_v48  ;;  %3003 = vmatmul.mubr.bf16.vlgmr.msra.gmra.mxu1 %v2925_v48 }
 0xa4d   :  { %v2963_v47 = vpop.f32.mrf.mxu0  ;;  %v3004_v50 = vpop.f32.mrf.mxu1 }
 0xa4e   :  { %v2964_v7 = vadd.f32 %v2963_v47, %v6388_v52  ;;  %v3005_v42 = vadd.f32 %v3004_v50, %v6390_v10 }
 0xa4f   :  { %v2965_v18 = vpop.f32.mrf.mxu0  ;;  %v3006_v35 = vpop.f32.mrf.mxu1 }
 0xa50   :  { %v3383_v0 = vmul.f32 -1.442695, %v2964_v7  ;;  %v2966_v40 = vadd.f32 %v2965_v18, %v6389_v29  ;;  %v3385_v54 = vmul.f32 -1.442695, %v3005_v42  ;;  %v3007_v16 = vadd.f32 %v3006_v35, %v6391_v45 }
 0xa51   :  { %v2967_v27 = vpop.f32.mrf.mxu0  ;;  %v3008_v20 = vpop.f32.mrf.mxu1 }
 0xa52   :  { %3906 = vpow2.f32 %v3383_v0  ;;  %v3384_v32 = vmul.f32 -1.442695, %v2966_v40 }
 0xa53   :  { %v2968_v41 = vpop.f32.mrf.mxu0  ;;  %v3009_v57 = vpop.f32.mrf.mxu1 }
 0xa54   :  { %3908 = vpow2.f32 %v3384_v32 }
 0xa55   :  { %3910 = vpow2.f32 %v3385_v54 }
 0xa5f   :  { %v3907_v37 = vpop.eup %3906 }
 0xa60   :  { %v3020_v15 = vadd.f32 1.0, %v3907_v37 }
 0xa61   :  { %v3909_v52 = vpop.eup %3908 }
 0xa62   :  { %3912 = vrcp.f32 %v3020_v15  ;;  %v3021_v19 = vadd.f32 1.0, %v3909_v52  ;;  %v3911_v29 = vpop.eup %3910 }
 0xa63   :  { %3914 = vtanh.f32 %v3007_v16  ;;  %v3022_v3 = vadd.f32 1.0, %v3911_v29 }
 0xa64   :  { %3916 = vrcp.f32 %v3021_v19 }
 0xa65   :  { %3918 = vrcp.f32 %v3022_v3 }
 0xa6f   :  { %v3913_v17 = vpop.eup %3912 }
 0xa70   :  { %v3915_v4 = vpop.eup %3914 }
 0xa71   :  { %v3917_v13 = vpop.eup %3916  ;;  %v3031_v60 = vmul.f32 %v3915_v4, %v3913_v17 }
 0xa72   :  { %v3030_v9 = vmul.f32 %v3917_v13, %v5755_v58  ;;  %v3919_v21 = vpop.eup %3918 }
 0xa74   :  { %v3032_v10 = vadd.f32 %v3031_v60, %v3030_v9 }
 0xa76   :  { %3920 = vtanh.f32 %v3032_v10 }
 0xa83   :  { %v3921_v45 = vpop.eup %3920 }
 0xa84   :  { %v3034_v44 = vmul.f32 %v3921_v45, %v3919_v21 }
 0xa86   :  { %v3035_v2 = vpack.c.bf16 %v3034_v44, %v3034_v44 }
 0xa87   :  { %4270 = dma.done.wait [#allocation4 + $0x1], 1024 }
 0xa88   :  { %4271 = vsyncadd [#allocation4 + $0x1], 4294966272  ;;  %v4285_v5 = vmov 0.0   ;;  %vm4286_vm2 = vmmov 0   ;;  %v4114_v23 = vld [vmem:[#allocation3 + $0x38] sm:$0xff]   ;;  %v4115_v14 = vld [vmem:[#allocation3 + $0x30] sm:$0xff]  }
 0xa89   :  { %3406 = vmatprep.subr.bf16.mxu0 %v4285_v5  ;;  %3422 = vmatprep.mubr.msk.bf16.mxu0 %vm4286_vm2, %v4285_v5  ;;  %v4116_v58 = vld [vmem:[#allocation3 + $0x28] sm:$0xff]   ;;  %v4117_v38 = vld [vmem:[#allocation3 + $0x20] sm:$0xff]   ;;  %v4118_v22 = vld [vmem:[#allocation3 + $0x18] sm:$0xff]   ;;  %s4287_s7 = smov [#allocation13]  }
 0xa8a   :  { %3407 = vmatpush3.bf16.msra.mxu0 %v4114_v23  ;;  %v4119_v33 = vld [vmem:[#allocation3 + $0x10] sm:$0xff]   ;;  %v4120_v36 = vld [vmem:[#allocation3 + $0x8] sm:$0xff]   ;;  %v4121_v11 = vld [vmem:[#allocation3] sm:$0xff]   ;;  %s3158_s15 = sshll.u32 %s4287_s7, 4  ;;  %s3159_s15 = int_to_ptr.vmem [resolvable:$true] %s3158_s15 }
 0xa8b   :  { %3408 = vmatprep.subr.bf16.mxu0 %v4285_v5  ;;  %v3386_v1 = vld [vmem:[%s5777_s5] ss:$0 sm:$0xff]  ;;  %s4242_s16 = scalar_lea.vmem %s3159_s15, 32  ;;  %p4247_p3 = scmp.lt.s32.totalorder %s3159_s15, %s3159_s15 }
 0xa8c   :  { %p4243_p2 = scmp.ne.s32.totalorder %s3159_s15, %s4242_s16  ;;  %p4248_p4 = scmp.lt.s32.totalorder %s4242_s16, %s4242_s16 }
 0xa8e   :  { %3409 = vmatpush3.bf16.msra.mxu0 %v4115_v14  ;;  %p4249_p5 = por %p4248_p4, %p4247_p3 }
 0xa8f   :  { %3410 = vmatprep.subr.bf16.mxu0 %v4285_v5 }
 0xa90   :  { %p4250_p6 = pnand %p4249_p5, %p4243_p2 }
 0xa92   :  { %3411 = vmatpush3.bf16.msra.mxu0 %v4116_v58 }
 0xa93   :  { %3412 = vmatprep.subr.bf16.mxu0 %v4285_v5 }
 0xa96   :  { %3413 = vmatpush3.bf16.msra.mxu0 %v4117_v38 }
 0xa97   :  { %3414 = vmatprep.subr.bf16.mxu0 %v4285_v5 }
 0xa9a   :  { %3415 = vmatpush3.bf16.msra.mxu0 %v4118_v22 }
 0xa9b   :  { %3416 = vmatprep.subr.bf16.mxu0 %v4285_v5 }
 0xa9e   :  { %3417 = vmatpush3.bf16.msra.mxu0 %v4119_v33 }
 0xa9f   :  { %3418 = vmatprep.subr.bf16.mxu0 %v4285_v5 }
 0xaa2   :  { %3419 = vmatpush3.bf16.msra.mxu0 %v4120_v36 }
 0xaa3   :  { %3420 = vmatprep.subr.bf16.mxu0 %v4285_v5 }
 0xaa6   :  { %3421 = vmatpush3.bf16.msra.mxu0 %v4121_v11 }
 0xaa9   :  { %3423 = vmatmul.mubr.bf16.vlgmr.msra.gmra.mxu0 %v3035_v2 }
 0xb69   :  { %v3145_v39 = vpop.f32.mrf.mxu0 }
 0xb6a   :  { %v3146_v59 = vadd.f32 %v3386_v1, %v3145_v39 }
 0xb6b   :  { %v3424_v26 = vpop.f32.mrf.mxu0 }
 0xb6c   :  { %3151 = vst [vmem:[#allocation13] sm:$0x3] %v3146_v59 }
 0xb6d   :  { %v3148_v63 = vpop.f32.mrf.mxu0 }
 0xb6e   :  { %4253 = shalt.err (!%p4250_p6)
}
 0xb6f   :  { %3161 = dma.vmem_to_hbm [thread:$0]  %s3159_s15, 32, %s5780_s8, [#allocation7]   ;;  %v3425_v12 = vpop.f32.mrf.mxu0 }
 0xb70   :  { %4272 = dma.done.wait [#allocation7], 32  }
 0xb71   :  { %4273 = vsyncadd [#allocation7], 4294967264 }
 0xb72   :  { %3165 = vsyncpa [#allocation6], 1 }
 0xb73   :  { %3166 = vsyncpa [#allocation9], 1 }
 0xb74   :  { %3167 = vsyncpa [#allocation12], 1 }
 0xb75   :  { %3168 = vsyncpa [#allocation7], 1 }
 0xb76   :  { %3169 = vsyncmov [#allocation4] }
 0xb79   :  { %s3170_s5 = vpop.sfrf %3169 }
 0xb7a   :  { %p3395_p7 = scmp.ne.s32.totalorder %s3170_s5, 0 }
 0xb7c   :  { %3174 = shalt.err (%p3395_p7)  }
 0xb7d   :  { %3176 = vsyncmov [#allocation4 + $0x1] }
 0xb80   :  { %s3177_s19 = vpop.sfrf %3176 }
 0xb81   :  { %p3396_p8 = scmp.ne.s32.totalorder %s3177_s19, 0 }
 0xb83   :  { %3181 = shalt.err (%p3396_p8)  }

</bundles_post_ra>
